<compile_context>
chip_gen: v6e
topology: v6e:2x2x1
jax: 0.10.0
libtpu: 0.0.40
codegen_flags: <defaults>
</compile_context>

<pallas_src>
import math
from functools import partial

import jax
import jax.numpy as jnp
from jax.experimental import pallas as pl
from jax.experimental.pallas import tpu as pltpu


# ----------------------------------------------------------------------------
# Fused DEM kernel: one grid step per Bblk batch elements.
# ----------------------------------------------------------------------------
def dem_kernel(x_ref, w1_ref, w2_ref, rowi_ref, coli_ref, kconv_ref, o_ref,
               *, hp, wp):
    """
    x_ref    : (Bblk, C, HW)  input, NCHW flattened (HW lane-dense)
    w1_ref   : (Cr, C)        ChannelAttention.fc1 weight (1x1 conv, no bias)
    w2_ref   : (C, Cr)        ChannelAttention.fc2 weight (1x1 conv, no bias)
    rowi_ref : (1, HW) int32  precomputed p // W
    coli_ref : (1, HW) int32  precomputed p %  W
    kconv_ref: (49,)  SMEM    SpatialAttention 7x7 conv weight, row-major flat
    o_ref    : (Bblk, C, HW)  output
    """
    x = x_ref[...]                                    # (Bblk, C, HW) f32
    bblk, c, hw = x.shape

    # ---- ChannelAttention: global max -> fc1 -> relu -> fc2 -> sigmoid ------
    # VPU broadcast-multiply + lane reductions; no MXU for these tiny matmuls.
    m = jnp.max(x, axis=2)                            # (Bblk, C)
    w1 = w1_ref[...]                                  # (Cr, C)
    w2 = w2_ref[...]                                  # (C, Cr)
    h1 = jnp.maximum(jnp.sum(w1[None, :, :] * m[:, None, :], axis=-1), 0.0)  # (Bblk, Cr)
    ca = jax.nn.sigmoid(jnp.sum(w2[None, :, :] * h1[:, None, :], axis=-1))   # (Bblk, C)
    ca3 = ca[:, :, None]                              # (Bblk, C, 1)

    # ---- SpatialAttention: channel max of (x*ca) -> 7x7 conv -> sigmoid -----
    # `x * ca3` is only needed for this max; it dies immediately afterwards.
    s = jnp.max(x * ca3, axis=1)                      # (Bblk, HW) lane-dense

    row = rowi_ref[...]                               # (1, HW) int32
    col = coli_ref[...]                               # (1, HW) int32

    # 49-tap stencil done fully in registers: roll the flat row by
    # di*W + dj (XLU), mask the zero-padding edges, FMA (VPU).
    acc = jnp.zeros((bblk, hw), jnp.float32)
    for di in range(-3, 4):
        r_ok = (row + di >= 0) & (row + di < hp)      # (1, HW) bool
        for dj in range(-3, 4):
            c_ok = (col + dj >= 0) & (col + dj < wp)  # (1, HW) bool
            k = di * wp + dj                          # flat offset
            if k == 0:
                shifted = s
            else:
                # value at flat index p + k (wrap handled by the mask)
                shifted = pltpu.roll(s, shift=(-k) % hw, axis=1)
            tap = kconv_ref[(di + 3) * 7 + (dj + 3)]  # SMEM scalar
            acc = acc + tap * jnp.where(r_ok & c_ok, shifted, 0.0)

    sa3 = jax.nn.sigmoid(acc)[:, None, :]             # (Bblk, 1, HW)

    # ---- DEM residual, fused: x + (x*ca)*sa == x * (1 + ca*sa) --------------
    o_ref[...] = (x * (1.0 + ca3 * sa3)).astype(o_ref.dtype)


# ----------------------------------------------------------------------------
# Wrapper
# ----------------------------------------------------------------------------
def _pick_bblk(b, c, hw, itemsize=4, budget_bytes=24 * 1024 * 1024):
    """Largest batch-block whose double-buffered in+out blocks fit the budget,
    preferring configurations that keep >= 2 grid steps (v7x megacore)."""
    per = c * hw * itemsize
    fits = [d for d in range(1, b + 1)
            if b % d == 0 and 4 * d * per <= budget_bytes]
    if not fits:
        return 1
    two_step = [d for d in fits if b // d >= 2]
    return max(two_step) if two_step else max(fits)


def dem_forward(x, w_fc1, w_fc2, w_conv):
    """x: (B, C, H, W) f32.  w_fc1: (C//16, C), w_fc2: (C, C//16), w_conv: (7, 7)."""
    b, c, h, w = x.shape
    hw = h * w
    cr = w_fc1.shape[0]

    xf = x.reshape(b, c, hw)                          # free row-major NCHW flatten
    kflat = w_conv.reshape(-1).astype(jnp.float32)    # (49,) for SMEM scalar reads
    row_idx = (jnp.arange(hw, dtype=jnp.int32) // w).reshape(1, hw)
    col_idx = (jnp.arange(hw, dtype=jnp.int32) % w).reshape(1, hw)

    bblk = _pick_bblk(b, c, hw)
    per_block = bblk * c * hw * 4
    # 2x(in) + 2x(out) double-buffered blocks + headroom; kept <= 48 MiB so the
    # same setting is safe on v7x (64 MiB physical).  On v5e/v6e this could be
    # raised toward ~96 MiB together with a larger bblk budget.
    vmem_limit = int(min(48 * 1024 * 1024,
                         max(16 * 1024 * 1024, 4 * per_block + 4 * 1024 * 1024)))

    kernel = partial(dem_kernel, hp=h, wp=w)

    out = pl.pallas_call(
        kernel,
        out_shape=jax.ShapeDtypeStruct((b, c, hw), jnp.float32),
        grid_spec=pltpu.PrefetchScalarGridSpec(
            num_scalar_prefetch=0,
            grid=(b // bblk,),
            in_specs=[
                pl.BlockSpec((bblk, c, hw), lambda i: (i, 0, 0)),
                pl.BlockSpec((cr, c), lambda i: (0, 0)),
                pl.BlockSpec((c, cr), lambda i: (0, 0)),
                pl.BlockSpec((1, hw), lambda i: (0, 0)),
                pl.BlockSpec((1, hw), lambda i: (0, 0)),
                pl.BlockSpec(memory_space=pltpu.MemorySpace.SMEM),
            ],
            out_specs=pl.BlockSpec((bblk, c, hw), lambda i: (i, 0, 0)),
        ),
        compiler_params=pltpu.CompilerParams(
            dimension_semantics=("parallel",),
            vmem_limit_bytes=vmem_limit,
        ),
    )(xf, w_fc1, w_fc2, row_idx, col_idx, kflat)

    return out.reshape(b, c, h, w)


# ----------------------------------------------------------------------------
# Pure-JAX reference (mirrors the PyTorch DEM forward op-by-op)
# ----------------------------------------------------------------------------
def dem_reference(x, w_fc1, w_fc2, w_conv):
    hp = jax.lax.Precision.HIGHEST
    # ChannelAttention
    m = jnp.max(x, axis=(2, 3))                                          # (B, C)
    h1 = jnp.maximum(jnp.einsum('rc,bc->br', w_fc1, m, precision=hp), 0.0)
    ca = jax.nn.sigmoid(jnp.einsum('cr,br->bc', w_fc2, h1, precision=hp))
    temp = x * ca[:, :, None, None]
    # SpatialAttention
    s = jnp.max(temp, axis=1, keepdims=True)                             # (B,1,H,W)
    sa = jax.lax.conv_general_dilated(
        s, w_conv[None, None, :, :], window_strides=(1, 1),
        padding=[(3, 3), (3, 3)],
        dimension_numbers=('NCHW', 'OIHW', 'NCHW'),
        precision=hp)
    sa = jax.nn.sigmoid(sa)
    return x + temp * sa


if __name__ == "__main__":
    B, C, H, W = 2, 32, 16, 16          # C must be >= 16 (fc1 reduces by //16)
    CR = C // 16

    key = jax.random.PRNGKey(0)
    kx, k1, k2, k3 = jax.random.split(key, 4)

    x = jax.random.normal(kx, (B, C, H, W), dtype=jnp.float32)
    w_fc1 = jax.random.normal(k1, (CR, C), dtype=jnp.float32) * (1.0 / math.sqrt(C))
    w_fc2 = jax.random.normal(k2, (C, CR), dtype=jnp.float32) * (1.0 / math.sqrt(CR))
    w_conv = jax.random.normal(k3, (7, 7), dtype=jnp.float32) * (1.0 / 7.0)

    out = dem_forward(x, w_fc1, w_fc2, w_conv)
    out = jax.block_until_ready(out)

    ref = dem_reference(x, w_fc1, w_fc2, w_conv)
    assert out.shape == (B, C, H, W)
    assert bool(jnp.allclose(out, ref, atol=1e-3, rtol=1e-3)), "mismatch vs reference"

    print("KERNEL_OK")
</pallas_src>

<mosaic_0001>
module attributes {stable_mosaic.version = 11 : i64} {
  func.func @dem_kernel(%arg0: i32, %arg1: memref<1x32x256xf32, #tpu.memory_space<vmem>>, %arg2: memref<2x32xf32, #tpu.memory_space<vmem>>, %arg3: memref<32x2xf32, #tpu.memory_space<vmem>>, %arg4: memref<1x256xi32, #tpu.memory_space<vmem>>, %arg5: memref<1x256xi32, #tpu.memory_space<vmem>>, %arg6: memref<49xf32, #tpu.memory_space<smem>>, %arg7: memref<1x32x256xf32, #tpu.memory_space<vmem>>) attributes {dimension_semantics = [#tpu.dimension_semantics<parallel>], iteration_bounds = array<i64: 2>, scalar_prefetch = 0 : i64, scratch_operands = 0 : i64, tpu.core_type = #tpu.core_type<tc>, window_params = [{transform_indices = @transform_0, window_bounds = array<i64: 1, 32, 256>}, {pipeline_mode = #tpu.pipeline_mode<synchronous>, transform_indices = @transform_1, window_bounds = array<i64: 2, 32>}, {pipeline_mode = #tpu.pipeline_mode<synchronous>, transform_indices = @transform_2, window_bounds = array<i64: 32, 2>}, {pipeline_mode = #tpu.pipeline_mode<synchronous>, transform_indices = @transform_3, window_bounds = array<i64: 1, 256>}, {pipeline_mode = #tpu.pipeline_mode<synchronous>, transform_indices = @transform_4, window_bounds = array<i64: 1, 256>}, {transform_indices = @transform_5, window_bounds = array<i64: 49>}, {transform_indices = @transform_6, window_bounds = array<i64: 1, 32, 256>}]} {
    %c0 = arith.constant 0 : index
    %c0_0 = arith.constant 0 : index
    %c0_1 = arith.constant 0 : index
    %0 = vector.load %arg1[%c0, %c0_0, %c0_1] : memref<1x32x256xf32, #tpu.memory_space<vmem>>, vector<1x32x256xf32>
    %cst = arith.constant dense<0xFF800000> : vector<1x32xf32>
    %1 = vector.multi_reduction <maximumf>, %0, %cst [2] : vector<1x32x256xf32> to vector<1x32xf32>
    %c0_2 = arith.constant 0 : index
    %c0_3 = arith.constant 0 : index
    %2 = vector.load %arg2[%c0_2, %c0_3] : memref<2x32xf32, #tpu.memory_space<vmem>>, vector<2x32xf32>
    %c0_4 = arith.constant 0 : index
    %c0_5 = arith.constant 0 : index
    %3 = vector.load %arg3[%c0_4, %c0_5] : memref<32x2xf32, #tpu.memory_space<vmem>>, vector<32x2xf32>
    %4 = vector.shape_cast %2 : vector<2x32xf32> to vector<1x2x32xf32>
    %5 = vector.shape_cast %1 : vector<1x32xf32> to vector<1x1x32xf32>
    %6 = vector.broadcast %5 : vector<1x1x32xf32> to vector<1x2x32xf32>
    %7 = arith.mulf %4, %6 : vector<1x2x32xf32>
    %cst_6 = arith.constant dense<0.000000e+00> : vector<1x2xf32>
    %8 = vector.multi_reduction <add>, %7, %cst_6 [2] : vector<1x2x32xf32> to vector<1x2xf32>
    %cst_7 = arith.constant 0.000000e+00 : f32
    %9 = vector.broadcast %cst_7 : f32 to vector<1x2xf32>
    %10 = arith.maximumf %8, %9 : vector<1x2xf32>
    %11 = vector.shape_cast %3 : vector<32x2xf32> to vector<1x32x2xf32>
    %12 = vector.shape_cast %10 : vector<1x2xf32> to vector<1x1x2xf32>
    %13 = vector.broadcast %12 : vector<1x1x2xf32> to vector<1x32x2xf32>
    %14 = arith.mulf %11, %13 : vector<1x32x2xf32>
    %cst_8 = arith.constant dense<0.000000e+00> : vector<1x32xf32>
    %15 = vector.multi_reduction <add>, %14, %cst_8 [2] : vector<1x32x2xf32> to vector<1x32xf32>
    %16 = arith.negf %15 : vector<1x32xf32>
    %17 = math.exp %16 : vector<1x32xf32>
    %cst_9 = arith.constant 1.000000e+00 : f32
    %18 = vector.broadcast %cst_9 : f32 to vector<1x32xf32>
    %19 = arith.addf %18, %17 : vector<1x32xf32>
    %20 = arith.divf %18, %19 : vector<1x32xf32>
    %21 = vector.shape_cast %20 : vector<1x32xf32> to vector<1x32x1xf32>
    %22 = vector.broadcast %21 : vector<1x32x1xf32> to vector<1x32x256xf32>
    %23 = arith.mulf %0, %22 : vector<1x32x256xf32>
    %cst_10 = arith.constant dense<0xFF800000> : vector<1x256xf32>
    %24 = vector.multi_reduction <maximumf>, %23, %cst_10 [1] : vector<1x32x256xf32> to vector<1x256xf32>
    %c0_11 = arith.constant 0 : index
    %c0_12 = arith.constant 0 : index
    %25 = vector.load %arg4[%c0_11, %c0_12] : memref<1x256xi32, #tpu.memory_space<vmem>>, vector<1x256xi32>
    %c0_13 = arith.constant 0 : index
    %c0_14 = arith.constant 0 : index
    %26 = vector.load %arg5[%c0_13, %c0_14] : memref<1x256xi32, #tpu.memory_space<vmem>>, vector<1x256xi32>
    %cst_15 = arith.constant 0.000000e+00 : f32
    %27 = vector.broadcast %cst_15 : f32 to vector<1x256xf32>
    %c-3_i32 = arith.constant -3 : i32
    %28 = vector.broadcast %c-3_i32 : i32 to vector<1x256xi32>
    %29 = arith.addi %25, %28 : vector<1x256xi32>
    %c0_i32 = arith.constant 0 : i32
    %30 = vector.broadcast %c0_i32 : i32 to vector<1x256xi32>
    %31 = arith.cmpi sge, %29, %30 : vector<1x256xi32>
    %c-3_i32_16 = arith.constant -3 : i32
    %32 = vector.broadcast %c-3_i32_16 : i32 to vector<1x256xi32>
    %33 = arith.addi %25, %32 : vector<1x256xi32>
    %c16_i32 = arith.constant 16 : i32
    %34 = vector.broadcast %c16_i32 : i32 to vector<1x256xi32>
    %35 = arith.cmpi slt, %33, %34 : vector<1x256xi32>
    %36 = arith.andi %31, %35 : vector<1x256xi1>
    %c-3_i32_17 = arith.constant -3 : i32
    %37 = vector.broadcast %c-3_i32_17 : i32 to vector<1x256xi32>
    %38 = arith.addi %26, %37 : vector<1x256xi32>
    %c0_i32_18 = arith.constant 0 : i32
    %39 = vector.broadcast %c0_i32_18 : i32 to vector<1x256xi32>
    %40 = arith.cmpi sge, %38, %39 : vector<1x256xi32>
    %c-3_i32_19 = arith.constant -3 : i32
    %41 = vector.broadcast %c-3_i32_19 : i32 to vector<1x256xi32>
    %42 = arith.addi %26, %41 : vector<1x256xi32>
    %c16_i32_20 = arith.constant 16 : i32
    %43 = vector.broadcast %c16_i32_20 : i32 to vector<1x256xi32>
    %44 = arith.cmpi slt, %42, %43 : vector<1x256xi32>
    %45 = arith.andi %40, %44 : vector<1x256xi1>
    %c51_i32 = arith.constant 51 : i32
    %46 = tpu.dynamic_rotate %24 by %c51_i32 dim 1 : vector<1x256xf32>, i32 -> vector<1x256xf32>
    %c0_21 = arith.constant 0 : index
    %47 = memref.load %arg6[%c0_21] : memref<49xf32, #tpu.memory_space<smem>>
    %48 = arith.andi %36, %45 : vector<1x256xi1>
    %cst_22 = arith.constant 0.000000e+00 : f32
    %49 = vector.broadcast %cst_22 : f32 to vector<1x256xf32>
    %50 = arith.select %48, %46, %49 : vector<1x256xi1>, vector<1x256xf32>
    %51 = vector.broadcast %47 : f32 to vector<1x256xf32>
    %52 = arith.mulf %51, %50 : vector<1x256xf32>
    %53 = arith.addf %27, %52 : vector<1x256xf32>
    %c-2_i32 = arith.constant -2 : i32
    %54 = vector.broadcast %c-2_i32 : i32 to vector<1x256xi32>
    %55 = arith.addi %26, %54 : vector<1x256xi32>
    %c0_i32_23 = arith.constant 0 : i32
    %56 = vector.broadcast %c0_i32_23 : i32 to vector<1x256xi32>
    %57 = arith.cmpi sge, %55, %56 : vector<1x256xi32>
    %c-2_i32_24 = arith.constant -2 : i32
    %58 = vector.broadcast %c-2_i32_24 : i32 to vector<1x256xi32>
    %59 = arith.addi %26, %58 : vector<1x256xi32>
    %c16_i32_25 = arith.constant 16 : i32
    %60 = vector.broadcast %c16_i32_25 : i32 to vector<1x256xi32>
    %61 = arith.cmpi slt, %59, %60 : vector<1x256xi32>
    %62 = arith.andi %57, %61 : vector<1x256xi1>
    %c50_i32 = arith.constant 50 : i32
    %63 = tpu.dynamic_rotate %24 by %c50_i32 dim 1 : vector<1x256xf32>, i32 -> vector<1x256xf32>
    %c1 = arith.constant 1 : index
    %64 = memref.load %arg6[%c1] : memref<49xf32, #tpu.memory_space<smem>>
    %65 = arith.andi %36, %62 : vector<1x256xi1>
    %cst_26 = arith.constant 0.000000e+00 : f32
    %66 = vector.broadcast %cst_26 : f32 to vector<1x256xf32>
    %67 = arith.select %65, %63, %66 : vector<1x256xi1>, vector<1x256xf32>
    %68 = vector.broadcast %64 : f32 to vector<1x256xf32>
    %69 = arith.mulf %68, %67 : vector<1x256xf32>
    %70 = arith.addf %53, %69 : vector<1x256xf32>
    %c-1_i32 = arith.constant -1 : i32
    %71 = vector.broadcast %c-1_i32 : i32 to vector<1x256xi32>
    %72 = arith.addi %26, %71 : vector<1x256xi32>
    %c0_i32_27 = arith.constant 0 : i32
    %73 = vector.broadcast %c0_i32_27 : i32 to vector<1x256xi32>
    %74 = arith.cmpi sge, %72, %73 : vector<1x256xi32>
    %c-1_i32_28 = arith.constant -1 : i32
    %75 = vector.broadcast %c-1_i32_28 : i32 to vector<1x256xi32>
    %76 = arith.addi %26, %75 : vector<1x256xi32>
    %c16_i32_29 = arith.constant 16 : i32
    %77 = vector.broadcast %c16_i32_29 : i32 to vector<1x256xi32>
    %78 = arith.cmpi slt, %76, %77 : vector<1x256xi32>
    %79 = arith.andi %74, %78 : vector<1x256xi1>
    %c49_i32 = arith.constant 49 : i32
    %80 = tpu.dynamic_rotate %24 by %c49_i32 dim 1 : vector<1x256xf32>, i32 -> vector<1x256xf32>
    %c2 = arith.constant 2 : index
    %81 = memref.load %arg6[%c2] : memref<49xf32, #tpu.memory_space<smem>>
    %82 = arith.andi %36, %79 : vector<1x256xi1>
    %cst_30 = arith.constant 0.000000e+00 : f32
    %83 = vector.broadcast %cst_30 : f32 to vector<1x256xf32>
    %84 = arith.select %82, %80, %83 : vector<1x256xi1>, vector<1x256xf32>
    %85 = vector.broadcast %81 : f32 to vector<1x256xf32>
    %86 = arith.mulf %85, %84 : vector<1x256xf32>
    %87 = arith.addf %70, %86 : vector<1x256xf32>
    %c0_i32_31 = arith.constant 0 : i32
    %88 = vector.broadcast %c0_i32_31 : i32 to vector<1x256xi32>
    %89 = arith.addi %26, %88 : vector<1x256xi32>
    %c0_i32_32 = arith.constant 0 : i32
    %90 = vector.broadcast %c0_i32_32 : i32 to vector<1x256xi32>
    %91 = arith.cmpi sge, %89, %90 : vector<1x256xi32>
    %c0_i32_33 = arith.constant 0 : i32
    %92 = vector.broadcast %c0_i32_33 : i32 to vector<1x256xi32>
    %93 = arith.addi %26, %92 : vector<1x256xi32>
    %c16_i32_34 = arith.constant 16 : i32
    %94 = vector.broadcast %c16_i32_34 : i32 to vector<1x256xi32>
    %95 = arith.cmpi slt, %93, %94 : vector<1x256xi32>
    %96 = arith.andi %91, %95 : vector<1x256xi1>
    %c48_i32 = arith.constant 48 : i32
    %97 = tpu.dynamic_rotate %24 by %c48_i32 dim 1 : vector<1x256xf32>, i32 -> vector<1x256xf32>
    %c3 = arith.constant 3 : index
    %98 = memref.load %arg6[%c3] : memref<49xf32, #tpu.memory_space<smem>>
    %99 = arith.andi %36, %96 : vector<1x256xi1>
    %cst_35 = arith.constant 0.000000e+00 : f32
    %100 = vector.broadcast %cst_35 : f32 to vector<1x256xf32>
    %101 = arith.select %99, %97, %100 : vector<1x256xi1>, vector<1x256xf32>
    %102 = vector.broadcast %98 : f32 to vector<1x256xf32>
    %103 = arith.mulf %102, %101 : vector<1x256xf32>
    %104 = arith.addf %87, %103 : vector<1x256xf32>
    %c1_i32 = arith.constant 1 : i32
    %105 = vector.broadcast %c1_i32 : i32 to vector<1x256xi32>
    %106 = arith.addi %26, %105 : vector<1x256xi32>
    %c0_i32_36 = arith.constant 0 : i32
    %107 = vector.broadcast %c0_i32_36 : i32 to vector<1x256xi32>
    %108 = arith.cmpi sge, %106, %107 : vector<1x256xi32>
    %c1_i32_37 = arith.constant 1 : i32
    %109 = vector.broadcast %c1_i32_37 : i32 to vector<1x256xi32>
    %110 = arith.addi %26, %109 : vector<1x256xi32>
    %c16_i32_38 = arith.constant 16 : i32
    %111 = vector.broadcast %c16_i32_38 : i32 to vector<1x256xi32>
    %112 = arith.cmpi slt, %110, %111 : vector<1x256xi32>
    %113 = arith.andi %108, %112 : vector<1x256xi1>
    %c47_i32 = arith.constant 47 : i32
    %114 = tpu.dynamic_rotate %24 by %c47_i32 dim 1 : vector<1x256xf32>, i32 -> vector<1x256xf32>
    %c4 = arith.constant 4 : index
    %115 = memref.load %arg6[%c4] : memref<49xf32, #tpu.memory_space<smem>>
    %116 = arith.andi %36, %113 : vector<1x256xi1>
    %cst_39 = arith.constant 0.000000e+00 : f32
    %117 = vector.broadcast %cst_39 : f32 to vector<1x256xf32>
    %118 = arith.select %116, %114, %117 : vector<1x256xi1>, vector<1x256xf32>
    %119 = vector.broadcast %115 : f32 to vector<1x256xf32>
    %120 = arith.mulf %119, %118 : vector<1x256xf32>
    %121 = arith.addf %104, %120 : vector<1x256xf32>
    %c2_i32 = arith.constant 2 : i32
    %122 = vector.broadcast %c2_i32 : i32 to vector<1x256xi32>
    %123 = arith.addi %26, %122 : vector<1x256xi32>
    %c0_i32_40 = arith.constant 0 : i32
    %124 = vector.broadcast %c0_i32_40 : i32 to vector<1x256xi32>
    %125 = arith.cmpi sge, %123, %124 : vector<1x256xi32>
    %c2_i32_41 = arith.constant 2 : i32
    %126 = vector.broadcast %c2_i32_41 : i32 to vector<1x256xi32>
    %127 = arith.addi %26, %126 : vector<1x256xi32>
    %c16_i32_42 = arith.constant 16 : i32
    %128 = vector.broadcast %c16_i32_42 : i32 to vector<1x256xi32>
    %129 = arith.cmpi slt, %127, %128 : vector<1x256xi32>
    %130 = arith.andi %125, %129 : vector<1x256xi1>
    %c46_i32 = arith.constant 46 : i32
    %131 = tpu.dynamic_rotate %24 by %c46_i32 dim 1 : vector<1x256xf32>, i32 -> vector<1x256xf32>
    %c5 = arith.constant 5 : index
    %132 = memref.load %arg6[%c5] : memref<49xf32, #tpu.memory_space<smem>>
    %133 = arith.andi %36, %130 : vector<1x256xi1>
    %cst_43 = arith.constant 0.000000e+00 : f32
    %134 = vector.broadcast %cst_43 : f32 to vector<1x256xf32>
    %135 = arith.select %133, %131, %134 : vector<1x256xi1>, vector<1x256xf32>
    %136 = vector.broadcast %132 : f32 to vector<1x256xf32>
    %137 = arith.mulf %136, %135 : vector<1x256xf32>
    %138 = arith.addf %121, %137 : vector<1x256xf32>
    %c3_i32 = arith.constant 3 : i32
    %139 = vector.broadcast %c3_i32 : i32 to vector<1x256xi32>
    %140 = arith.addi %26, %139 : vector<1x256xi32>
    %c0_i32_44 = arith.constant 0 : i32
    %141 = vector.broadcast %c0_i32_44 : i32 to vector<1x256xi32>
    %142 = arith.cmpi sge, %140, %141 : vector<1x256xi32>
    %c3_i32_45 = arith.constant 3 : i32
    %143 = vector.broadcast %c3_i32_45 : i32 to vector<1x256xi32>
    %144 = arith.addi %26, %143 : vector<1x256xi32>
    %c16_i32_46 = arith.constant 16 : i32
    %145 = vector.broadcast %c16_i32_46 : i32 to vector<1x256xi32>
    %146 = arith.cmpi slt, %144, %145 : vector<1x256xi32>
    %147 = arith.andi %142, %146 : vector<1x256xi1>
    %c45_i32 = arith.constant 45 : i32
    %148 = tpu.dynamic_rotate %24 by %c45_i32 dim 1 : vector<1x256xf32>, i32 -> vector<1x256xf32>
    %c6 = arith.constant 6 : index
    %149 = memref.load %arg6[%c6] : memref<49xf32, #tpu.memory_space<smem>>
    %150 = arith.andi %36, %147 : vector<1x256xi1>
    %cst_47 = arith.constant 0.000000e+00 : f32
    %151 = vector.broadcast %cst_47 : f32 to vector<1x256xf32>
    %152 = arith.select %150, %148, %151 : vector<1x256xi1>, vector<1x256xf32>
    %153 = vector.broadcast %149 : f32 to vector<1x256xf32>
    %154 = arith.mulf %153, %152 : vector<1x256xf32>
    %155 = arith.addf %138, %154 : vector<1x256xf32>
    %c-2_i32_48 = arith.constant -2 : i32
    %156 = vector.broadcast %c-2_i32_48 : i32 to vector<1x256xi32>
    %157 = arith.addi %25, %156 : vector<1x256xi32>
    %c0_i32_49 = arith.constant 0 : i32
    %158 = vector.broadcast %c0_i32_49 : i32 to vector<1x256xi32>
    %159 = arith.cmpi sge, %157, %158 : vector<1x256xi32>
    %c-2_i32_50 = arith.constant -2 : i32
    %160 = vector.broadcast %c-2_i32_50 : i32 to vector<1x256xi32>
    %161 = arith.addi %25, %160 : vector<1x256xi32>
    %c16_i32_51 = arith.constant 16 : i32
    %162 = vector.broadcast %c16_i32_51 : i32 to vector<1x256xi32>
    %163 = arith.cmpi slt, %161, %162 : vector<1x256xi32>
    %164 = arith.andi %159, %163 : vector<1x256xi1>
    %c-3_i32_52 = arith.constant -3 : i32
    %165 = vector.broadcast %c-3_i32_52 : i32 to vector<1x256xi32>
    %166 = arith.addi %26, %165 : vector<1x256xi32>
    %c0_i32_53 = arith.constant 0 : i32
    %167 = vector.broadcast %c0_i32_53 : i32 to vector<1x256xi32>
    %168 = arith.cmpi sge, %166, %167 : vector<1x256xi32>
    %c-3_i32_54 = arith.constant -3 : i32
    %169 = vector.broadcast %c-3_i32_54 : i32 to vector<1x256xi32>
    %170 = arith.addi %26, %169 : vector<1x256xi32>
    %c16_i32_55 = arith.constant 16 : i32
    %171 = vector.broadcast %c16_i32_55 : i32 to vector<1x256xi32>
    %172 = arith.cmpi slt, %170, %171 : vector<1x256xi32>
    %173 = arith.andi %168, %172 : vector<1x256xi1>
    %c35_i32 = arith.constant 35 : i32
    %174 = tpu.dynamic_rotate %24 by %c35_i32 dim 1 : vector<1x256xf32>, i32 -> vector<1x256xf32>
    %c7 = arith.constant 7 : index
    %175 = memref.load %arg6[%c7] : memref<49xf32, #tpu.memory_space<smem>>
    %176 = arith.andi %164, %173 : vector<1x256xi1>
    %cst_56 = arith.constant 0.000000e+00 : f32
    %177 = vector.broadcast %cst_56 : f32 to vector<1x256xf32>
    %178 = arith.select %176, %174, %177 : vector<1x256xi1>, vector<1x256xf32>
    %179 = vector.broadcast %175 : f32 to vector<1x256xf32>
    %180 = arith.mulf %179, %178 : vector<1x256xf32>
    %181 = arith.addf %155, %180 : vector<1x256xf32>
    %c-2_i32_57 = arith.constant -2 : i32
    %182 = vector.broadcast %c-2_i32_57 : i32 to vector<1x256xi32>
    %183 = arith.addi %26, %182 : vector<1x256xi32>
    %c0_i32_58 = arith.constant 0 : i32
    %184 = vector.broadcast %c0_i32_58 : i32 to vector<1x256xi32>
    %185 = arith.cmpi sge, %183, %184 : vector<1x256xi32>
    %c-2_i32_59 = arith.constant -2 : i32
    %186 = vector.broadcast %c-2_i32_59 : i32 to vector<1x256xi32>
    %187 = arith.addi %26, %186 : vector<1x256xi32>
    %c16_i32_60 = arith.constant 16 : i32
    %188 = vector.broadcast %c16_i32_60 : i32 to vector<1x256xi32>
    %189 = arith.cmpi slt, %187, %188 : vector<1x256xi32>
    %190 = arith.andi %185, %189 : vector<1x256xi1>
    %c34_i32 = arith.constant 34 : i32
    %191 = tpu.dynamic_rotate %24 by %c34_i32 dim 1 : vector<1x256xf32>, i32 -> vector<1x256xf32>
    %c8 = arith.constant 8 : index
    %192 = memref.load %arg6[%c8] : memref<49xf32, #tpu.memory_space<smem>>
    %193 = arith.andi %164, %190 : vector<1x256xi1>
    %cst_61 = arith.constant 0.000000e+00 : f32
    %194 = vector.broadcast %cst_61 : f32 to vector<1x256xf32>
    %195 = arith.select %193, %191, %194 : vector<1x256xi1>, vector<1x256xf32>
    %196 = vector.broadcast %192 : f32 to vector<1x256xf32>
    %197 = arith.mulf %196, %195 : vector<1x256xf32>
    %198 = arith.addf %181, %197 : vector<1x256xf32>
    %c-1_i32_62 = arith.constant -1 : i32
    %199 = vector.broadcast %c-1_i32_62 : i32 to vector<1x256xi32>
    %200 = arith.addi %26, %199 : vector<1x256xi32>
    %c0_i32_63 = arith.constant 0 : i32
    %201 = vector.broadcast %c0_i32_63 : i32 to vector<1x256xi32>
    %202 = arith.cmpi sge, %200, %201 : vector<1x256xi32>
    %c-1_i32_64 = arith.constant -1 : i32
    %203 = vector.broadcast %c-1_i32_64 : i32 to vector<1x256xi32>
    %204 = arith.addi %26, %203 : vector<1x256xi32>
    %c16_i32_65 = arith.constant 16 : i32
    %205 = vector.broadcast %c16_i32_65 : i32 to vector<1x256xi32>
    %206 = arith.cmpi slt, %204, %205 : vector<1x256xi32>
    %207 = arith.andi %202, %206 : vector<1x256xi1>
    %c33_i32 = arith.constant 33 : i32
    %208 = tpu.dynamic_rotate %24 by %c33_i32 dim 1 : vector<1x256xf32>, i32 -> vector<1x256xf32>
    %c9 = arith.constant 9 : index
    %209 = memref.load %arg6[%c9] : memref<49xf32, #tpu.memory_space<smem>>
    %210 = arith.andi %164, %207 : vector<1x256xi1>
    %cst_66 = arith.constant 0.000000e+00 : f32
    %211 = vector.broadcast %cst_66 : f32 to vector<1x256xf32>
    %212 = arith.select %210, %208, %211 : vector<1x256xi1>, vector<1x256xf32>
    %213 = vector.broadcast %209 : f32 to vector<1x256xf32>
    %214 = arith.mulf %213, %212 : vector<1x256xf32>
    %215 = arith.addf %198, %214 : vector<1x256xf32>
    %c0_i32_67 = arith.constant 0 : i32
    %216 = vector.broadcast %c0_i32_67 : i32 to vector<1x256xi32>
    %217 = arith.addi %26, %216 : vector<1x256xi32>
    %c0_i32_68 = arith.constant 0 : i32
    %218 = vector.broadcast %c0_i32_68 : i32 to vector<1x256xi32>
    %219 = arith.cmpi sge, %217, %218 : vector<1x256xi32>
    %c0_i32_69 = arith.constant 0 : i32
    %220 = vector.broadcast %c0_i32_69 : i32 to vector<1x256xi32>
    %221 = arith.addi %26, %220 : vector<1x256xi32>
    %c16_i32_70 = arith.constant 16 : i32
    %222 = vector.broadcast %c16_i32_70 : i32 to vector<1x256xi32>
    %223 = arith.cmpi slt, %221, %222 : vector<1x256xi32>
    %224 = arith.andi %219, %223 : vector<1x256xi1>
    %c32_i32 = arith.constant 32 : i32
    %225 = tpu.dynamic_rotate %24 by %c32_i32 dim 1 : vector<1x256xf32>, i32 -> vector<1x256xf32>
    %c10 = arith.constant 10 : index
    %226 = memref.load %arg6[%c10] : memref<49xf32, #tpu.memory_space<smem>>
    %227 = arith.andi %164, %224 : vector<1x256xi1>
    %cst_71 = arith.constant 0.000000e+00 : f32
    %228 = vector.broadcast %cst_71 : f32 to vector<1x256xf32>
    %229 = arith.select %227, %225, %228 : vector<1x256xi1>, vector<1x256xf32>
    %230 = vector.broadcast %226 : f32 to vector<1x256xf32>
    %231 = arith.mulf %230, %229 : vector<1x256xf32>
    %232 = arith.addf %215, %231 : vector<1x256xf32>
    %c1_i32_72 = arith.constant 1 : i32
    %233 = vector.broadcast %c1_i32_72 : i32 to vector<1x256xi32>
    %234 = arith.addi %26, %233 : vector<1x256xi32>
    %c0_i32_73 = arith.constant 0 : i32
    %235 = vector.broadcast %c0_i32_73 : i32 to vector<1x256xi32>
    %236 = arith.cmpi sge, %234, %235 : vector<1x256xi32>
    %c1_i32_74 = arith.constant 1 : i32
    %237 = vector.broadcast %c1_i32_74 : i32 to vector<1x256xi32>
    %238 = arith.addi %26, %237 : vector<1x256xi32>
    %c16_i32_75 = arith.constant 16 : i32
    %239 = vector.broadcast %c16_i32_75 : i32 to vector<1x256xi32>
    %240 = arith.cmpi slt, %238, %239 : vector<1x256xi32>
    %241 = arith.andi %236, %240 : vector<1x256xi1>
    %c31_i32 = arith.constant 31 : i32
    %242 = tpu.dynamic_rotate %24 by %c31_i32 dim 1 : vector<1x256xf32>, i32 -> vector<1x256xf32>
    %c11 = arith.constant 11 : index
    %243 = memref.load %arg6[%c11] : memref<49xf32, #tpu.memory_space<smem>>
    %244 = arith.andi %164, %241 : vector<1x256xi1>
    %cst_76 = arith.constant 0.000000e+00 : f32
    %245 = vector.broadcast %cst_76 : f32 to vector<1x256xf32>
    %246 = arith.select %244, %242, %245 : vector<1x256xi1>, vector<1x256xf32>
    %247 = vector.broadcast %243 : f32 to vector<1x256xf32>
    %248 = arith.mulf %247, %246 : vector<1x256xf32>
    %249 = arith.addf %232, %248 : vector<1x256xf32>
    %c2_i32_77 = arith.constant 2 : i32
    %250 = vector.broadcast %c2_i32_77 : i32 to vector<1x256xi32>
    %251 = arith.addi %26, %250 : vector<1x256xi32>
    %c0_i32_78 = arith.constant 0 : i32
    %252 = vector.broadcast %c0_i32_78 : i32 to vector<1x256xi32>
    %253 = arith.cmpi sge, %251, %252 : vector<1x256xi32>
    %c2_i32_79 = arith.constant 2 : i32
    %254 = vector.broadcast %c2_i32_79 : i32 to vector<1x256xi32>
    %255 = arith.addi %26, %254 : vector<1x256xi32>
    %c16_i32_80 = arith.constant 16 : i32
    %256 = vector.broadcast %c16_i32_80 : i32 to vector<1x256xi32>
    %257 = arith.cmpi slt, %255, %256 : vector<1x256xi32>
    %258 = arith.andi %253, %257 : vector<1x256xi1>
    %c30_i32 = arith.constant 30 : i32
    %259 = tpu.dynamic_rotate %24 by %c30_i32 dim 1 : vector<1x256xf32>, i32 -> vector<1x256xf32>
    %c12 = arith.constant 12 : index
    %260 = memref.load %arg6[%c12] : memref<49xf32, #tpu.memory_space<smem>>
    %261 = arith.andi %164, %258 : vector<1x256xi1>
    %cst_81 = arith.constant 0.000000e+00 : f32
    %262 = vector.broadcast %cst_81 : f32 to vector<1x256xf32>
    %263 = arith.select %261, %259, %262 : vector<1x256xi1>, vector<1x256xf32>
    %264 = vector.broadcast %260 : f32 to vector<1x256xf32>
    %265 = arith.mulf %264, %263 : vector<1x256xf32>
    %266 = arith.addf %249, %265 : vector<1x256xf32>
    %c3_i32_82 = arith.constant 3 : i32
    %267 = vector.broadcast %c3_i32_82 : i32 to vector<1x256xi32>
    %268 = arith.addi %26, %267 : vector<1x256xi32>
    %c0_i32_83 = arith.constant 0 : i32
    %269 = vector.broadcast %c0_i32_83 : i32 to vector<1x256xi32>
    %270 = arith.cmpi sge, %268, %269 : vector<1x256xi32>
    %c3_i32_84 = arith.constant 3 : i32
    %271 = vector.broadcast %c3_i32_84 : i32 to vector<1x256xi32>
    %272 = arith.addi %26, %271 : vector<1x256xi32>
    %c16_i32_85 = arith.constant 16 : i32
    %273 = vector.broadcast %c16_i32_85 : i32 to vector<1x256xi32>
    %274 = arith.cmpi slt, %272, %273 : vector<1x256xi32>
    %275 = arith.andi %270, %274 : vector<1x256xi1>
    %c29_i32 = arith.constant 29 : i32
    %276 = tpu.dynamic_rotate %24 by %c29_i32 dim 1 : vector<1x256xf32>, i32 -> vector<1x256xf32>
    %c13 = arith.constant 13 : index
    %277 = memref.load %arg6[%c13] : memref<49xf32, #tpu.memory_space<smem>>
    %278 = arith.andi %164, %275 : vector<1x256xi1>
    %cst_86 = arith.constant 0.000000e+00 : f32
    %279 = vector.broadcast %cst_86 : f32 to vector<1x256xf32>
    %280 = arith.select %278, %276, %279 : vector<1x256xi1>, vector<1x256xf32>
    %281 = vector.broadcast %277 : f32 to vector<1x256xf32>
    %282 = arith.mulf %281, %280 : vector<1x256xf32>
    %283 = arith.addf %266, %282 : vector<1x256xf32>
    %c-1_i32_87 = arith.constant -1 : i32
    %284 = vector.broadcast %c-1_i32_87 : i32 to vector<1x256xi32>
    %285 = arith.addi %25, %284 : vector<1x256xi32>
    %c0_i32_88 = arith.constant 0 : i32
    %286 = vector.broadcast %c0_i32_88 : i32 to vector<1x256xi32>
    %287 = arith.cmpi sge, %285, %286 : vector<1x256xi32>
    %c-1_i32_89 = arith.constant -1 : i32
    %288 = vector.broadcast %c-1_i32_89 : i32 to vector<1x256xi32>
    %289 = arith.addi %25, %288 : vector<1x256xi32>
    %c16_i32_90 = arith.constant 16 : i32
    %290 = vector.broadcast %c16_i32_90 : i32 to vector<1x256xi32>
    %291 = arith.cmpi slt, %289, %290 : vector<1x256xi32>
    %292 = arith.andi %287, %291 : vector<1x256xi1>
    %c-3_i32_91 = arith.constant -3 : i32
    %293 = vector.broadcast %c-3_i32_91 : i32 to vector<1x256xi32>
    %294 = arith.addi %26, %293 : vector<1x256xi32>
    %c0_i32_92 = arith.constant 0 : i32
    %295 = vector.broadcast %c0_i32_92 : i32 to vector<1x256xi32>
    %296 = arith.cmpi sge, %294, %295 : vector<1x256xi32>
    %c-3_i32_93 = arith.constant -3 : i32
    %297 = vector.broadcast %c-3_i32_93 : i32 to vector<1x256xi32>
    %298 = arith.addi %26, %297 : vector<1x256xi32>
    %c16_i32_94 = arith.constant 16 : i32
    %299 = vector.broadcast %c16_i32_94 : i32 to vector<1x256xi32>
    %300 = arith.cmpi slt, %298, %299 : vector<1x256xi32>
    %301 = arith.andi %296, %300 : vector<1x256xi1>
    %c19_i32 = arith.constant 19 : i32
    %302 = tpu.dynamic_rotate %24 by %c19_i32 dim 1 : vector<1x256xf32>, i32 -> vector<1x256xf32>
    %c14 = arith.constant 14 : index
    %303 = memref.load %arg6[%c14] : memref<49xf32, #tpu.memory_space<smem>>
    %304 = arith.andi %292, %301 : vector<1x256xi1>
    %cst_95 = arith.constant 0.000000e+00 : f32
    %305 = vector.broadcast %cst_95 : f32 to vector<1x256xf32>
    %306 = arith.select %304, %302, %305 : vector<1x256xi1>, vector<1x256xf32>
    %307 = vector.broadcast %303 : f32 to vector<1x256xf32>
    %308 = arith.mulf %307, %306 : vector<1x256xf32>
    %309 = arith.addf %283, %308 : vector<1x256xf32>
    %c-2_i32_96 = arith.constant -2 : i32
    %310 = vector.broadcast %c-2_i32_96 : i32 to vector<1x256xi32>
    %311 = arith.addi %26, %310 : vector<1x256xi32>
    %c0_i32_97 = arith.constant 0 : i32
    %312 = vector.broadcast %c0_i32_97 : i32 to vector<1x256xi32>
    %313 = arith.cmpi sge, %311, %312 : vector<1x256xi32>
    %c-2_i32_98 = arith.constant -2 : i32
    %314 = vector.broadcast %c-2_i32_98 : i32 to vector<1x256xi32>
    %315 = arith.addi %26, %314 : vector<1x256xi32>
    %c16_i32_99 = arith.constant 16 : i32
    %316 = vector.broadcast %c16_i32_99 : i32 to vector<1x256xi32>
    %317 = arith.cmpi slt, %315, %316 : vector<1x256xi32>
    %318 = arith.andi %313, %317 : vector<1x256xi1>
    %c18_i32 = arith.constant 18 : i32
    %319 = tpu.dynamic_rotate %24 by %c18_i32 dim 1 : vector<1x256xf32>, i32 -> vector<1x256xf32>
    %c15 = arith.constant 15 : index
    %320 = memref.load %arg6[%c15] : memref<49xf32, #tpu.memory_space<smem>>
    %321 = arith.andi %292, %318 : vector<1x256xi1>
    %cst_100 = arith.constant 0.000000e+00 : f32
    %322 = vector.broadcast %cst_100 : f32 to vector<1x256xf32>
    %323 = arith.select %321, %319, %322 : vector<1x256xi1>, vector<1x256xf32>
    %324 = vector.broadcast %320 : f32 to vector<1x256xf32>
    %325 = arith.mulf %324, %323 : vector<1x256xf32>
    %326 = arith.addf %309, %325 : vector<1x256xf32>
    %c-1_i32_101 = arith.constant -1 : i32
    %327 = vector.broadcast %c-1_i32_101 : i32 to vector<1x256xi32>
    %328 = arith.addi %26, %327 : vector<1x256xi32>
    %c0_i32_102 = arith.constant 0 : i32
    %329 = vector.broadcast %c0_i32_102 : i32 to vector<1x256xi32>
    %330 = arith.cmpi sge, %328, %329 : vector<1x256xi32>
    %c-1_i32_103 = arith.constant -1 : i32
    %331 = vector.broadcast %c-1_i32_103 : i32 to vector<1x256xi32>
    %332 = arith.addi %26, %331 : vector<1x256xi32>
    %c16_i32_104 = arith.constant 16 : i32
    %333 = vector.broadcast %c16_i32_104 : i32 to vector<1x256xi32>
    %334 = arith.cmpi slt, %332, %333 : vector<1x256xi32>
    %335 = arith.andi %330, %334 : vector<1x256xi1>
    %c17_i32 = arith.constant 17 : i32
    %336 = tpu.dynamic_rotate %24 by %c17_i32 dim 1 : vector<1x256xf32>, i32 -> vector<1x256xf32>
    %c16 = arith.constant 16 : index
    %337 = memref.load %arg6[%c16] : memref<49xf32, #tpu.memory_space<smem>>
    %338 = arith.andi %292, %335 : vector<1x256xi1>
    %cst_105 = arith.constant 0.000000e+00 : f32
    %339 = vector.broadcast %cst_105 : f32 to vector<1x256xf32>
    %340 = arith.select %338, %336, %339 : vector<1x256xi1>, vector<1x256xf32>
    %341 = vector.broadcast %337 : f32 to vector<1x256xf32>
    %342 = arith.mulf %341, %340 : vector<1x256xf32>
    %343 = arith.addf %326, %342 : vector<1x256xf32>
    %c0_i32_106 = arith.constant 0 : i32
    %344 = vector.broadcast %c0_i32_106 : i32 to vector<1x256xi32>
    %345 = arith.addi %26, %344 : vector<1x256xi32>
    %c0_i32_107 = arith.constant 0 : i32
    %346 = vector.broadcast %c0_i32_107 : i32 to vector<1x256xi32>
    %347 = arith.cmpi sge, %345, %346 : vector<1x256xi32>
    %c0_i32_108 = arith.constant 0 : i32
    %348 = vector.broadcast %c0_i32_108 : i32 to vector<1x256xi32>
    %349 = arith.addi %26, %348 : vector<1x256xi32>
    %c16_i32_109 = arith.constant 16 : i32
    %350 = vector.broadcast %c16_i32_109 : i32 to vector<1x256xi32>
    %351 = arith.cmpi slt, %349, %350 : vector<1x256xi32>
    %352 = arith.andi %347, %351 : vector<1x256xi1>
    %c16_i32_110 = arith.constant 16 : i32
    %353 = tpu.dynamic_rotate %24 by %c16_i32_110 dim 1 : vector<1x256xf32>, i32 -> vector<1x256xf32>
    %c17 = arith.constant 17 : index
    %354 = memref.load %arg6[%c17] : memref<49xf32, #tpu.memory_space<smem>>
    %355 = arith.andi %292, %352 : vector<1x256xi1>
    %cst_111 = arith.constant 0.000000e+00 : f32
    %356 = vector.broadcast %cst_111 : f32 to vector<1x256xf32>
    %357 = arith.select %355, %353, %356 : vector<1x256xi1>, vector<1x256xf32>
    %358 = vector.broadcast %354 : f32 to vector<1x256xf32>
    %359 = arith.mulf %358, %357 : vector<1x256xf32>
    %360 = arith.addf %343, %359 : vector<1x256xf32>
    %c1_i32_112 = arith.constant 1 : i32
    %361 = vector.broadcast %c1_i32_112 : i32 to vector<1x256xi32>
    %362 = arith.addi %26, %361 : vector<1x256xi32>
    %c0_i32_113 = arith.constant 0 : i32
    %363 = vector.broadcast %c0_i32_113 : i32 to vector<1x256xi32>
    %364 = arith.cmpi sge, %362, %363 : vector<1x256xi32>
    %c1_i32_114 = arith.constant 1 : i32
    %365 = vector.broadcast %c1_i32_114 : i32 to vector<1x256xi32>
    %366 = arith.addi %26, %365 : vector<1x256xi32>
    %c16_i32_115 = arith.constant 16 : i32
    %367 = vector.broadcast %c16_i32_115 : i32 to vector<1x256xi32>
    %368 = arith.cmpi slt, %366, %367 : vector<1x256xi32>
    %369 = arith.andi %364, %368 : vector<1x256xi1>
    %c15_i32 = arith.constant 15 : i32
    %370 = tpu.dynamic_rotate %24 by %c15_i32 dim 1 : vector<1x256xf32>, i32 -> vector<1x256xf32>
    %c18 = arith.constant 18 : index
    %371 = memref.load %arg6[%c18] : memref<49xf32, #tpu.memory_space<smem>>
    %372 = arith.andi %292, %369 : vector<1x256xi1>
    %cst_116 = arith.constant 0.000000e+00 : f32
    %373 = vector.broadcast %cst_116 : f32 to vector<1x256xf32>
    %374 = arith.select %372, %370, %373 : vector<1x256xi1>, vector<1x256xf32>
    %375 = vector.broadcast %371 : f32 to vector<1x256xf32>
    %376 = arith.mulf %375, %374 : vector<1x256xf32>
    %377 = arith.addf %360, %376 : vector<1x256xf32>
    %c2_i32_117 = arith.constant 2 : i32
    %378 = vector.broadcast %c2_i32_117 : i32 to vector<1x256xi32>
    %379 = arith.addi %26, %378 : vector<1x256xi32>
    %c0_i32_118 = arith.constant 0 : i32
    %380 = vector.broadcast %c0_i32_118 : i32 to vector<1x256xi32>
    %381 = arith.cmpi sge, %379, %380 : vector<1x256xi32>
    %c2_i32_119 = arith.constant 2 : i32
    %382 = vector.broadcast %c2_i32_119 : i32 to vector<1x256xi32>
    %383 = arith.addi %26, %382 : vector<1x256xi32>
    %c16_i32_120 = arith.constant 16 : i32
    %384 = vector.broadcast %c16_i32_120 : i32 to vector<1x256xi32>
    %385 = arith.cmpi slt, %383, %384 : vector<1x256xi32>
    %386 = arith.andi %381, %385 : vector<1x256xi1>
    %c14_i32 = arith.constant 14 : i32
    %387 = tpu.dynamic_rotate %24 by %c14_i32 dim 1 : vector<1x256xf32>, i32 -> vector<1x256xf32>
    %c19 = arith.constant 19 : index
    %388 = memref.load %arg6[%c19] : memref<49xf32, #tpu.memory_space<smem>>
    %389 = arith.andi %292, %386 : vector<1x256xi1>
    %cst_121 = arith.constant 0.000000e+00 : f32
    %390 = vector.broadcast %cst_121 : f32 to vector<1x256xf32>
    %391 = arith.select %389, %387, %390 : vector<1x256xi1>, vector<1x256xf32>
    %392 = vector.broadcast %388 : f32 to vector<1x256xf32>
    %393 = arith.mulf %392, %391 : vector<1x256xf32>
    %394 = arith.addf %377, %393 : vector<1x256xf32>
    %c3_i32_122 = arith.constant 3 : i32
    %395 = vector.broadcast %c3_i32_122 : i32 to vector<1x256xi32>
    %396 = arith.addi %26, %395 : vector<1x256xi32>
    %c0_i32_123 = arith.constant 0 : i32
    %397 = vector.broadcast %c0_i32_123 : i32 to vector<1x256xi32>
    %398 = arith.cmpi sge, %396, %397 : vector<1x256xi32>
    %c3_i32_124 = arith.constant 3 : i32
    %399 = vector.broadcast %c3_i32_124 : i32 to vector<1x256xi32>
    %400 = arith.addi %26, %399 : vector<1x256xi32>
    %c16_i32_125 = arith.constant 16 : i32
    %401 = vector.broadcast %c16_i32_125 : i32 to vector<1x256xi32>
    %402 = arith.cmpi slt, %400, %401 : vector<1x256xi32>
    %403 = arith.andi %398, %402 : vector<1x256xi1>
    %c13_i32 = arith.constant 13 : i32
    %404 = tpu.dynamic_rotate %24 by %c13_i32 dim 1 : vector<1x256xf32>, i32 -> vector<1x256xf32>
    %c20 = arith.constant 20 : index
    %405 = memref.load %arg6[%c20] : memref<49xf32, #tpu.memory_space<smem>>
    %406 = arith.andi %292, %403 : vector<1x256xi1>
    %cst_126 = arith.constant 0.000000e+00 : f32
    %407 = vector.broadcast %cst_126 : f32 to vector<1x256xf32>
    %408 = arith.select %406, %404, %407 : vector<1x256xi1>, vector<1x256xf32>
    %409 = vector.broadcast %405 : f32 to vector<1x256xf32>
    %410 = arith.mulf %409, %408 : vector<1x256xf32>
    %411 = arith.addf %394, %410 : vector<1x256xf32>
    %c0_i32_127 = arith.constant 0 : i32
    %412 = vector.broadcast %c0_i32_127 : i32 to vector<1x256xi32>
    %413 = arith.addi %25, %412 : vector<1x256xi32>
    %c0_i32_128 = arith.constant 0 : i32
    %414 = vector.broadcast %c0_i32_128 : i32 to vector<1x256xi32>
    %415 = arith.cmpi sge, %413, %414 : vector<1x256xi32>
    %c0_i32_129 = arith.constant 0 : i32
    %416 = vector.broadcast %c0_i32_129 : i32 to vector<1x256xi32>
    %417 = arith.addi %25, %416 : vector<1x256xi32>
    %c16_i32_130 = arith.constant 16 : i32
    %418 = vector.broadcast %c16_i32_130 : i32 to vector<1x256xi32>
    %419 = arith.cmpi slt, %417, %418 : vector<1x256xi32>
    %420 = arith.andi %415, %419 : vector<1x256xi1>
    %c-3_i32_131 = arith.constant -3 : i32
    %421 = vector.broadcast %c-3_i32_131 : i32 to vector<1x256xi32>
    %422 = arith.addi %26, %421 : vector<1x256xi32>
    %c0_i32_132 = arith.constant 0 : i32
    %423 = vector.broadcast %c0_i32_132 : i32 to vector<1x256xi32>
    %424 = arith.cmpi sge, %422, %423 : vector<1x256xi32>
    %c-3_i32_133 = arith.constant -3 : i32
    %425 = vector.broadcast %c-3_i32_133 : i32 to vector<1x256xi32>
    %426 = arith.addi %26, %425 : vector<1x256xi32>
    %c16_i32_134 = arith.constant 16 : i32
    %427 = vector.broadcast %c16_i32_134 : i32 to vector<1x256xi32>
    %428 = arith.cmpi slt, %426, %427 : vector<1x256xi32>
    %429 = arith.andi %424, %428 : vector<1x256xi1>
    %c3_i32_135 = arith.constant 3 : i32
    %430 = tpu.dynamic_rotate %24 by %c3_i32_135 dim 1 : vector<1x256xf32>, i32 -> vector<1x256xf32>
    %c21 = arith.constant 21 : index
    %431 = memref.load %arg6[%c21] : memref<49xf32, #tpu.memory_space<smem>>
    %432 = arith.andi %420, %429 : vector<1x256xi1>
    %cst_136 = arith.constant 0.000000e+00 : f32
    %433 = vector.broadcast %cst_136 : f32 to vector<1x256xf32>
    %434 = arith.select %432, %430, %433 : vector<1x256xi1>, vector<1x256xf32>
    %435 = vector.broadcast %431 : f32 to vector<1x256xf32>
    %436 = arith.mulf %435, %434 : vector<1x256xf32>
    %437 = arith.addf %411, %436 : vector<1x256xf32>
    %c-2_i32_137 = arith.constant -2 : i32
    %438 = vector.broadcast %c-2_i32_137 : i32 to vector<1x256xi32>
    %439 = arith.addi %26, %438 : vector<1x256xi32>
    %c0_i32_138 = arith.constant 0 : i32
    %440 = vector.broadcast %c0_i32_138 : i32 to vector<1x256xi32>
    %441 = arith.cmpi sge, %439, %440 : vector<1x256xi32>
    %c-2_i32_139 = arith.constant -2 : i32
    %442 = vector.broadcast %c-2_i32_139 : i32 to vector<1x256xi32>
    %443 = arith.addi %26, %442 : vector<1x256xi32>
    %c16_i32_140 = arith.constant 16 : i32
    %444 = vector.broadcast %c16_i32_140 : i32 to vector<1x256xi32>
    %445 = arith.cmpi slt, %443, %444 : vector<1x256xi32>
    %446 = arith.andi %441, %445 : vector<1x256xi1>
    %c2_i32_141 = arith.constant 2 : i32
    %447 = tpu.dynamic_rotate %24 by %c2_i32_141 dim 1 : vector<1x256xf32>, i32 -> vector<1x256xf32>
    %c22 = arith.constant 22 : index
    %448 = memref.load %arg6[%c22] : memref<49xf32, #tpu.memory_space<smem>>
    %449 = arith.andi %420, %446 : vector<1x256xi1>
    %cst_142 = arith.constant 0.000000e+00 : f32
    %450 = vector.broadcast %cst_142 : f32 to vector<1x256xf32>
    %451 = arith.select %449, %447, %450 : vector<1x256xi1>, vector<1x256xf32>
    %452 = vector.broadcast %448 : f32 to vector<1x256xf32>
    %453 = arith.mulf %452, %451 : vector<1x256xf32>
    %454 = arith.addf %437, %453 : vector<1x256xf32>
    %c-1_i32_143 = arith.constant -1 : i32
    %455 = vector.broadcast %c-1_i32_143 : i32 to vector<1x256xi32>
    %456 = arith.addi %26, %455 : vector<1x256xi32>
    %c0_i32_144 = arith.constant 0 : i32
    %457 = vector.broadcast %c0_i32_144 : i32 to vector<1x256xi32>
    %458 = arith.cmpi sge, %456, %457 : vector<1x256xi32>
    %c-1_i32_145 = arith.constant -1 : i32
    %459 = vector.broadcast %c-1_i32_145 : i32 to vector<1x256xi32>
    %460 = arith.addi %26, %459 : vector<1x256xi32>
    %c16_i32_146 = arith.constant 16 : i32
    %461 = vector.broadcast %c16_i32_146 : i32 to vector<1x256xi32>
    %462 = arith.cmpi slt, %460, %461 : vector<1x256xi32>
    %463 = arith.andi %458, %462 : vector<1x256xi1>
    %c1_i32_147 = arith.constant 1 : i32
    %464 = tpu.dynamic_rotate %24 by %c1_i32_147 dim 1 : vector<1x256xf32>, i32 -> vector<1x256xf32>
    %c23 = arith.constant 23 : index
    %465 = memref.load %arg6[%c23] : memref<49xf32, #tpu.memory_space<smem>>
    %466 = arith.andi %420, %463 : vector<1x256xi1>
    %cst_148 = arith.constant 0.000000e+00 : f32
    %467 = vector.broadcast %cst_148 : f32 to vector<1x256xf32>
    %468 = arith.select %466, %464, %467 : vector<1x256xi1>, vector<1x256xf32>
    %469 = vector.broadcast %465 : f32 to vector<1x256xf32>
    %470 = arith.mulf %469, %468 : vector<1x256xf32>
    %471 = arith.addf %454, %470 : vector<1x256xf32>
    %c0_i32_149 = arith.constant 0 : i32
    %472 = vector.broadcast %c0_i32_149 : i32 to vector<1x256xi32>
    %473 = arith.addi %26, %472 : vector<1x256xi32>
    %c0_i32_150 = arith.constant 0 : i32
    %474 = vector.broadcast %c0_i32_150 : i32 to vector<1x256xi32>
    %475 = arith.cmpi sge, %473, %474 : vector<1x256xi32>
    %c0_i32_151 = arith.constant 0 : i32
    %476 = vector.broadcast %c0_i32_151 : i32 to vector<1x256xi32>
    %477 = arith.addi %26, %476 : vector<1x256xi32>
    %c16_i32_152 = arith.constant 16 : i32
    %478 = vector.broadcast %c16_i32_152 : i32 to vector<1x256xi32>
    %479 = arith.cmpi slt, %477, %478 : vector<1x256xi32>
    %480 = arith.andi %475, %479 : vector<1x256xi1>
    %c24 = arith.constant 24 : index
    %481 = memref.load %arg6[%c24] : memref<49xf32, #tpu.memory_space<smem>>
    %482 = arith.andi %420, %480 : vector<1x256xi1>
    %cst_153 = arith.constant 0.000000e+00 : f32
    %483 = vector.broadcast %cst_153 : f32 to vector<1x256xf32>
    %484 = arith.select %482, %24, %483 : vector<1x256xi1>, vector<1x256xf32>
    %485 = vector.broadcast %481 : f32 to vector<1x256xf32>
    %486 = arith.mulf %485, %484 : vector<1x256xf32>
    %487 = arith.addf %471, %486 : vector<1x256xf32>
    %c1_i32_154 = arith.constant 1 : i32
    %488 = vector.broadcast %c1_i32_154 : i32 to vector<1x256xi32>
    %489 = arith.addi %26, %488 : vector<1x256xi32>
    %c0_i32_155 = arith.constant 0 : i32
    %490 = vector.broadcast %c0_i32_155 : i32 to vector<1x256xi32>
    %491 = arith.cmpi sge, %489, %490 : vector<1x256xi32>
    %c1_i32_156 = arith.constant 1 : i32
    %492 = vector.broadcast %c1_i32_156 : i32 to vector<1x256xi32>
    %493 = arith.addi %26, %492 : vector<1x256xi32>
    %c16_i32_157 = arith.constant 16 : i32
    %494 = vector.broadcast %c16_i32_157 : i32 to vector<1x256xi32>
    %495 = arith.cmpi slt, %493, %494 : vector<1x256xi32>
    %496 = arith.andi %491, %495 : vector<1x256xi1>
    %c255_i32 = arith.constant 255 : i32
    %497 = tpu.dynamic_rotate %24 by %c255_i32 dim 1 : vector<1x256xf32>, i32 -> vector<1x256xf32>
    %c25 = arith.constant 25 : index
    %498 = memref.load %arg6[%c25] : memref<49xf32, #tpu.memory_space<smem>>
    %499 = arith.andi %420, %496 : vector<1x256xi1>
    %cst_158 = arith.constant 0.000000e+00 : f32
    %500 = vector.broadcast %cst_158 : f32 to vector<1x256xf32>
    %501 = arith.select %499, %497, %500 : vector<1x256xi1>, vector<1x256xf32>
    %502 = vector.broadcast %498 : f32 to vector<1x256xf32>
    %503 = arith.mulf %502, %501 : vector<1x256xf32>
    %504 = arith.addf %487, %503 : vector<1x256xf32>
    %c2_i32_159 = arith.constant 2 : i32
    %505 = vector.broadcast %c2_i32_159 : i32 to vector<1x256xi32>
    %506 = arith.addi %26, %505 : vector<1x256xi32>
    %c0_i32_160 = arith.constant 0 : i32
    %507 = vector.broadcast %c0_i32_160 : i32 to vector<1x256xi32>
    %508 = arith.cmpi sge, %506, %507 : vector<1x256xi32>
    %c2_i32_161 = arith.constant 2 : i32
    %509 = vector.broadcast %c2_i32_161 : i32 to vector<1x256xi32>
    %510 = arith.addi %26, %509 : vector<1x256xi32>
    %c16_i32_162 = arith.constant 16 : i32
    %511 = vector.broadcast %c16_i32_162 : i32 to vector<1x256xi32>
    %512 = arith.cmpi slt, %510, %511 : vector<1x256xi32>
    %513 = arith.andi %508, %512 : vector<1x256xi1>
    %c254_i32 = arith.constant 254 : i32
    %514 = tpu.dynamic_rotate %24 by %c254_i32 dim 1 : vector<1x256xf32>, i32 -> vector<1x256xf32>
    %c26 = arith.constant 26 : index
    %515 = memref.load %arg6[%c26] : memref<49xf32, #tpu.memory_space<smem>>
    %516 = arith.andi %420, %513 : vector<1x256xi1>
    %cst_163 = arith.constant 0.000000e+00 : f32
    %517 = vector.broadcast %cst_163 : f32 to vector<1x256xf32>
    %518 = arith.select %516, %514, %517 : vector<1x256xi1>, vector<1x256xf32>
    %519 = vector.broadcast %515 : f32 to vector<1x256xf32>
    %520 = arith.mulf %519, %518 : vector<1x256xf32>
    %521 = arith.addf %504, %520 : vector<1x256xf32>
    %c3_i32_164 = arith.constant 3 : i32
    %522 = vector.broadcast %c3_i32_164 : i32 to vector<1x256xi32>
    %523 = arith.addi %26, %522 : vector<1x256xi32>
    %c0_i32_165 = arith.constant 0 : i32
    %524 = vector.broadcast %c0_i32_165 : i32 to vector<1x256xi32>
    %525 = arith.cmpi sge, %523, %524 : vector<1x256xi32>
    %c3_i32_166 = arith.constant 3 : i32
    %526 = vector.broadcast %c3_i32_166 : i32 to vector<1x256xi32>
    %527 = arith.addi %26, %526 : vector<1x256xi32>
    %c16_i32_167 = arith.constant 16 : i32
    %528 = vector.broadcast %c16_i32_167 : i32 to vector<1x256xi32>
    %529 = arith.cmpi slt, %527, %528 : vector<1x256xi32>
    %530 = arith.andi %525, %529 : vector<1x256xi1>
    %c253_i32 = arith.constant 253 : i32
    %531 = tpu.dynamic_rotate %24 by %c253_i32 dim 1 : vector<1x256xf32>, i32 -> vector<1x256xf32>
    %c27 = arith.constant 27 : index
    %532 = memref.load %arg6[%c27] : memref<49xf32, #tpu.memory_space<smem>>
    %533 = arith.andi %420, %530 : vector<1x256xi1>
    %cst_168 = arith.constant 0.000000e+00 : f32
    %534 = vector.broadcast %cst_168 : f32 to vector<1x256xf32>
    %535 = arith.select %533, %531, %534 : vector<1x256xi1>, vector<1x256xf32>
    %536 = vector.broadcast %532 : f32 to vector<1x256xf32>
    %537 = arith.mulf %536, %535 : vector<1x256xf32>
    %538 = arith.addf %521, %537 : vector<1x256xf32>
    %c1_i32_169 = arith.constant 1 : i32
    %539 = vector.broadcast %c1_i32_169 : i32 to vector<1x256xi32>
    %540 = arith.addi %25, %539 : vector<1x256xi32>
    %c0_i32_170 = arith.constant 0 : i32
    %541 = vector.broadcast %c0_i32_170 : i32 to vector<1x256xi32>
    %542 = arith.cmpi sge, %540, %541 : vector<1x256xi32>
    %c1_i32_171 = arith.constant 1 : i32
    %543 = vector.broadcast %c1_i32_171 : i32 to vector<1x256xi32>
    %544 = arith.addi %25, %543 : vector<1x256xi32>
    %c16_i32_172 = arith.constant 16 : i32
    %545 = vector.broadcast %c16_i32_172 : i32 to vector<1x256xi32>
    %546 = arith.cmpi slt, %544, %545 : vector<1x256xi32>
    %547 = arith.andi %542, %546 : vector<1x256xi1>
    %c-3_i32_173 = arith.constant -3 : i32
    %548 = vector.broadcast %c-3_i32_173 : i32 to vector<1x256xi32>
    %549 = arith.addi %26, %548 : vector<1x256xi32>
    %c0_i32_174 = arith.constant 0 : i32
    %550 = vector.broadcast %c0_i32_174 : i32 to vector<1x256xi32>
    %551 = arith.cmpi sge, %549, %550 : vector<1x256xi32>
    %c-3_i32_175 = arith.constant -3 : i32
    %552 = vector.broadcast %c-3_i32_175 : i32 to vector<1x256xi32>
    %553 = arith.addi %26, %552 : vector<1x256xi32>
    %c16_i32_176 = arith.constant 16 : i32
    %554 = vector.broadcast %c16_i32_176 : i32 to vector<1x256xi32>
    %555 = arith.cmpi slt, %553, %554 : vector<1x256xi32>
    %556 = arith.andi %551, %555 : vector<1x256xi1>
    %c243_i32 = arith.constant 243 : i32
    %557 = tpu.dynamic_rotate %24 by %c243_i32 dim 1 : vector<1x256xf32>, i32 -> vector<1x256xf32>
    %c28 = arith.constant 28 : index
    %558 = memref.load %arg6[%c28] : memref<49xf32, #tpu.memory_space<smem>>
    %559 = arith.andi %547, %556 : vector<1x256xi1>
    %cst_177 = arith.constant 0.000000e+00 : f32
    %560 = vector.broadcast %cst_177 : f32 to vector<1x256xf32>
    %561 = arith.select %559, %557, %560 : vector<1x256xi1>, vector<1x256xf32>
    %562 = vector.broadcast %558 : f32 to vector<1x256xf32>
    %563 = arith.mulf %562, %561 : vector<1x256xf32>
    %564 = arith.addf %538, %563 : vector<1x256xf32>
    %c-2_i32_178 = arith.constant -2 : i32
    %565 = vector.broadcast %c-2_i32_178 : i32 to vector<1x256xi32>
    %566 = arith.addi %26, %565 : vector<1x256xi32>
    %c0_i32_179 = arith.constant 0 : i32
    %567 = vector.broadcast %c0_i32_179 : i32 to vector<1x256xi32>
    %568 = arith.cmpi sge, %566, %567 : vector<1x256xi32>
    %c-2_i32_180 = arith.constant -2 : i32
    %569 = vector.broadcast %c-2_i32_180 : i32 to vector<1x256xi32>
    %570 = arith.addi %26, %569 : vector<1x256xi32>
    %c16_i32_181 = arith.constant 16 : i32
    %571 = vector.broadcast %c16_i32_181 : i32 to vector<1x256xi32>
    %572 = arith.cmpi slt, %570, %571 : vector<1x256xi32>
    %573 = arith.andi %568, %572 : vector<1x256xi1>
    %c242_i32 = arith.constant 242 : i32
    %574 = tpu.dynamic_rotate %24 by %c242_i32 dim 1 : vector<1x256xf32>, i32 -> vector<1x256xf32>
    %c29 = arith.constant 29 : index
    %575 = memref.load %arg6[%c29] : memref<49xf32, #tpu.memory_space<smem>>
    %576 = arith.andi %547, %573 : vector<1x256xi1>
    %cst_182 = arith.constant 0.000000e+00 : f32
    %577 = vector.broadcast %cst_182 : f32 to vector<1x256xf32>
    %578 = arith.select %576, %574, %577 : vector<1x256xi1>, vector<1x256xf32>
    %579 = vector.broadcast %575 : f32 to vector<1x256xf32>
    %580 = arith.mulf %579, %578 : vector<1x256xf32>
    %581 = arith.addf %564, %580 : vector<1x256xf32>
    %c-1_i32_183 = arith.constant -1 : i32
    %582 = vector.broadcast %c-1_i32_183 : i32 to vector<1x256xi32>
    %583 = arith.addi %26, %582 : vector<1x256xi32>
    %c0_i32_184 = arith.constant 0 : i32
    %584 = vector.broadcast %c0_i32_184 : i32 to vector<1x256xi32>
    %585 = arith.cmpi sge, %583, %584 : vector<1x256xi32>
    %c-1_i32_185 = arith.constant -1 : i32
    %586 = vector.broadcast %c-1_i32_185 : i32 to vector<1x256xi32>
    %587 = arith.addi %26, %586 : vector<1x256xi32>
    %c16_i32_186 = arith.constant 16 : i32
    %588 = vector.broadcast %c16_i32_186 : i32 to vector<1x256xi32>
    %589 = arith.cmpi slt, %587, %588 : vector<1x256xi32>
    %590 = arith.andi %585, %589 : vector<1x256xi1>
    %c241_i32 = arith.constant 241 : i32
    %591 = tpu.dynamic_rotate %24 by %c241_i32 dim 1 : vector<1x256xf32>, i32 -> vector<1x256xf32>
    %c30 = arith.constant 30 : index
    %592 = memref.load %arg6[%c30] : memref<49xf32, #tpu.memory_space<smem>>
    %593 = arith.andi %547, %590 : vector<1x256xi1>
    %cst_187 = arith.constant 0.000000e+00 : f32
    %594 = vector.broadcast %cst_187 : f32 to vector<1x256xf32>
    %595 = arith.select %593, %591, %594 : vector<1x256xi1>, vector<1x256xf32>
    %596 = vector.broadcast %592 : f32 to vector<1x256xf32>
    %597 = arith.mulf %596, %595 : vector<1x256xf32>
    %598 = arith.addf %581, %597 : vector<1x256xf32>
    %c0_i32_188 = arith.constant 0 : i32
    %599 = vector.broadcast %c0_i32_188 : i32 to vector<1x256xi32>
    %600 = arith.addi %26, %599 : vector<1x256xi32>
    %c0_i32_189 = arith.constant 0 : i32
    %601 = vector.broadcast %c0_i32_189 : i32 to vector<1x256xi32>
    %602 = arith.cmpi sge, %600, %601 : vector<1x256xi32>
    %c0_i32_190 = arith.constant 0 : i32
    %603 = vector.broadcast %c0_i32_190 : i32 to vector<1x256xi32>
    %604 = arith.addi %26, %603 : vector<1x256xi32>
    %c16_i32_191 = arith.constant 16 : i32
    %605 = vector.broadcast %c16_i32_191 : i32 to vector<1x256xi32>
    %606 = arith.cmpi slt, %604, %605 : vector<1x256xi32>
    %607 = arith.andi %602, %606 : vector<1x256xi1>
    %c240_i32 = arith.constant 240 : i32
    %608 = tpu.dynamic_rotate %24 by %c240_i32 dim 1 : vector<1x256xf32>, i32 -> vector<1x256xf32>
    %c31 = arith.constant 31 : index
    %609 = memref.load %arg6[%c31] : memref<49xf32, #tpu.memory_space<smem>>
    %610 = arith.andi %547, %607 : vector<1x256xi1>
    %cst_192 = arith.constant 0.000000e+00 : f32
    %611 = vector.broadcast %cst_192 : f32 to vector<1x256xf32>
    %612 = arith.select %610, %608, %611 : vector<1x256xi1>, vector<1x256xf32>
    %613 = vector.broadcast %609 : f32 to vector<1x256xf32>
    %614 = arith.mulf %613, %612 : vector<1x256xf32>
    %615 = arith.addf %598, %614 : vector<1x256xf32>
    %c1_i32_193 = arith.constant 1 : i32
    %616 = vector.broadcast %c1_i32_193 : i32 to vector<1x256xi32>
    %617 = arith.addi %26, %616 : vector<1x256xi32>
    %c0_i32_194 = arith.constant 0 : i32
    %618 = vector.broadcast %c0_i32_194 : i32 to vector<1x256xi32>
    %619 = arith.cmpi sge, %617, %618 : vector<1x256xi32>
    %c1_i32_195 = arith.constant 1 : i32
    %620 = vector.broadcast %c1_i32_195 : i32 to vector<1x256xi32>
    %621 = arith.addi %26, %620 : vector<1x256xi32>
    %c16_i32_196 = arith.constant 16 : i32
    %622 = vector.broadcast %c16_i32_196 : i32 to vector<1x256xi32>
    %623 = arith.cmpi slt, %621, %622 : vector<1x256xi32>
    %624 = arith.andi %619, %623 : vector<1x256xi1>
    %c239_i32 = arith.constant 239 : i32
    %625 = tpu.dynamic_rotate %24 by %c239_i32 dim 1 : vector<1x256xf32>, i32 -> vector<1x256xf32>
    %c32 = arith.constant 32 : index
    %626 = memref.load %arg6[%c32] : memref<49xf32, #tpu.memory_space<smem>>
    %627 = arith.andi %547, %624 : vector<1x256xi1>
    %cst_197 = arith.constant 0.000000e+00 : f32
    %628 = vector.broadcast %cst_197 : f32 to vector<1x256xf32>
    %629 = arith.select %627, %625, %628 : vector<1x256xi1>, vector<1x256xf32>
    %630 = vector.broadcast %626 : f32 to vector<1x256xf32>
    %631 = arith.mulf %630, %629 : vector<1x256xf32>
    %632 = arith.addf %615, %631 : vector<1x256xf32>
    %c2_i32_198 = arith.constant 2 : i32
    %633 = vector.broadcast %c2_i32_198 : i32 to vector<1x256xi32>
    %634 = arith.addi %26, %633 : vector<1x256xi32>
    %c0_i32_199 = arith.constant 0 : i32
    %635 = vector.broadcast %c0_i32_199 : i32 to vector<1x256xi32>
    %636 = arith.cmpi sge, %634, %635 : vector<1x256xi32>
    %c2_i32_200 = arith.constant 2 : i32
    %637 = vector.broadcast %c2_i32_200 : i32 to vector<1x256xi32>
    %638 = arith.addi %26, %637 : vector<1x256xi32>
    %c16_i32_201 = arith.constant 16 : i32
    %639 = vector.broadcast %c16_i32_201 : i32 to vector<1x256xi32>
    %640 = arith.cmpi slt, %638, %639 : vector<1x256xi32>
    %641 = arith.andi %636, %640 : vector<1x256xi1>
    %c238_i32 = arith.constant 238 : i32
    %642 = tpu.dynamic_rotate %24 by %c238_i32 dim 1 : vector<1x256xf32>, i32 -> vector<1x256xf32>
    %c33 = arith.constant 33 : index
    %643 = memref.load %arg6[%c33] : memref<49xf32, #tpu.memory_space<smem>>
    %644 = arith.andi %547, %641 : vector<1x256xi1>
    %cst_202 = arith.constant 0.000000e+00 : f32
    %645 = vector.broadcast %cst_202 : f32 to vector<1x256xf32>
    %646 = arith.select %644, %642, %645 : vector<1x256xi1>, vector<1x256xf32>
    %647 = vector.broadcast %643 : f32 to vector<1x256xf32>
    %648 = arith.mulf %647, %646 : vector<1x256xf32>
    %649 = arith.addf %632, %648 : vector<1x256xf32>
    %c3_i32_203 = arith.constant 3 : i32
    %650 = vector.broadcast %c3_i32_203 : i32 to vector<1x256xi32>
    %651 = arith.addi %26, %650 : vector<1x256xi32>
    %c0_i32_204 = arith.constant 0 : i32
    %652 = vector.broadcast %c0_i32_204 : i32 to vector<1x256xi32>
    %653 = arith.cmpi sge, %651, %652 : vector<1x256xi32>
    %c3_i32_205 = arith.constant 3 : i32
    %654 = vector.broadcast %c3_i32_205 : i32 to vector<1x256xi32>
    %655 = arith.addi %26, %654 : vector<1x256xi32>
    %c16_i32_206 = arith.constant 16 : i32
    %656 = vector.broadcast %c16_i32_206 : i32 to vector<1x256xi32>
    %657 = arith.cmpi slt, %655, %656 : vector<1x256xi32>
    %658 = arith.andi %653, %657 : vector<1x256xi1>
    %c237_i32 = arith.constant 237 : i32
    %659 = tpu.dynamic_rotate %24 by %c237_i32 dim 1 : vector<1x256xf32>, i32 -> vector<1x256xf32>
    %c34 = arith.constant 34 : index
    %660 = memref.load %arg6[%c34] : memref<49xf32, #tpu.memory_space<smem>>
    %661 = arith.andi %547, %658 : vector<1x256xi1>
    %cst_207 = arith.constant 0.000000e+00 : f32
    %662 = vector.broadcast %cst_207 : f32 to vector<1x256xf32>
    %663 = arith.select %661, %659, %662 : vector<1x256xi1>, vector<1x256xf32>
    %664 = vector.broadcast %660 : f32 to vector<1x256xf32>
    %665 = arith.mulf %664, %663 : vector<1x256xf32>
    %666 = arith.addf %649, %665 : vector<1x256xf32>
    %c2_i32_208 = arith.constant 2 : i32
    %667 = vector.broadcast %c2_i32_208 : i32 to vector<1x256xi32>
    %668 = arith.addi %25, %667 : vector<1x256xi32>
    %c0_i32_209 = arith.constant 0 : i32
    %669 = vector.broadcast %c0_i32_209 : i32 to vector<1x256xi32>
    %670 = arith.cmpi sge, %668, %669 : vector<1x256xi32>
    %c2_i32_210 = arith.constant 2 : i32
    %671 = vector.broadcast %c2_i32_210 : i32 to vector<1x256xi32>
    %672 = arith.addi %25, %671 : vector<1x256xi32>
    %c16_i32_211 = arith.constant 16 : i32
    %673 = vector.broadcast %c16_i32_211 : i32 to vector<1x256xi32>
    %674 = arith.cmpi slt, %672, %673 : vector<1x256xi32>
    %675 = arith.andi %670, %674 : vector<1x256xi1>
    %c-3_i32_212 = arith.constant -3 : i32
    %676 = vector.broadcast %c-3_i32_212 : i32 to vector<1x256xi32>
    %677 = arith.addi %26, %676 : vector<1x256xi32>
    %c0_i32_213 = arith.constant 0 : i32
    %678 = vector.broadcast %c0_i32_213 : i32 to vector<1x256xi32>
    %679 = arith.cmpi sge, %677, %678 : vector<1x256xi32>
    %c-3_i32_214 = arith.constant -3 : i32
    %680 = vector.broadcast %c-3_i32_214 : i32 to vector<1x256xi32>
    %681 = arith.addi %26, %680 : vector<1x256xi32>
    %c16_i32_215 = arith.constant 16 : i32
    %682 = vector.broadcast %c16_i32_215 : i32 to vector<1x256xi32>
    %683 = arith.cmpi slt, %681, %682 : vector<1x256xi32>
    %684 = arith.andi %679, %683 : vector<1x256xi1>
    %c227_i32 = arith.constant 227 : i32
    %685 = tpu.dynamic_rotate %24 by %c227_i32 dim 1 : vector<1x256xf32>, i32 -> vector<1x256xf32>
    %c35 = arith.constant 35 : index
    %686 = memref.load %arg6[%c35] : memref<49xf32, #tpu.memory_space<smem>>
    %687 = arith.andi %675, %684 : vector<1x256xi1>
    %cst_216 = arith.constant 0.000000e+00 : f32
    %688 = vector.broadcast %cst_216 : f32 to vector<1x256xf32>
    %689 = arith.select %687, %685, %688 : vector<1x256xi1>, vector<1x256xf32>
    %690 = vector.broadcast %686 : f32 to vector<1x256xf32>
    %691 = arith.mulf %690, %689 : vector<1x256xf32>
    %692 = arith.addf %666, %691 : vector<1x256xf32>
    %c-2_i32_217 = arith.constant -2 : i32
    %693 = vector.broadcast %c-2_i32_217 : i32 to vector<1x256xi32>
    %694 = arith.addi %26, %693 : vector<1x256xi32>
    %c0_i32_218 = arith.constant 0 : i32
    %695 = vector.broadcast %c0_i32_218 : i32 to vector<1x256xi32>
    %696 = arith.cmpi sge, %694, %695 : vector<1x256xi32>
    %c-2_i32_219 = arith.constant -2 : i32
    %697 = vector.broadcast %c-2_i32_219 : i32 to vector<1x256xi32>
    %698 = arith.addi %26, %697 : vector<1x256xi32>
    %c16_i32_220 = arith.constant 16 : i32
    %699 = vector.broadcast %c16_i32_220 : i32 to vector<1x256xi32>
    %700 = arith.cmpi slt, %698, %699 : vector<1x256xi32>
    %701 = arith.andi %696, %700 : vector<1x256xi1>
    %c226_i32 = arith.constant 226 : i32
    %702 = tpu.dynamic_rotate %24 by %c226_i32 dim 1 : vector<1x256xf32>, i32 -> vector<1x256xf32>
    %c36 = arith.constant 36 : index
    %703 = memref.load %arg6[%c36] : memref<49xf32, #tpu.memory_space<smem>>
    %704 = arith.andi %675, %701 : vector<1x256xi1>
    %cst_221 = arith.constant 0.000000e+00 : f32
    %705 = vector.broadcast %cst_221 : f32 to vector<1x256xf32>
    %706 = arith.select %704, %702, %705 : vector<1x256xi1>, vector<1x256xf32>
    %707 = vector.broadcast %703 : f32 to vector<1x256xf32>
    %708 = arith.mulf %707, %706 : vector<1x256xf32>
    %709 = arith.addf %692, %708 : vector<1x256xf32>
    %c-1_i32_222 = arith.constant -1 : i32
    %710 = vector.broadcast %c-1_i32_222 : i32 to vector<1x256xi32>
    %711 = arith.addi %26, %710 : vector<1x256xi32>
    %c0_i32_223 = arith.constant 0 : i32
    %712 = vector.broadcast %c0_i32_223 : i32 to vector<1x256xi32>
    %713 = arith.cmpi sge, %711, %712 : vector<1x256xi32>
    %c-1_i32_224 = arith.constant -1 : i32
    %714 = vector.broadcast %c-1_i32_224 : i32 to vector<1x256xi32>
    %715 = arith.addi %26, %714 : vector<1x256xi32>
    %c16_i32_225 = arith.constant 16 : i32
    %716 = vector.broadcast %c16_i32_225 : i32 to vector<1x256xi32>
    %717 = arith.cmpi slt, %715, %716 : vector<1x256xi32>
    %718 = arith.andi %713, %717 : vector<1x256xi1>
    %c225_i32 = arith.constant 225 : i32
    %719 = tpu.dynamic_rotate %24 by %c225_i32 dim 1 : vector<1x256xf32>, i32 -> vector<1x256xf32>
    %c37 = arith.constant 37 : index
    %720 = memref.load %arg6[%c37] : memref<49xf32, #tpu.memory_space<smem>>
    %721 = arith.andi %675, %718 : vector<1x256xi1>
    %cst_226 = arith.constant 0.000000e+00 : f32
    %722 = vector.broadcast %cst_226 : f32 to vector<1x256xf32>
    %723 = arith.select %721, %719, %722 : vector<1x256xi1>, vector<1x256xf32>
    %724 = vector.broadcast %720 : f32 to vector<1x256xf32>
    %725 = arith.mulf %724, %723 : vector<1x256xf32>
    %726 = arith.addf %709, %725 : vector<1x256xf32>
    %c0_i32_227 = arith.constant 0 : i32
    %727 = vector.broadcast %c0_i32_227 : i32 to vector<1x256xi32>
    %728 = arith.addi %26, %727 : vector<1x256xi32>
    %c0_i32_228 = arith.constant 0 : i32
    %729 = vector.broadcast %c0_i32_228 : i32 to vector<1x256xi32>
    %730 = arith.cmpi sge, %728, %729 : vector<1x256xi32>
    %c0_i32_229 = arith.constant 0 : i32
    %731 = vector.broadcast %c0_i32_229 : i32 to vector<1x256xi32>
    %732 = arith.addi %26, %731 : vector<1x256xi32>
    %c16_i32_230 = arith.constant 16 : i32
    %733 = vector.broadcast %c16_i32_230 : i32 to vector<1x256xi32>
    %734 = arith.cmpi slt, %732, %733 : vector<1x256xi32>
    %735 = arith.andi %730, %734 : vector<1x256xi1>
    %c224_i32 = arith.constant 224 : i32
    %736 = tpu.dynamic_rotate %24 by %c224_i32 dim 1 : vector<1x256xf32>, i32 -> vector<1x256xf32>
    %c38 = arith.constant 38 : index
    %737 = memref.load %arg6[%c38] : memref<49xf32, #tpu.memory_space<smem>>
    %738 = arith.andi %675, %735 : vector<1x256xi1>
    %cst_231 = arith.constant 0.000000e+00 : f32
    %739 = vector.broadcast %cst_231 : f32 to vector<1x256xf32>
    %740 = arith.select %738, %736, %739 : vector<1x256xi1>, vector<1x256xf32>
    %741 = vector.broadcast %737 : f32 to vector<1x256xf32>
    %742 = arith.mulf %741, %740 : vector<1x256xf32>
    %743 = arith.addf %726, %742 : vector<1x256xf32>
    %c1_i32_232 = arith.constant 1 : i32
    %744 = vector.broadcast %c1_i32_232 : i32 to vector<1x256xi32>
    %745 = arith.addi %26, %744 : vector<1x256xi32>
    %c0_i32_233 = arith.constant 0 : i32
    %746 = vector.broadcast %c0_i32_233 : i32 to vector<1x256xi32>
    %747 = arith.cmpi sge, %745, %746 : vector<1x256xi32>
    %c1_i32_234 = arith.constant 1 : i32
    %748 = vector.broadcast %c1_i32_234 : i32 to vector<1x256xi32>
    %749 = arith.addi %26, %748 : vector<1x256xi32>
    %c16_i32_235 = arith.constant 16 : i32
    %750 = vector.broadcast %c16_i32_235 : i32 to vector<1x256xi32>
    %751 = arith.cmpi slt, %749, %750 : vector<1x256xi32>
    %752 = arith.andi %747, %751 : vector<1x256xi1>
    %c223_i32 = arith.constant 223 : i32
    %753 = tpu.dynamic_rotate %24 by %c223_i32 dim 1 : vector<1x256xf32>, i32 -> vector<1x256xf32>
    %c39 = arith.constant 39 : index
    %754 = memref.load %arg6[%c39] : memref<49xf32, #tpu.memory_space<smem>>
    %755 = arith.andi %675, %752 : vector<1x256xi1>
    %cst_236 = arith.constant 0.000000e+00 : f32
    %756 = vector.broadcast %cst_236 : f32 to vector<1x256xf32>
    %757 = arith.select %755, %753, %756 : vector<1x256xi1>, vector<1x256xf32>
    %758 = vector.broadcast %754 : f32 to vector<1x256xf32>
    %759 = arith.mulf %758, %757 : vector<1x256xf32>
    %760 = arith.addf %743, %759 : vector<1x256xf32>
    %c2_i32_237 = arith.constant 2 : i32
    %761 = vector.broadcast %c2_i32_237 : i32 to vector<1x256xi32>
    %762 = arith.addi %26, %761 : vector<1x256xi32>
    %c0_i32_238 = arith.constant 0 : i32
    %763 = vector.broadcast %c0_i32_238 : i32 to vector<1x256xi32>
    %764 = arith.cmpi sge, %762, %763 : vector<1x256xi32>
    %c2_i32_239 = arith.constant 2 : i32
    %765 = vector.broadcast %c2_i32_239 : i32 to vector<1x256xi32>
    %766 = arith.addi %26, %765 : vector<1x256xi32>
    %c16_i32_240 = arith.constant 16 : i32
    %767 = vector.broadcast %c16_i32_240 : i32 to vector<1x256xi32>
    %768 = arith.cmpi slt, %766, %767 : vector<1x256xi32>
    %769 = arith.andi %764, %768 : vector<1x256xi1>
    %c222_i32 = arith.constant 222 : i32
    %770 = tpu.dynamic_rotate %24 by %c222_i32 dim 1 : vector<1x256xf32>, i32 -> vector<1x256xf32>
    %c40 = arith.constant 40 : index
    %771 = memref.load %arg6[%c40] : memref<49xf32, #tpu.memory_space<smem>>
    %772 = arith.andi %675, %769 : vector<1x256xi1>
    %cst_241 = arith.constant 0.000000e+00 : f32
    %773 = vector.broadcast %cst_241 : f32 to vector<1x256xf32>
    %774 = arith.select %772, %770, %773 : vector<1x256xi1>, vector<1x256xf32>
    %775 = vector.broadcast %771 : f32 to vector<1x256xf32>
    %776 = arith.mulf %775, %774 : vector<1x256xf32>
    %777 = arith.addf %760, %776 : vector<1x256xf32>
    %c3_i32_242 = arith.constant 3 : i32
    %778 = vector.broadcast %c3_i32_242 : i32 to vector<1x256xi32>
    %779 = arith.addi %26, %778 : vector<1x256xi32>
    %c0_i32_243 = arith.constant 0 : i32
    %780 = vector.broadcast %c0_i32_243 : i32 to vector<1x256xi32>
    %781 = arith.cmpi sge, %779, %780 : vector<1x256xi32>
    %c3_i32_244 = arith.constant 3 : i32
    %782 = vector.broadcast %c3_i32_244 : i32 to vector<1x256xi32>
    %783 = arith.addi %26, %782 : vector<1x256xi32>
    %c16_i32_245 = arith.constant 16 : i32
    %784 = vector.broadcast %c16_i32_245 : i32 to vector<1x256xi32>
    %785 = arith.cmpi slt, %783, %784 : vector<1x256xi32>
    %786 = arith.andi %781, %785 : vector<1x256xi1>
    %c221_i32 = arith.constant 221 : i32
    %787 = tpu.dynamic_rotate %24 by %c221_i32 dim 1 : vector<1x256xf32>, i32 -> vector<1x256xf32>
    %c41 = arith.constant 41 : index
    %788 = memref.load %arg6[%c41] : memref<49xf32, #tpu.memory_space<smem>>
    %789 = arith.andi %675, %786 : vector<1x256xi1>
    %cst_246 = arith.constant 0.000000e+00 : f32
    %790 = vector.broadcast %cst_246 : f32 to vector<1x256xf32>
    %791 = arith.select %789, %787, %790 : vector<1x256xi1>, vector<1x256xf32>
    %792 = vector.broadcast %788 : f32 to vector<1x256xf32>
    %793 = arith.mulf %792, %791 : vector<1x256xf32>
    %794 = arith.addf %777, %793 : vector<1x256xf32>
    %c3_i32_247 = arith.constant 3 : i32
    %795 = vector.broadcast %c3_i32_247 : i32 to vector<1x256xi32>
    %796 = arith.addi %25, %795 : vector<1x256xi32>
    %c0_i32_248 = arith.constant 0 : i32
    %797 = vector.broadcast %c0_i32_248 : i32 to vector<1x256xi32>
    %798 = arith.cmpi sge, %796, %797 : vector<1x256xi32>
    %c3_i32_249 = arith.constant 3 : i32
    %799 = vector.broadcast %c3_i32_249 : i32 to vector<1x256xi32>
    %800 = arith.addi %25, %799 : vector<1x256xi32>
    %c16_i32_250 = arith.constant 16 : i32
    %801 = vector.broadcast %c16_i32_250 : i32 to vector<1x256xi32>
    %802 = arith.cmpi slt, %800, %801 : vector<1x256xi32>
    %803 = arith.andi %798, %802 : vector<1x256xi1>
    %c-3_i32_251 = arith.constant -3 : i32
    %804 = vector.broadcast %c-3_i32_251 : i32 to vector<1x256xi32>
    %805 = arith.addi %26, %804 : vector<1x256xi32>
    %c0_i32_252 = arith.constant 0 : i32
    %806 = vector.broadcast %c0_i32_252 : i32 to vector<1x256xi32>
    %807 = arith.cmpi sge, %805, %806 : vector<1x256xi32>
    %c-3_i32_253 = arith.constant -3 : i32
    %808 = vector.broadcast %c-3_i32_253 : i32 to vector<1x256xi32>
    %809 = arith.addi %26, %808 : vector<1x256xi32>
    %c16_i32_254 = arith.constant 16 : i32
    %810 = vector.broadcast %c16_i32_254 : i32 to vector<1x256xi32>
    %811 = arith.cmpi slt, %809, %810 : vector<1x256xi32>
    %812 = arith.andi %807, %811 : vector<1x256xi1>
    %c211_i32 = arith.constant 211 : i32
    %813 = tpu.dynamic_rotate %24 by %c211_i32 dim 1 : vector<1x256xf32>, i32 -> vector<1x256xf32>
    %c42 = arith.constant 42 : index
    %814 = memref.load %arg6[%c42] : memref<49xf32, #tpu.memory_space<smem>>
    %815 = arith.andi %803, %812 : vector<1x256xi1>
    %cst_255 = arith.constant 0.000000e+00 : f32
    %816 = vector.broadcast %cst_255 : f32 to vector<1x256xf32>
    %817 = arith.select %815, %813, %816 : vector<1x256xi1>, vector<1x256xf32>
    %818 = vector.broadcast %814 : f32 to vector<1x256xf32>
    %819 = arith.mulf %818, %817 : vector<1x256xf32>
    %820 = arith.addf %794, %819 : vector<1x256xf32>
    %c-2_i32_256 = arith.constant -2 : i32
    %821 = vector.broadcast %c-2_i32_256 : i32 to vector<1x256xi32>
    %822 = arith.addi %26, %821 : vector<1x256xi32>
    %c0_i32_257 = arith.constant 0 : i32
    %823 = vector.broadcast %c0_i32_257 : i32 to vector<1x256xi32>
    %824 = arith.cmpi sge, %822, %823 : vector<1x256xi32>
    %c-2_i32_258 = arith.constant -2 : i32
    %825 = vector.broadcast %c-2_i32_258 : i32 to vector<1x256xi32>
    %826 = arith.addi %26, %825 : vector<1x256xi32>
    %c16_i32_259 = arith.constant 16 : i32
    %827 = vector.broadcast %c16_i32_259 : i32 to vector<1x256xi32>
    %828 = arith.cmpi slt, %826, %827 : vector<1x256xi32>
    %829 = arith.andi %824, %828 : vector<1x256xi1>
    %c210_i32 = arith.constant 210 : i32
    %830 = tpu.dynamic_rotate %24 by %c210_i32 dim 1 : vector<1x256xf32>, i32 -> vector<1x256xf32>
    %c43 = arith.constant 43 : index
    %831 = memref.load %arg6[%c43] : memref<49xf32, #tpu.memory_space<smem>>
    %832 = arith.andi %803, %829 : vector<1x256xi1>
    %cst_260 = arith.constant 0.000000e+00 : f32
    %833 = vector.broadcast %cst_260 : f32 to vector<1x256xf32>
    %834 = arith.select %832, %830, %833 : vector<1x256xi1>, vector<1x256xf32>
    %835 = vector.broadcast %831 : f32 to vector<1x256xf32>
    %836 = arith.mulf %835, %834 : vector<1x256xf32>
    %837 = arith.addf %820, %836 : vector<1x256xf32>
    %c-1_i32_261 = arith.constant -1 : i32
    %838 = vector.broadcast %c-1_i32_261 : i32 to vector<1x256xi32>
    %839 = arith.addi %26, %838 : vector<1x256xi32>
    %c0_i32_262 = arith.constant 0 : i32
    %840 = vector.broadcast %c0_i32_262 : i32 to vector<1x256xi32>
    %841 = arith.cmpi sge, %839, %840 : vector<1x256xi32>
    %c-1_i32_263 = arith.constant -1 : i32
    %842 = vector.broadcast %c-1_i32_263 : i32 to vector<1x256xi32>
    %843 = arith.addi %26, %842 : vector<1x256xi32>
    %c16_i32_264 = arith.constant 16 : i32
    %844 = vector.broadcast %c16_i32_264 : i32 to vector<1x256xi32>
    %845 = arith.cmpi slt, %843, %844 : vector<1x256xi32>
    %846 = arith.andi %841, %845 : vector<1x256xi1>
    %c209_i32 = arith.constant 209 : i32
    %847 = tpu.dynamic_rotate %24 by %c209_i32 dim 1 : vector<1x256xf32>, i32 -> vector<1x256xf32>
    %c44 = arith.constant 44 : index
    %848 = memref.load %arg6[%c44] : memref<49xf32, #tpu.memory_space<smem>>
    %849 = arith.andi %803, %846 : vector<1x256xi1>
    %cst_265 = arith.constant 0.000000e+00 : f32
    %850 = vector.broadcast %cst_265 : f32 to vector<1x256xf32>
    %851 = arith.select %849, %847, %850 : vector<1x256xi1>, vector<1x256xf32>
    %852 = vector.broadcast %848 : f32 to vector<1x256xf32>
    %853 = arith.mulf %852, %851 : vector<1x256xf32>
    %854 = arith.addf %837, %853 : vector<1x256xf32>
    %c0_i32_266 = arith.constant 0 : i32
    %855 = vector.broadcast %c0_i32_266 : i32 to vector<1x256xi32>
    %856 = arith.addi %26, %855 : vector<1x256xi32>
    %c0_i32_267 = arith.constant 0 : i32
    %857 = vector.broadcast %c0_i32_267 : i32 to vector<1x256xi32>
    %858 = arith.cmpi sge, %856, %857 : vector<1x256xi32>
    %c0_i32_268 = arith.constant 0 : i32
    %859 = vector.broadcast %c0_i32_268 : i32 to vector<1x256xi32>
    %860 = arith.addi %26, %859 : vector<1x256xi32>
    %c16_i32_269 = arith.constant 16 : i32
    %861 = vector.broadcast %c16_i32_269 : i32 to vector<1x256xi32>
    %862 = arith.cmpi slt, %860, %861 : vector<1x256xi32>
    %863 = arith.andi %858, %862 : vector<1x256xi1>
    %c208_i32 = arith.constant 208 : i32
    %864 = tpu.dynamic_rotate %24 by %c208_i32 dim 1 : vector<1x256xf32>, i32 -> vector<1x256xf32>
    %c45 = arith.constant 45 : index
    %865 = memref.load %arg6[%c45] : memref<49xf32, #tpu.memory_space<smem>>
    %866 = arith.andi %803, %863 : vector<1x256xi1>
    %cst_270 = arith.constant 0.000000e+00 : f32
    %867 = vector.broadcast %cst_270 : f32 to vector<1x256xf32>
    %868 = arith.select %866, %864, %867 : vector<1x256xi1>, vector<1x256xf32>
    %869 = vector.broadcast %865 : f32 to vector<1x256xf32>
    %870 = arith.mulf %869, %868 : vector<1x256xf32>
    %871 = arith.addf %854, %870 : vector<1x256xf32>
    %c1_i32_271 = arith.constant 1 : i32
    %872 = vector.broadcast %c1_i32_271 : i32 to vector<1x256xi32>
    %873 = arith.addi %26, %872 : vector<1x256xi32>
    %c0_i32_272 = arith.constant 0 : i32
    %874 = vector.broadcast %c0_i32_272 : i32 to vector<1x256xi32>
    %875 = arith.cmpi sge, %873, %874 : vector<1x256xi32>
    %c1_i32_273 = arith.constant 1 : i32
    %876 = vector.broadcast %c1_i32_273 : i32 to vector<1x256xi32>
    %877 = arith.addi %26, %876 : vector<1x256xi32>
    %c16_i32_274 = arith.constant 16 : i32
    %878 = vector.broadcast %c16_i32_274 : i32 to vector<1x256xi32>
    %879 = arith.cmpi slt, %877, %878 : vector<1x256xi32>
    %880 = arith.andi %875, %879 : vector<1x256xi1>
    %c207_i32 = arith.constant 207 : i32
    %881 = tpu.dynamic_rotate %24 by %c207_i32 dim 1 : vector<1x256xf32>, i32 -> vector<1x256xf32>
    %c46 = arith.constant 46 : index
    %882 = memref.load %arg6[%c46] : memref<49xf32, #tpu.memory_space<smem>>
    %883 = arith.andi %803, %880 : vector<1x256xi1>
    %cst_275 = arith.constant 0.000000e+00 : f32
    %884 = vector.broadcast %cst_275 : f32 to vector<1x256xf32>
    %885 = arith.select %883, %881, %884 : vector<1x256xi1>, vector<1x256xf32>
    %886 = vector.broadcast %882 : f32 to vector<1x256xf32>
    %887 = arith.mulf %886, %885 : vector<1x256xf32>
    %888 = arith.addf %871, %887 : vector<1x256xf32>
    %c2_i32_276 = arith.constant 2 : i32
    %889 = vector.broadcast %c2_i32_276 : i32 to vector<1x256xi32>
    %890 = arith.addi %26, %889 : vector<1x256xi32>
    %c0_i32_277 = arith.constant 0 : i32
    %891 = vector.broadcast %c0_i32_277 : i32 to vector<1x256xi32>
    %892 = arith.cmpi sge, %890, %891 : vector<1x256xi32>
    %c2_i32_278 = arith.constant 2 : i32
    %893 = vector.broadcast %c2_i32_278 : i32 to vector<1x256xi32>
    %894 = arith.addi %26, %893 : vector<1x256xi32>
    %c16_i32_279 = arith.constant 16 : i32
    %895 = vector.broadcast %c16_i32_279 : i32 to vector<1x256xi32>
    %896 = arith.cmpi slt, %894, %895 : vector<1x256xi32>
    %897 = arith.andi %892, %896 : vector<1x256xi1>
    %c206_i32 = arith.constant 206 : i32
    %898 = tpu.dynamic_rotate %24 by %c206_i32 dim 1 : vector<1x256xf32>, i32 -> vector<1x256xf32>
    %c47 = arith.constant 47 : index
    %899 = memref.load %arg6[%c47] : memref<49xf32, #tpu.memory_space<smem>>
    %900 = arith.andi %803, %897 : vector<1x256xi1>
    %cst_280 = arith.constant 0.000000e+00 : f32
    %901 = vector.broadcast %cst_280 : f32 to vector<1x256xf32>
    %902 = arith.select %900, %898, %901 : vector<1x256xi1>, vector<1x256xf32>
    %903 = vector.broadcast %899 : f32 to vector<1x256xf32>
    %904 = arith.mulf %903, %902 : vector<1x256xf32>
    %905 = arith.addf %888, %904 : vector<1x256xf32>
    %c3_i32_281 = arith.constant 3 : i32
    %906 = vector.broadcast %c3_i32_281 : i32 to vector<1x256xi32>
    %907 = arith.addi %26, %906 : vector<1x256xi32>
    %c0_i32_282 = arith.constant 0 : i32
    %908 = vector.broadcast %c0_i32_282 : i32 to vector<1x256xi32>
    %909 = arith.cmpi sge, %907, %908 : vector<1x256xi32>
    %c3_i32_283 = arith.constant 3 : i32
    %910 = vector.broadcast %c3_i32_283 : i32 to vector<1x256xi32>
    %911 = arith.addi %26, %910 : vector<1x256xi32>
    %c16_i32_284 = arith.constant 16 : i32
    %912 = vector.broadcast %c16_i32_284 : i32 to vector<1x256xi32>
    %913 = arith.cmpi slt, %911, %912 : vector<1x256xi32>
    %914 = arith.andi %909, %913 : vector<1x256xi1>
    %c205_i32 = arith.constant 205 : i32
    %915 = tpu.dynamic_rotate %24 by %c205_i32 dim 1 : vector<1x256xf32>, i32 -> vector<1x256xf32>
    %c48 = arith.constant 48 : index
    %916 = memref.load %arg6[%c48] : memref<49xf32, #tpu.memory_space<smem>>
    %917 = arith.andi %803, %914 : vector<1x256xi1>
    %cst_285 = arith.constant 0.000000e+00 : f32
    %918 = vector.broadcast %cst_285 : f32 to vector<1x256xf32>
    %919 = arith.select %917, %915, %918 : vector<1x256xi1>, vector<1x256xf32>
    %920 = vector.broadcast %916 : f32 to vector<1x256xf32>
    %921 = arith.mulf %920, %919 : vector<1x256xf32>
    %922 = arith.addf %905, %921 : vector<1x256xf32>
    %923 = arith.negf %922 : vector<1x256xf32>
    %924 = math.exp %923 : vector<1x256xf32>
    %cst_286 = arith.constant 1.000000e+00 : f32
    %925 = vector.broadcast %cst_286 : f32 to vector<1x256xf32>
    %926 = arith.addf %925, %924 : vector<1x256xf32>
    %927 = arith.divf %925, %926 : vector<1x256xf32>
    %928 = vector.shape_cast %927 : vector<1x256xf32> to vector<1x1x256xf32>
    %929 = vector.broadcast %21 : vector<1x32x1xf32> to vector<1x32x256xf32>
    %930 = vector.broadcast %928 : vector<1x1x256xf32> to vector<1x32x256xf32>
    %931 = arith.mulf %929, %930 : vector<1x32x256xf32>
    %cst_287 = arith.constant 1.000000e+00 : f32
    %932 = vector.broadcast %cst_287 : f32 to vector<1x32x256xf32>
    %933 = arith.addf %932, %931 : vector<1x32x256xf32>
    %934 = arith.mulf %0, %933 : vector<1x32x256xf32>
    %c0_288 = arith.constant 0 : index
    %c0_289 = arith.constant 0 : index
    %c0_290 = arith.constant 0 : index
    %935 = vector.load %arg7[%c0_288, %c0_289, %c0_290] : memref<1x32x256xf32, #tpu.memory_space<vmem>>, vector<1x32x256xf32>
    tpu.vector_store %arg7[%c0_288, %c0_289, %c0_290], %934 {strides = array<i32>} : memref<1x32x256xf32, #tpu.memory_space<vmem>>, vector<1x32x256xf32>,
    return
  }
  func.func @transform_0(%arg0: i32) -> (i32, i32, i32) {
    %c0_i32 = arith.constant 0 : i32
    %c0_i32_0 = arith.constant 0 : i32
    %c0_i32_1 = arith.constant 0 : i32
    return %arg0, %c0_i32, %c0_i32_0 : i32, i32, i32
  }
  func.func @transform_1(%arg0: i32) -> (i32, i32) {
    %c0_i32 = arith.constant 0 : i32
    %c0_i32_0 = arith.constant 0 : i32
    %c0_i32_1 = arith.constant 0 : i32
    return %c0_i32, %c0_i32_0 : i32, i32
  }
  func.func @transform_2(%arg0: i32) -> (i32, i32) {
    %c0_i32 = arith.constant 0 : i32
    %c0_i32_0 = arith.constant 0 : i32
    %c0_i32_1 = arith.constant 0 : i32
    return %c0_i32, %c0_i32_0 : i32, i32
  }
  func.func @transform_3(%arg0: i32) -> (i32, i32) {
    %c0_i32 = arith.constant 0 : i32
    %c0_i32_0 = arith.constant 0 : i32
    %c0_i32_1 = arith.constant 0 : i32
    return %c0_i32, %c0_i32_0 : i32, i32
  }
  func.func @transform_4(%arg0: i32) -> (i32, i32) {
    %c0_i32 = arith.constant 0 : i32
    %c0_i32_0 = arith.constant 0 : i32
    %c0_i32_1 = arith.constant 0 : i32
    return %c0_i32, %c0_i32_0 : i32, i32
  }
  func.func @transform_5(%arg0: i32) -> i32 {
    %c0_i32 = arith.constant 0 : i32
    %c0_i32_0 = arith.constant 0 : i32
    return %c0_i32 : i32
  }
  func.func @transform_6(%arg0: i32) -> (i32, i32, i32) {
    %c0_i32 = arith.constant 0 : i32
    %c0_i32_0 = arith.constant 0 : i32
    %c0_i32_1 = arith.constant 0 : i32
    return %arg0, %c0_i32, %c0_i32_0 : i32, i32, i32
  }
}

</mosaic_0001>

<bundles_post_ra>
// kernel: tpu_custom_call.1
= control target key start
LH: loop header
LB: loop body
LE: loop exit
PB: predicated region body
PF: predicated region fallthrough
CT: control target
= control target key end

     0   :  { %s3963_s0 = inlined_call_operand.hbm [shape: f32[2,32,256], index: 0, kind: input, shape index: {}]   ;;  %s3964_s1 = inlined_call_operand.vmem [shape: f32[2,32], index: 1, kind: input, shape index: {}]   ;;  %s3965_s2 = inlined_call_operand.vmem [shape: f32[32,2], index: 2, kind: input, shape index: {}]   ;;  %s3966_s3 = inlined_call_operand.vmem [shape: s32[1,256], index: 3, kind: input, shape index: {}]   ;;  %s3967_s4 = inlined_call_operand.vmem [shape: s32[1,256], index: 4, kind: input, shape index: {}]   ;;  %s3968_s5 = inlined_call_operand.vmem [shape: f32[49], index: 5, kind: input, shape index: {}]   ;;  %s3969_s6 = inlined_call_operand.hbm [shape: f32[2,32,256], index: 6, kind: output, shape index: {}]  }
   0x1   :  { %3976 = sst [smem:[#allocation11_spill]] %s3963_s0 }
   0x2   :  { %3977 = sst [smem:[#allocation12_spill]] %s3964_s1 }
   0x3   :  { %3978 = sst [smem:[#allocation13_spill]] %s3965_s2 }
   0x4   :  { %3979 = sst [smem:[#allocation14_spill]] %s3967_s4 }
   0x5   :  { %3980 = sst [smem:[#allocation15_spill]] %s3968_s5 }
   0x6   :  { %11 = vsyncpa [#allocation3], 0 }
   0x7   :  { %13 = vsyncpa [#allocation3 + $0x1], 0 }
   0x8   :  { %14 = vsyncpa [#allocation5], 0 }
   0x9   :  { %15 = vsyncpa [#allocation4], 0 }
   0xa   :  { %17 = vsyncpa [#allocation4 + $0x1], 0  ;;  %s2560_s21 = smov 0   ;;  %s2562_s22 = smov 0  }
   0xb   :  { %s2564_s23 = smov 0   ;;  %s2566_s24 = smov 0  }
   0xc LB: > { %s2581_s25 = sadd.s32 4294967295, %s2468_s24   ;;  %s2148_s26 = sadd.s32 4294967294, %s2468_s24   ;;  %s2468_s24 = sphi %s2566_s24, %s4056_s24   ;;  %s2464_s23 = sphi %s2564_s23, %s4055_s23   ;;  %s2460_s22 = sphi %s2562_s22, %s4054_s22   ;;  %s2456_s21 = sphi %s2560_s21, %s4053_s21  }
   0xd   : > { %s2585_s27 = sadd.s32 1, %s2468_s24   ;;  %s30_s28 = sadd.s32 1, %s2464_s23 }
   0xe   : > { %s27_s29 = ssub.s32 %s2468_s24, %s2585_s27  ;;  %p37_p0 = scmp.ne.s32.totalorder %s2464_s23, %s2460_s22 }
   0xf   : > { %p28_p1 = scmp.eq.s32.totalorder %s27_s29, 0  ;;  %p38_p2 = scmp.eq.s32.totalorder %s2468_s24, 0 }
  0x10   : > { %p43_p3 = scmp.ne.s32.totalorder %s2460_s22, %s2456_s21  ;;  %p3971_p4 = scmp.eq.s32.totalorder %s2581_s25, 0 }
  0x11   : > { %s2597_s30 = scalar_select %p28_p1, %s2464_s23, %s30_s28  }
  0x12   : > { %p2599_p5 = por %p38_p2, %p37_p0  ;;  %p2605_p6 = por %p3971_p4, %p43_p3 }
  0x13   : > { %p172_p7 = scmp.eq.s32.totalorder %s2581_s25, 1  ;;  %p178_p8 = scmp.eq.s32.totalorder %s2148_s26, 1 }
  0x14   : > { %s3982_s8 = scalar_select %p2605_p6, 1, 0 }
  0x15   : > { %p2149_p9 = scmp.ge.s32.totalorder %s2468_s24, 1  ;;  %p185_p10 = scmp.lt.s32.totalorder %s2468_s24, 3 }
  0x16   : > { %p2612_p11 = por %p172_p7, %p37_p0  ;;  %p2616_p12 = por %p178_p8, %p43_p3 }
  0x17   : > { %p2620_p13 = pnand %p2149_p9, %p185_p10  ;;  %s3986_s5 = sld [smem:[#allocation15_spill]] }
  0x18   : > { %s3983_s9 = scalar_select %p2612_p11, 1, 0 }
  0x19   : > { %s3984_s10 = scalar_select %p2616_p12, 1, 0 }
  0x1a   : > { %s3985_s11 = scalar_select %p2620_p13, 1, 0 }
  0x1b   : > { %p2227_p1 = pneg %p2620_p13  ;;  %p2240_p2 = scmp.lt.s32.totalorder %s2468_s24, 2 }
  0x1c   : > { %s221_s16 = sand.u32 1, %s2464_s23  }
  0x1d   : > { %s210_s14 = sshll.u32 %s3986_s5, 4  ;;  %p2633_p7 = pnand %p2227_p1, %p3971_p4  ;;  %s211_s14 = int_to_ptr.vmem [resolvable:$true] %s210_s14 }
  0x1e   : > { %p2640_p3 = pnand %p2240_p2, %p2599_p5  ;;  %s2152_s18 = sshll.u32 %s221_s16, 6 }
  0x1f   : > { %s2357_s19 = scalar_lea.vmem %s211_s14, 16  ;;  %p2359_p9 = pneg %p2633_p7 }
  0x20   : > { %p2358_p8 = scmp.ne.s32.totalorder %s211_s14, %s2357_s19  ;;  %p2365_p12 = scmp.lt.s32.totalorder %s211_s14, %s211_s14 }
  0x21   : > { %p2366_p11 = scmp.lt.s32.totalorder %s2357_s19, %s2357_s19 }
  0x22   : > { %p2360_p10 = pnand %p2359_p9, %p2358_p8 }
  0x23   : > { %p2367_p1 = por %p2366_p11, %p2365_p12 }
  0x24   : > { %p2361_p0 = pneg %p2360_p10 }
  0x26   : > { %p2368_p4 = pnand %p2367_p1, %p2361_p0 }
  0x28   : > { %2371 = shalt.err (!%p2368_p4)
}
  0x29   : > { %s2470_s20 = smov [#allocation6]   ;;  %s2217_s26 = sshll.u32 %s2468_s24, 10 }
  0x2a   : > { %2230 = dma.vmem_to_smem (!%p2633_p7), %s211_s14, 16, %s2470_s20, [#allocation5]  }
  0x2b   : > { %s225_s28 = scalar_lea.vmem [#allocation2], %s2152_s18  ;;  %s3989_s0 = sld [smem:[#allocation11_spill]] }
  0x2c   : > { %s232_s29 = sshll.u32 %s225_s28, 4  ;;  %s2656_s19 = scalar_lea.sflag [#allocation3], %s221_s16  ;;  %s2654_s29 = int_to_ptr.vmem [resolvable:$true] %s232_s29 }
  0x2d   : > { %p2374_p5 = pneg %p2640_p3 }
  0x31   : > { %s2652_s13 = scalar_lea.hbm %s3989_s0, %s2217_s26  ;;  %s2377_s18 = scalar_lea.hbm %s3989_s0, 2048 }
  0x32   : > { %s2372_s5 = scalar_lea.hbm %s2652_s13, 1024  ;;  %p2378_p0 = scmp.lt.s32.totalorder %s2652_s13, %s3989_s0 }
  0x33   : > { %p2373_p4 = scmp.ne.s32.totalorder %s2652_s13, %s2372_s5  ;;  %p2379_p2 = scmp.lt.s32.totalorder %s2377_s18, %s2372_s5 }
  0x35   : > { %p2375_p11 = pnand %p2374_p5, %p2373_p4  ;;  %p2380_p7 = por %p2379_p2, %p2378_p0 }
  0x37   : > { %p2376_p12 = pneg %p2375_p11 }
  0x39   : > { %p2381_p8 = pnand %p2380_p7, %p2376_p12 }
  0x3b   : > { %2384 = shalt.err (!%p2381_p8)
}
  0x3c   : > { %s2385_s16 = scalar_lea.vmem %s2654_s29, 1024  ;;  %s2471_s28 = smov [#allocation2]  }
  0x3d   : > { %p2386_p9 = scmp.ne.s32.totalorder %s2654_s29, %s2385_s16  ;;  %s2390_s7 = sshll.u32 %s2471_s28, 4  ;;  %s2391_s7 = int_to_ptr.vmem [resolvable:$false] %s2390_s7 }
  0x3e   : > { %s2392_s12 = scalar_lea.vmem %s2391_s7, 2048  ;;  %p2393_p4 = scmp.lt.s32.totalorder %s2654_s29, %s2391_s7 }
  0x3f   : > { %p2388_p10 = pnand %p2386_p9, %p2374_p5  ;;  %p2394_p11 = scmp.lt.s32.totalorder %s2392_s12, %s2385_s16 }
  0x41   : > { %p2389_p1 = pneg %p2388_p10  ;;  %p2395_p6 = por %p2394_p11, %p2393_p4 }
  0x43   : > { %p2396_p13 = pnand %p2395_p6, %p2389_p1 }
  0x45   : > { %2399 = shalt.err (!%p2396_p13)
}
  0x46   : > { %s2472_s5 = smov 256   ;;  %s2473_s14 = smov 16  }
  0x47   : > { %2234 = dma.hbm_to_vmem [thread:$0]  (!%p2640_p3), %s2652_s13, 1024, %s2654_s29, %s2656_s19, %s2472_s5, %s2472_s5, %s2473_s14  }
  0x48   : > { %p3990_p5 = scmp.ne.s32.totalorder %s3985_s11, 0 }
  0x49   : > { %s2680_s15 = sand.u32 (!%p3990_p5), 1, %s2460_s22   ;;  %p3991_p6 = scmp.ne.s32.totalorder (!%p3990_p5), %s3982_s8, 0 }
  0x4a   : > { %244 = sbr.rel (%p3990_p5) target bundleno = 953 (0x3b9), region = 44  ;;  %s3975_s18 = sshll.u32 (!%p3990_p5), %s2680_s15, 6 }
  0x4b   : > { %s247_s20 = scalar_lea.sflag (!%p3990_p5), [#allocation3], %s2680_s15  ;;  %s2686_s26 = scalar_lea.vmem (!%p3990_p5), [#allocation2], %s3975_s18 }
  0x4f   : > { %2443 = dma.done.wait (%p3991_p6), %s247_s20, 1024  }
  0x50   : > { %2445 = vsyncadd (%p3991_p6), %s247_s20, 4294966272  ;;  %p3992_p13 = scmp.eq.s32.totalorder %s2581_s25, 0 }
  0x52   : > { %2447 = dma.done.wait (%p3992_p13), [#allocation5], 16   ;;  %p3993_p3 = pmov %p3992_p13 }
  0x54   : > { %2449 = vsyncadd (%p3993_p3), [#allocation5], 4294967280 }
  0x55   : > { %259 = sfence }
  0x56   : > { %v2697_v0 = vld [vmem:[%s2686_s26] sm:$0xff]  ;;  %v2700_v1 = vld [vmem:[%s2686_s26 + $0x8] sm:$0xff]  ;;  %v2711_v5 = vld [vmem:[%s2686_s26 + $0x10] sm:$0xff]  ;;  %v313_v12 = vlaneseq  ;;  %vm324_vm0 = vcmask 130112   ;;  %vm331_vm1 = vcmask 195712   ;;  %vm338_vm2 = vcmask 261312  }
  0x57   : > { %v2703_v2 = vld [vmem:[%s2686_s26 + $0x20] sm:$0xff]  ;;  %v292_v3 = vmax.f32 %v2697_v0, %v2700_v1  ;;  %v2708_v4 = vld [vmem:[%s2686_s26 + $0x28] sm:$0xff]  ;;  %v2714_v6 = vld [vmem:[%s2686_s26 + $0x18] sm:$0xff]  ;;  %s3994_s1 = sld [smem:[#allocation12_spill]]  ;;  %vm342_vm3 = vcmask 254976   ;;  %vm369_vm4 = vcmask 15360  }
  0x58   : > { %v298_v7 = vmax.f32 %v2703_v2, %v2708_v4  ;;  %v2719_v8 = vld [vmem:[%s2686_s26 + $0x30] sm:$0xff]  ;;  %v2722_v9 = vld [vmem:[%s2686_s26 + $0x38] sm:$0xff]  ;;  %v295_v10 = vmax.f32 %v2711_v5, %v2714_v6  ;;  %v2728_v13 = vand.u32 127, %v313_v12  ;;  %v2730_v14 = vshrl.u32 %v313_v12, 7  ;;  %s3995_s2 = sld [smem:[#allocation13_spill]]  ;;  %s2474_s5 = smov 51  }
  0x59   : > { %293 = vmax.xlane.f32.xlu0 %v292_v3  ;;  %v301_v11 = vmax.f32 %v2719_v8, %v2722_v9  ;;  %s2475_s14 = smov 49   ;;  %s2476_s20 = smov 50  }
  0x5a   : > { %299 = vmax.xlane.f32.xlu1 %v298_v7  ;;  %v319_v15 = vadd.s32 4294967288, %v2728_v13  ;;  %v326_v16 = vadd.s32 4294967280, %v2728_v13  ;;  %v333_v17 = vadd.s32 4294967272, %v2728_v13  ;;  %v317_v19 = vsub.s32 %v2728_v13, %v2730_v14  ;;  %s2477_s8 = smov 48   ;;  %s2478_s11 = smov 47  }
  0x5b   : > { %s2479_s17 = smov 46   ;;  %s2480_s29 = smov 45   ;;  %vm446_vm5 = vcmp.lt.s32.totalorder %v2728_v13, 51  ;;  %vm481_vm10 = vcmp.lt.s32.totalorder %v2728_v13, 50 }
  0x5c   : > { %v322_v21 = vsub.s32 %v319_v15, %v2730_v14  ;;  %v329_v22 = vsub.s32 %v326_v16, %v2730_v14  ;;  %v336_v23 = vsub.s32 %v333_v17, %v2730_v14  ;;  %s2481_s13 = smov 35   ;;  %s2482_s19 = smov 34  }
  0x5d   : > { %296 = vmax.xlane.f32.xlu0 %v295_v10  ;;  %v304_v31 = vld [vmem:[%s3994_s1] sm:$0x3]  ;;  %s2483_s16 = smov 33   ;;  %s2484_s28 = smov 32  }
  0x5e   : > { %302 = vmax.xlane.f32.xlu1 %v301_v11  ;;  %v306_v38 = vld [vmem:[%s3995_s2 + $0x8] sm:$0xff]  ;;  %v305_v39 = vld [vmem:[%s3995_s2] sm:$0xff]  ;;  %v308_v41 = vld [vmem:[%s3995_s2 + $0x18] sm:$0xff]  ;;  %s2485_s7 = smov 31   ;;  %s2486_s12 = smov 30  }
  0x5f   : > { %v307_v42 = vld [vmem:[%s3995_s2 + $0x10] sm:$0xff]  ;;  %s3996_s4 = sld [smem:[#allocation14_spill]]  ;;  %p4049_p0 = scmp.ne.s32.totalorder %s3983_s9, 0 }
  0x60   : > { %s3357_s18 = sld [smem:[#allocation6 + $0x1f]] }
  0x61   : > { %s3371_s0 = sld [smem:[#allocation6 + $0x20]] }
  0x62   : > { %s3498_s1 = sld [smem:[#allocation6 + $0x26]] }
  0x63   : > { %s3541_s2 = sld [smem:[#allocation6 + $0x27]] }
  0xe2   : > { %v294_v18 = vpop.xlane.xlu0 %293 }
  0xe3   : > { %v300_v20 = vpop.xlane.xlu1 %299  ;;  %v318_v25 = vrot.slane %v294_v18, %v317_v19 }
  0xe4   : > { %v330_v28 = vrot.slane %v300_v20, %v329_v22 }
  0xe6   : > { %v297_v24 = vpop.xlane.xlu0 %296 }
  0xe7   : > { %v323_v26 = vrot.slane %v297_v24, %v322_v21  ;;  %v303_v27 = vpop.xlane.xlu1 %302 }
  0xe8   : > { %v337_v29 = vrot.slane %v303_v27, %v336_v23 }
  0xe9   : > { %v325_v30 = vsel %vm324_vm0, %v323_v26, %v318_v25  ;;  %vm516_vm0 = vcmp.lt.s32.totalorder %v2728_v13, 49 }
  0xea   : > { %v332_v32 = vsel %vm331_vm1, %v330_v28, %v325_v30 }
  0xeb   : > { %v339_v33 = vsel %vm338_vm2, %v337_v29, %v332_v32 }
  0xec   : > { %v341_v34 = vmul.f32 %v339_v33, %v304_v31 }
  0xee   : > { %v343_v35 = vsel %vm342_vm3, %v341_v34, 0.0 }
  0xef   : > { %344 = vadd.xlane.f32.xlu0 %v343_v35 }
 0x178   : > { %v345_v36 = vpop.xlane.xlu0 %344 }
 0x179   : > { %v346_v37 = vmax.f32 %v345_v36, 0.0 }
 0x17b   : > { %v351_v40 = vrot.slane %v346_v37, %v317_v19  ;;  %v2848_v37 = vld [vmem:[%s3966_s3] sm:$0x3] }
 0x17d   : > { %v366_v43 = vmul.f32 %v351_v40, %v306_v38  ;;  %v365_v44 = vmul.f32 %v351_v40, %v305_v39  ;;  %v368_v47 = vmul.f32 %v351_v40, %v308_v41  ;;  %v367_v48 = vmul.f32 %v351_v40, %v307_v42  ;;  %v2853_v40 = vld [vmem:[%s3996_s4] sm:$0x3]  ;;  %s3766_s4 = sld [smem:[#allocation6 + $0x29]] }
 0x17e   : > { %v434_v41 = vadd.s32 4294967293, %v2848_v37 }
 0x17f   : > { %v373_v45 = vsel %vm369_vm4, %v366_v43, 0.0  ;;  %v370_v46 = vsel %vm369_vm4, %v365_v44, 0.0  ;;  %v379_v49 = vsel %vm369_vm4, %v368_v47, 0.0  ;;  %v376_v50 = vsel %vm369_vm4, %v367_v48, 0.0 }
 0x180   : > { %374 = vadd.xlane.f32.xlu0 %v373_v45  ;;  %371 = vadd.xlane.f32.xlu1 %v370_v46  ;;  %v438_v43 = vadd.s32 4294967293, %v2853_v40  ;;  %v473_v47 = vadd.s32 4294967294, %v2853_v40  ;;  %vm435_vm6 = vcmp.ge.s32.totalorder %v434_v41, 0  ;;  %vm436_vm7 = vcmp.lt.s32.totalorder %v434_v41, 16 }
 0x181   : > { %vm2874_vm11 = vmand %vm435_vm6, %vm436_vm7  ;;  %vm550_vm6 = vcmp.lt.s32.totalorder %v2728_v13, 48  ;;  %vm543_vm7 = vcmp.ge.s32.totalorder %v2853_v40, 0 }
 0x182   : > { %vm439_vm8 = vcmp.ge.s32.totalorder %v438_v43, 0  ;;  %vm440_vm9 = vcmp.lt.s32.totalorder %v438_v43, 16  ;;  %vm474_vm12 = vcmp.ge.s32.totalorder %v473_v47, 0  ;;  %vm475_vm13 = vcmp.lt.s32.totalorder %v473_v47, 16 }
 0x183   : > { %vm2879_vm14 = vmand %vm439_vm8, %vm440_vm9  ;;  %vm544_vm8 = vcmp.lt.s32.totalorder %v2853_v40, 16 }
 0x184   : > { %380 = vadd.xlane.f32.xlu0 %v379_v49  ;;  %377 = vadd.xlane.f32.xlu1 %v376_v50  ;;  %vm2884_vm15 = vmand %vm474_vm12, %vm475_vm13 }
 0x185   : > { %vm450_vm1 = vmand %vm2874_vm11, %vm2879_vm14 }
 0x186   : > { %vm485_vm4 = vmand %vm2874_vm11, %vm2884_vm15 }
 0x209   : > { %v375_v51 = vpop.xlane.xlu0 %374  ;;  %v372_v52 = vpop.xlane.xlu1 %371 }
 0x20a   : > { %v2160_v53 = vmul.f32 -1.442695, %v375_v51  ;;  %v2159_v54 = vmul.f32 -1.442695, %v372_v52 }
 0x20c   : > { %2328 = vpow2.f32 %v2160_v53  ;;  %v508_v53 = vadd.s32 4294967295, %v2853_v40 }
 0x20d   : > { %2330 = vpow2.f32 %v2159_v54  ;;  %v381_v55 = vpop.xlane.xlu0 %380  ;;  %v378_v56 = vpop.xlane.xlu1 %377 }
 0x20e   : > { %v2162_v57 = vmul.f32 -1.442695, %v381_v55  ;;  %v2161_v58 = vmul.f32 -1.442695, %v378_v56  ;;  %vm509_vm2 = vcmp.ge.s32.totalorder %v508_v53, 0  ;;  %vm510_vm3 = vcmp.lt.s32.totalorder %v508_v53, 16 }
 0x210   : > { %2332 = vpow2.f32 %v2162_v57 }
 0x211   : > { %2334 = vpow2.f32 %v2161_v58 }
 0x219   : > { %v2329_v59 = vpop.eup %2328 }
 0x21a   : > { %v2331_v60 = vpop.eup %2330  ;;  %v395_v61 = vadd.f32 1.0, %v2329_v59 }
 0x21b   : > { %v394_v62 = vadd.f32 1.0, %v2331_v60 }
 0x21c   : > { %2336 = vrcp.f32 %v395_v61 }
 0x21d   : > { %v2333_v63 = vpop.eup %2332  ;;  %2338 = vrcp.f32 %v394_v62 }
 0x21e   : > { %v2335_v3 = vpop.eup %2334  ;;  %v397_v7 = vadd.f32 1.0, %v2333_v63 }
 0x21f   : > { %v396_v10 = vadd.f32 1.0, %v2335_v3 }
 0x220   : > { %2340 = vrcp.f32 %v397_v7 }
 0x221   : > { %2342 = vrcp.f32 %v396_v10 }
 0x229   : > { %v2755_v11 = vpop.eup %2336 }
 0x22a   : > { %v2757_v12 = vpop.eup %2338  ;;  %v408_v17 = vmul.f32 %v2755_v11, %v2711_v5  ;;  %v409_v18 = vmul.f32 %v2755_v11, %v2714_v6 }
 0x22b   : > { %v406_v21 = vmul.f32 %v2757_v12, %v2697_v0  ;;  %v407_v22 = vmul.f32 %v2757_v12, %v2700_v1 }
 0x22d   : > { %v2759_v15 = vpop.eup %2340 }
 0x22e   : > { %v2761_v16 = vpop.eup %2342  ;;  %v412_v19 = vmul.f32 %v2759_v15, %v2719_v8  ;;  %v413_v20 = vmul.f32 %v2759_v15, %v2722_v9 }
 0x22f   : > { %v410_v23 = vmul.f32 %v2761_v16, %v2703_v2  ;;  %v411_v5 = vmul.f32 %v2761_v16, %v2708_v4  ;;  %v2503_v4 = vmov 1966171168  }
 0x230   : > { %v415_v24 = vmax.f32 %v408_v17, %v412_v19  ;;  %v424_v6 = vmax.f32 %v409_v18, %v413_v20  ;;  %v455_v36 = vunpack.c.l.s4 %v2503_v4 }
 0x231   : > { %v414_v25 = vmax.f32 %v406_v21, %v410_v23  ;;  %v423_v26 = vmax.f32 %v407_v22, %v411_v5  ;;  %v577_v23 = vadd.s32 1, %v2853_v40 }
 0x232   : > { %v456_v38 = vunpack.c.0.s8 %v455_v36 }
 0x233   : > { %v416_v8 = vmax.f32 %v414_v25, %v415_v24  ;;  %v425_v27 = vmax.f32 %v423_v26, %v424_v6  ;;  %vm578_vm12 = vcmp.ge.s32.totalorder %v577_v23, 0  ;;  %vm579_vm13 = vcmp.lt.s32.totalorder %v577_v23, 16 }
 0x234   : > { %v2862_v48 = vsub.s32 %v456_v38, %v2730_v14  ;;  %v2013_v23 = vsub.s32 1, %v2730_v14 }
 0x235   : > { %v417_v28 = vrot.slane %v416_v8, 4  ;;  %v426_v9 = vrot.slane %v425_v27, 4 }
 0x237   : > { %v418_v29 = vmax.f32 %v416_v8, %v417_v28  ;;  %v427_v30 = vmax.f32 %v425_v27, %v426_v9 }
 0x239   : > { %v419_v0 = vrot.slane %v418_v29, 2  ;;  %v428_v31 = vrot.slane %v427_v30, 2 }
 0x23b   : > { %v420_v32 = vmax.f32 %v418_v29, %v419_v0  ;;  %v429_v1 = vmax.f32 %v427_v30, %v428_v31  ;;  %v612_v31 = vadd.s32 2, %v2853_v40 }
 0x23d   : > { %v421_v33 = vrot.slane %v420_v32, 1  ;;  %v430_v34 = vrot.slane %v429_v1, 1 }
 0x23f   : > { %v2779_v2 = vmax.f32 %v420_v32, %v421_v33  ;;  %v2781_v35 = vmax.f32 %v429_v1, %v430_v34 }
 0x241   : > { %444 = vrot.lane.b32.xlu0 %v2781_v35, %s2474_s5  ;;  %442 = vrot.lane.b32.xlu1 %v2779_v2, %s2474_s5  ;;  %s2487_s5 = smov 29  }
 0x245   : > { %514 = vrot.lane.b32.xlu0 %v2781_v35, %s2475_s14  ;;  %477 = vrot.lane.b32.xlu1 %v2779_v2, %s2476_s20 }
 0x249   : > { %548 = vrot.lane.b32.xlu0 %v2781_v35, %s2477_s8  ;;  %479 = vrot.lane.b32.xlu1 %v2781_v35, %s2476_s20  ;;  %s2489_s20 = smov 18  }
 0x24d   : > { %583 = vrot.lane.b32.xlu0 %v2781_v35, %s2478_s11  ;;  %512 = vrot.lane.b32.xlu1 %v2779_v2, %s2475_s14  ;;  %s2488_s14 = smov 19  }
 0x251   : > { %618 = vrot.lane.b32.xlu0 %v2781_v35, %s2479_s17  ;;  %546 = vrot.lane.b32.xlu1 %v2779_v2, %s2477_s8  ;;  %s2490_s8 = smov 17  }
 0x255   : > { %653 = vrot.lane.b32.xlu0 %v2781_v35, %s2480_s29  ;;  %581 = vrot.lane.b32.xlu1 %v2779_v2, %s2478_s11  ;;  %s3974_s11 = smov 16  }
 0x259   : > { %688 = vrot.lane.b32.xlu0 %v2781_v35, %s2481_s13  ;;  %616 = vrot.lane.b32.xlu1 %v2779_v2, %s2479_s17  ;;  %s2492_s17 = smov 15  }
 0x25d   : > { %719 = vrot.lane.b32.xlu0 %v2781_v35, %s2482_s19  ;;  %651 = vrot.lane.b32.xlu1 %v2779_v2, %s2480_s29  ;;  %s2493_s29 = smov 14  }
 0x261   : > { %750 = vrot.lane.b32.xlu0 %v2781_v35, %s2483_s16  ;;  %686 = vrot.lane.b32.xlu1 %v2779_v2, %s2481_s13  ;;  %s2494_s13 = smov 13  }
 0x265   : > { %781 = vrot.lane.b32.xlu0 %v2781_v35, %s2484_s28  ;;  %717 = vrot.lane.b32.xlu1 %v2779_v2, %s2482_s19  ;;  %s2495_s19 = smov 3  }
 0x269   : > { %812 = vrot.lane.b32.xlu0 %v2781_v35, %s2485_s7  ;;  %748 = vrot.lane.b32.xlu1 %v2779_v2, %s2483_s16  ;;  %s2496_s16 = smov 2  }
 0x26d   : > { %843 = vrot.lane.b32.xlu0 %v2781_v35, %s2486_s12  ;;  %779 = vrot.lane.b32.xlu1 %v2779_v2, %s2484_s28  ;;  %s2497_s28 = smov 1  }
 0x271   : > { %874 = vrot.lane.b32.xlu0 %v2781_v35, %s2487_s5  ;;  %810 = vrot.lane.b32.xlu1 %v2779_v2, %s2485_s7  ;;  %s2498_s7 = smov 127  }
 0x275   : > { %909 = vrot.lane.b32.xlu0 %v2781_v35, %s2488_s14  ;;  %841 = vrot.lane.b32.xlu1 %v2779_v2, %s2486_s12  ;;  %s2499_s12 = smov 126  }
 0x279   : > { %940 = vrot.lane.b32.xlu0 %v2781_v35, %s2489_s20  ;;  %872 = vrot.lane.b32.xlu1 %v2779_v2, %s2487_s5  ;;  %s2500_s5 = smov 125  }
 0x27d   : > { %971 = vrot.lane.b32.xlu0 %v2781_v35, %s2490_s8  ;;  %907 = vrot.lane.b32.xlu1 %v2779_v2, %s2488_s14  ;;  %s2501_s14 = smov 115  }
 0x281   : > { %1002 = vrot.lane.b32.xlu0 %v2781_v35, %s3974_s11  ;;  %938 = vrot.lane.b32.xlu1 %v2779_v2, %s2489_s20  ;;  %s2502_s20 = smov 114  }
 0x285   : > { %1033 = vrot.lane.b32.xlu0 %v2781_v35, %s2492_s17  ;;  %969 = vrot.lane.b32.xlu1 %v2779_v2, %s2490_s8  ;;  %s2504_s8 = smov 113  }
 0x289   : > { %1064 = vrot.lane.b32.xlu0 %v2781_v35, %s2493_s29  ;;  %1000 = vrot.lane.b32.xlu1 %v2779_v2, %s3974_s11  ;;  %s3337_s11 = sld [smem:[#allocation6 + $0x1e]] }
 0x28d   : > { %1095 = vrot.lane.b32.xlu0 %v2781_v35, %s2494_s13  ;;  %1031 = vrot.lane.b32.xlu1 %v2779_v2, %s2492_s17  ;;  %s2509_s17 = smov 99  }
 0x291   : > { %1129 = vrot.lane.b32.xlu0 %v2781_v35, %s2495_s19  ;;  %1062 = vrot.lane.b32.xlu1 %v2779_v2, %s2493_s29  ;;  %s2933_s29 = sld [smem:[#allocation6 + $0x4]] }
 0x295   : > { %1160 = vrot.lane.b32.xlu0 %v2781_v35, %s2496_s16  ;;  %1093 = vrot.lane.b32.xlu1 %v2779_v2, %s2494_s13  ;;  %s2510_s13 = smov 98  }
 0x299   : > { %1191 = vrot.lane.b32.xlu0 %v2781_v35, %s2497_s28  ;;  %1127 = vrot.lane.b32.xlu1 %v2779_v2, %s2495_s19  ;;  %s2960_s19 = sld [smem:[#allocation6 + $0x5]] }
 0x29d   : > { %1246 = vrot.lane.b32.xlu0 %v2781_v35, %s2498_s7  ;;  %1158 = vrot.lane.b32.xlu1 %v2779_v2, %s2496_s16  ;;  %s2505_s16 = smov 112  }
 0x2a1   : > { %1277 = vrot.lane.b32.xlu0 %v2781_v35, %s2499_s12  ;;  %1189 = vrot.lane.b32.xlu1 %v2779_v2, %s2497_s28  ;;  %s2864_s28 = sld [smem:[#allocation6]] }
 0x2a5   : > { %1308 = vrot.lane.b32.xlu0 %v2781_v35, %s2500_s5  ;;  %1244 = vrot.lane.b32.xlu1 %v2779_v2, %s2498_s7  ;;  %s2866_s7 = sld [smem:[#allocation6 + $0x1]] }
 0x2a7   : > { %v470_v7 = vstv %s2864_s28  ;;  %s2984_s28 = sld [smem:[#allocation6 + $0x6]] }
 0x2a9   : > { %1343 = vrot.lane.b32.xlu0 %v2781_v35, %s2501_s14  ;;  %1275 = vrot.lane.b32.xlu1 %v2779_v2, %s2499_s12  ;;  %s2506_s12 = smov 111  }
 0x2ab   : > { %v505_v10 = vstv %s2866_s7  ;;  %s2512_s7 = smov 96  }
 0x2ad   : > { %1374 = vrot.lane.b32.xlu0 %v2781_v35, %s2502_s20  ;;  %1306 = vrot.lane.b32.xlu1 %v2779_v2, %s2500_s5  ;;  %s2507_s5 = smov 110  }
 0x2b1   : > { %1405 = vrot.lane.b32.xlu0 %v2781_v35, %s2504_s8  ;;  %1341 = vrot.lane.b32.xlu1 %v2779_v2, %s2501_s14  ;;  %s2893_s14 = sld [smem:[#allocation6 + $0x2]] }
 0x2b3   : > { %v445_v39 = vpop.permute.xlu0 %444  ;;  %v443_v42 = vpop.permute.xlu1 %442 }
 0x2b4   : > { %v447_v44 = vsel %vm446_vm5, %v443_v42, %v445_v39  ;;  %v448_v45 = vsel %vm446_vm5, %v445_v39, %v443_v42  ;;  %vm2907_vm5 = vmand %vm509_vm2, %vm510_vm3  ;;  %vm620_vm3 = vcmp.lt.s32.totalorder %v2728_v13, 46 }
 0x2b5   : > { %v453_v46 = vcombine.low %v448_v45, %v447_v44  ;;  %1436 = vrot.lane.b32.xlu0 %v2781_v35, %s2505_s16  ;;  %1372 = vrot.lane.b32.xlu1 %v2779_v2, %s2502_s20  ;;  %s2508_s20 = smov 109   ;;  %vm520_vm9 = vmand %vm2874_vm11, %vm2907_vm5 }
 0x2b6   : > { %vm2951_vm2 = vmand %vm578_vm12, %vm579_vm13 }
 0x2b7   : > { %v515_v49 = vpop.permute.xlu0 %514  ;;  %v478_v50 = vpop.permute.xlu1 %477  ;;  %v460_v51 = vrot.slane %v453_v46, %v2862_v48  ;;  %v540_v9 = vstv %s2893_s14  ;;  %v647_v46 = vadd.s32 3, %v2853_v40  ;;  %s3026_s14 = sld [smem:[#allocation6 + $0x8]] }
 0x2b9   : > { %1467 = vrot.lane.b32.xlu0 %v2781_v35, %s2506_s12  ;;  %1403 = vrot.lane.b32.xlu1 %v2779_v2, %s2504_s8  ;;  %v467_v59 = vrot.slane %v460_v51, %v2862_v48  ;;  %s2916_s8 = sld [smem:[#allocation6 + $0x3]]  ;;  %vm649_vm12 = vcmp.lt.s32.totalorder %v647_v46, 16 }
 0x2bb   : > { %v549_v55 = vpop.permute.xlu0 %548  ;;  %v480_v56 = vpop.permute.xlu1 %479  ;;  %v469_v19 = vsel %vm450_vm1, %v467_v59, 0.0 }
 0x2bc   : > { %v482_v57 = vsel %vm481_vm10, %v478_v50, %v480_v56  ;;  %v483_v58 = vsel %vm481_vm10, %v480_v56, %v478_v50  ;;  %v471_v26 = vmul.f32 %v470_v7, %v469_v19  ;;  %vm585_vm10 = vcmp.lt.s32.totalorder %v2728_v13, 47 }
 0x2bd   : > { %v488_v61 = vcombine.low %v483_v58, %v482_v57  ;;  %1498 = vrot.lane.b32.xlu0 %v2781_v35, %s2507_s5  ;;  %1434 = vrot.lane.b32.xlu1 %v2779_v2, %s2505_s16  ;;  %v609_v57 = vstv %s2933_s29  ;;  %s2511_s16 = smov 97   ;;  %s3054_s29 = sld [smem:[#allocation6 + $0xa]] }
 0x2bf   : > { %v495_v62 = vrot.slane %v488_v61, %v2862_v48  ;;  %v584_v63 = vpop.permute.xlu0 %583  ;;  %v513_v3 = vpop.permute.xlu1 %512  ;;  %v574_v41 = vstv %s2916_s8  ;;  %s3040_s8 = sld [smem:[#allocation6 + $0x9]] }
 0x2c0   : > { %v517_v17 = vsel %vm516_vm0, %v513_v3, %v515_v49  ;;  %v518_v18 = vsel %vm516_vm0, %v515_v49, %v513_v3  ;;  %vm2940_vm0 = vmand %vm543_vm7, %vm544_vm8 }
 0x2c1   : > { %v502_v20 = vrot.slane %v495_v62, %v2862_v48  ;;  %v523_v22 = vcombine.low %v518_v18, %v517_v17  ;;  %1529 = vrot.lane.b32.xlu0 %v2781_v35, %s2508_s20  ;;  %1465 = vrot.lane.b32.xlu1 %v2779_v2, %s2506_s12  ;;  %vm554_vm1 = vmand %vm2874_vm11, %vm2940_vm0  ;;  %v682_v62 = vadd.s32 4294967294, %v2848_v37  ;;  %s3008_s12 = sld [smem:[#allocation6 + $0x7]] }
 0x2c2   : > { %vm589_vm7 = vmand %vm2874_vm11, %vm2951_vm2 }
 0x2c3   : > { %v504_v5 = vsel %vm485_vm4, %v502_v20, 0.0  ;;  %v530_v24 = vrot.slane %v523_v22, %v2862_v48  ;;  %v619_v6 = vpop.permute.xlu0 %618  ;;  %v547_v25 = vpop.permute.xlu1 %546  ;;  %vm613_vm4 = vcmp.ge.s32.totalorder %v612_v31, 0  ;;  %v644_v20 = vstv %s2960_s19  ;;  %s3068_s19 = sld [smem:[#allocation6 + $0xb]] }
 0x2c4   : > { %v506_v8 = vmul.f32 %v505_v10, %v504_v5  ;;  %v551_v27 = vsel %vm550_vm6, %v547_v25, %v549_v55  ;;  %v552_v28 = vsel %vm550_vm6, %v549_v55, %v547_v25  ;;  %vm614_vm6 = vcmp.lt.s32.totalorder %v612_v31, 16 }
 0x2c5   : > { %v537_v29 = vrot.slane %v530_v24, %v2862_v48  ;;  %v557_v30 = vcombine.low %v552_v28, %v551_v27  ;;  %1564 = vrot.lane.b32.xlu0 %v2781_v35, %s2509_s17  ;;  %1496 = vrot.lane.b32.xlu1 %v2779_v2, %s2507_s5  ;;  %vm2975_vm8 = vmand %vm613_vm4, %vm614_vm6  ;;  %vm683_vm4 = vcmp.ge.s32.totalorder %v682_v62, 0  ;;  %vm684_vm6 = vcmp.lt.s32.totalorder %v682_v62, 16  ;;  %s2513_s5 = smov 95  }
 0x2c6   : > { %v507_v0 = vadd.f32 %v506_v8, %v471_v26  ;;  %vm624_vm13 = vmand %vm2874_vm11, %vm2975_vm8 }
 0x2c7   : > { %v539_v32 = vsel %vm520_vm9, %v537_v29, 0.0  ;;  %v564_v33 = vrot.slane %v557_v30, %v2862_v48  ;;  %v654_v34 = vpop.permute.xlu0 %653  ;;  %v582_v4 = vpop.permute.xlu1 %581  ;;  %vm655_vm9 = vcmp.lt.s32.totalorder %v2728_v13, 45  ;;  %v679_v29 = vstv %s2984_s28  ;;  %s3082_s28 = sld [smem:[#allocation6 + $0xc]] }
 0x2c8   : > { %v541_v36 = vmul.f32 %v540_v9, %v539_v32  ;;  %v586_v38 = vsel %vm585_vm10, %v582_v4, %v584_v63  ;;  %v587_v39 = vsel %vm585_vm10, %v584_v63, %v582_v4  ;;  %vm648_vm10 = vcmp.ge.s32.totalorder %v647_v46, 0 }
 0x2c9   : > { %v571_v42 = vrot.slane %v564_v33, %v2862_v48  ;;  %v592_v44 = vcombine.low %v587_v39, %v586_v38  ;;  %1595 = vrot.lane.b32.xlu0 %v2781_v35, %s2510_s13  ;;  %1527 = vrot.lane.b32.xlu1 %v2779_v2, %s2508_s20  ;;  %s2514_s20 = smov 94  }
 0x2ca   : > { %v542_v45 = vadd.f32 %v541_v36, %v507_v0 }
 0x2cb   : > { %v573_v47 = vsel %vm554_vm1, %v571_v42, 0.0  ;;  %v599_v49 = vrot.slane %v592_v44, %v2862_v48  ;;  %v689_v50 = vpop.permute.xlu0 %688  ;;  %v617_v51 = vpop.permute.xlu1 %616  ;;  %vm2999_vm1 = vmand %vm648_vm10, %vm649_vm12  ;;  %vm752_vm12 = vcmp.lt.s32.totalorder %v2728_v13, 33 }
 0x2cc   : > { %v575_v53 = vmul.f32 %v574_v41, %v573_v47  ;;  %v621_v55 = vsel %vm620_vm3, %v617_v51, %v619_v6  ;;  %v622_v56 = vsel %vm620_vm3, %v619_v6, %v617_v51  ;;  %vm690_vm3 = vcmp.lt.s32.totalorder %v2728_v13, 35 }
 0x2cd   : > { %v606_v40 = vrot.slane %v599_v49, %v2862_v48  ;;  %v627_v59 = vcombine.low %v622_v56, %v621_v55  ;;  %1626 = vrot.lane.b32.xlu0 %v2781_v35, %s2511_s16  ;;  %1562 = vrot.lane.b32.xlu1 %v2779_v2, %s2509_s17  ;;  %v714_v41 = vstv %s3008_s12  ;;  %v745_v56 = vstv %s3026_s14  ;;  %s2515_s17 = smov 93   ;;  %s3096_s12 = sld [smem:[#allocation6 + $0xd]] }
 0x2ce   : > { %v576_v61 = vadd.f32 %v575_v53, %v542_v45  ;;  %s3113_s14 = sld [smem:[#allocation6 + $0xe]] }
 0x2cf   : > { %v608_v63 = vsel %vm589_vm7, %v606_v40, 0.0  ;;  %v634_v3 = vrot.slane %v627_v59, %v2862_v48  ;;  %v720_v7 = vpop.permute.xlu0 %719  ;;  %v652_v10 = vpop.permute.xlu1 %651  ;;  %vm659_vm7 = vmand %vm2874_vm11, %vm2999_vm1  ;;  %vm721_vm11 = vcmp.lt.s32.totalorder %v2728_v13, 34 }
 0x2d0   : > { %v610_v17 = vmul.f32 %v609_v57, %v608_v63  ;;  %v656_v18 = vsel %vm655_vm9, %v652_v10, %v654_v34  ;;  %v657_v19 = vsel %vm655_vm9, %v654_v34, %v652_v10  ;;  %vm3017_vm9 = vmand %vm683_vm4, %vm684_vm6  ;;  %vm814_vm6 = vcmp.lt.s32.totalorder %v2728_v13, 31 }
 0x2d1   : > { %v641_v22 = vrot.slane %v634_v3, %v2862_v48  ;;  %v662_v5 = vcombine.low %v657_v19, %v656_v18  ;;  %1657 = vrot.lane.b32.xlu0 %v2781_v35, %s2512_s7  ;;  %1593 = vrot.lane.b32.xlu1 %v2779_v2, %s2510_s13  ;;  %vm694_vm10 = vmand %vm3017_vm9, %vm2879_vm14  ;;  %v776_v18 = vstv %s3040_s8  ;;  %s2516_s13 = smov 83   ;;  %s2521_s8 = smov 78  }
 0x2d2   : > { %v611_v24 = vadd.f32 %v610_v17, %v576_v61  ;;  %vm756_vm4 = vmand %vm3017_vm9, %vm2907_vm5 }
 0x2d3   : > { %v643_v6 = vsel %vm624_vm13, %v641_v22, 0.0  ;;  %v669_v25 = vrot.slane %v662_v5, %v2862_v48  ;;  %v751_v26 = vpop.permute.xlu0 %750  ;;  %v687_v8 = vpop.permute.xlu1 %686  ;;  %vm725_vm13 = vmand %vm3017_vm9, %vm2884_vm15 }
 0x2d4   : > { %v645_v27 = vmul.f32 %v644_v20, %v643_v6  ;;  %v691_v28 = vsel %vm690_vm3, %v687_v8, %v689_v50  ;;  %v692_v9 = vsel %vm690_vm3, %v689_v50, %v687_v8  ;;  %vm783_vm3 = vcmp.lt.s32.totalorder %v2728_v13, 32 }
 0x2d5   : > { %v676_v30 = vrot.slane %v669_v25, %v2862_v48  ;;  %v697_v31 = vcombine.low %v692_v9, %v691_v28  ;;  %1688 = vrot.lane.b32.xlu0 %v2781_v35, %s2513_s5  ;;  %1624 = vrot.lane.b32.xlu1 %v2779_v2, %s2511_s16  ;;  %v807_v28 = vstv %s3054_s29  ;;  %s2517_s16 = smov 82   ;;  %s3186_s29 = sld [smem:[#allocation6 + $0x18]] }
 0x2d6   : > { %v646_v52 = vadd.f32 %v645_v27, %v611_v24 }
 0x2d7   : > { %v678_v32 = vsel %vm659_vm7, %v676_v30, 0.0  ;;  %v704_v33 = vrot.slane %v697_v31, %v2862_v48  ;;  %v782_v34 = vpop.permute.xlu0 %781  ;;  %v718_v4 = vpop.permute.xlu1 %717  ;;  %vm787_vm7 = vmand %vm3017_vm9, %vm2940_vm0 }
 0x2d8   : > { %v680_v36 = vmul.f32 %v679_v29, %v678_v32  ;;  %v722_v38 = vsel %vm721_vm11, %v718_v4, %v720_v7  ;;  %v723_v39 = vsel %vm721_vm11, %v720_v7, %v718_v4  ;;  %vm845_vm11 = vcmp.lt.s32.totalorder %v2728_v13, 30 }
 0x2d9   : > { %v711_v42 = vrot.slane %v704_v33, %v2862_v48  ;;  %v728_v44 = vcombine.low %v723_v39, %v722_v38  ;;  %1719 = vrot.lane.b32.xlu0 %v2781_v35, %s2514_s20  ;;  %1655 = vrot.lane.b32.xlu1 %v2779_v2, %s2512_s7  ;;  %v838_v38 = vstv %s3068_s19  ;;  %s2518_s7 = smov 81   ;;  %s3202_s19 = sld [smem:[#allocation6 + $0x10]] }
 0x2da   : > { %v681_v45 = vadd.f32 %v680_v36, %v646_v52 }
 0x2db   : > { %v713_v46 = vsel %vm694_vm10, %v711_v42, 0.0  ;;  %v735_v47 = vrot.slane %v728_v44, %v2862_v48  ;;  %v813_v49 = vpop.permute.xlu0 %812  ;;  %v749_v50 = vpop.permute.xlu1 %748  ;;  %vm818_vm10 = vmand %vm3017_vm9, %vm2951_vm2  ;;  %v903_v44 = vadd.s32 4294967295, %v2848_v37 }
 0x2dc   : > { %v715_v51 = vmul.f32 %v714_v41, %v713_v46  ;;  %v753_v53 = vsel %vm752_vm12, %v749_v50, %v751_v26  ;;  %v754_v55 = vsel %vm752_vm12, %v751_v26, %v749_v50  ;;  %vm876_vm12 = vcmp.lt.s32.totalorder %v2728_v13, 29 }
 0x2dd   : > { %v742_v57 = vrot.slane %v735_v47, %v2862_v48  ;;  %v759_v40 = vcombine.low %v754_v55, %v753_v53  ;;  %1750 = vrot.lane.b32.xlu0 %v2781_v35, %s2515_s17  ;;  %1686 = vrot.lane.b32.xlu1 %v2779_v2, %s2513_s5  ;;  %v869_v55 = vstv %s3082_s28  ;;  %s2519_s5 = smov 80   ;;  %s3214_s28 = sld [smem:[#allocation6 + $0x12]] }
 0x2de   : > { %v716_v59 = vadd.f32 %v715_v51, %v681_v45 }
 0x2df   : > { %v744_v61 = vsel %vm725_vm13, %v742_v57, 0.0  ;;  %v766_v62 = vrot.slane %v759_v40, %v2862_v48  ;;  %v844_v63 = vpop.permute.xlu0 %843  ;;  %v780_v3 = vpop.permute.xlu1 %779  ;;  %vm849_vm13 = vmand %vm3017_vm9, %vm2975_vm8 }
 0x2e0   : > { %v746_v7 = vmul.f32 %v745_v56, %v744_v61  ;;  %v784_v10 = vsel %vm783_vm3, %v780_v3, %v782_v34  ;;  %v785_v17 = vsel %vm783_vm3, %v782_v34, %v780_v3  ;;  %vm911_vm3 = vcmp.lt.s32.totalorder %v2728_v13, 19 }
 0x2e1   : > { %v773_v19 = vrot.slane %v766_v62, %v2862_v48  ;;  %v790_v20 = vcombine.low %v785_v17, %v784_v10  ;;  %1785 = vrot.lane.b32.xlu0 %v2781_v35, %s2516_s13  ;;  %1717 = vrot.lane.b32.xlu1 %v2779_v2, %s2514_s20  ;;  %v900_v17 = vstv %s3096_s12  ;;  %s2520_s20 = smov 79   ;;  %s3225_s12 = sld [smem:[#allocation6 + $0x14]] }
 0x2e2   : > { %v747_v22 = vadd.f32 %v746_v7, %v716_v59 }
 0x2e3   : > { %v775_v5 = vsel %vm756_vm4, %v773_v19, 0.0  ;;  %v797_v24 = vrot.slane %v790_v20, %v2862_v48  ;;  %v875_v6 = vpop.permute.xlu0 %874  ;;  %v811_v25 = vpop.permute.xlu1 %810  ;;  %vm904_vm4 = vcmp.ge.s32.totalorder %v903_v44, 0 }
 0x2e4   : > { %v777_v26 = vmul.f32 %v776_v18, %v775_v5  ;;  %v815_v8 = vsel %vm814_vm6, %v811_v25, %v813_v49  ;;  %v816_v27 = vsel %vm814_vm6, %v813_v49, %v811_v25  ;;  %vm905_vm6 = vcmp.lt.s32.totalorder %v903_v44, 16 }
 0x2e5   : > { %v804_v9 = vrot.slane %v797_v24, %v2862_v48  ;;  %v821_v29 = vcombine.low %v816_v27, %v815_v8  ;;  %1816 = vrot.lane.b32.xlu0 %v2781_v35, %s2517_s16  ;;  %1748 = vrot.lane.b32.xlu1 %v2779_v2, %s2515_s17  ;;  %s2522_s17 = smov 77  }
 0x2e6   : > { %v778_v30 = vadd.f32 %v777_v26, %v747_v22  ;;  %v935_v26 = vstv %s3113_s14  ;;  %s3237_s14 = sld [smem:[#allocation6 + $0x16]] }
 0x2e7   : > { %v806_v31 = vsel %vm787_vm7, %v804_v9, 0.0  ;;  %v828_v52 = vrot.slane %v821_v29, %v2862_v48  ;;  %v910_v32 = vpop.permute.xlu0 %909  ;;  %v842_v33 = vpop.permute.xlu1 %841  ;;  %vm880_vm7 = vmand %vm3017_vm9, %vm2999_vm1 }
 0x2e8   : > { %v808_v34 = vmul.f32 %v807_v28, %v806_v31  ;;  %v846_v4 = vsel %vm845_vm11, %v842_v33, %v844_v63  ;;  %v847_v36 = vsel %vm845_vm11, %v844_v63, %v842_v33  ;;  %vm3124_vm11 = vmand %vm904_vm4, %vm905_vm6  ;;  %vm1004_vm6 = vcmp.lt.s32.totalorder %v2728_v13, 16 }
 0x2e9   : > { %v835_v39 = vrot.slane %v828_v52, %v2862_v48  ;;  %v852_v41 = vcombine.low %v847_v36, %v846_v4  ;;  %1847 = vrot.lane.b32.xlu0 %v2781_v35, %s2518_s7  ;;  %1783 = vrot.lane.b32.xlu1 %v2779_v2, %s2516_s13  ;;  %vm915_vm9 = vmand %vm3124_vm11, %vm2879_vm14  ;;  %s3193_s13 = sld [smem:[#allocation6 + $0xf]] }
 0x2ea   : > { %v809_v42 = vadd.f32 %v808_v34, %v778_v30 }
 0x2eb   : > { %v837_v45 = vsel %vm818_vm10, %v835_v39, 0.0  ;;  %v859_v46 = vrot.slane %v852_v41, %v2862_v48  ;;  %v3100_v47 = vpop.permute.xlu0 %940  ;;  %v873_v49 = vpop.permute.xlu1 %872  ;;  %vm1124_vm10 = vcmp.ge.s32.totalorder %v2848_v37, 0 }
 0x2ec   : > { %v839_v50 = vmul.f32 %v838_v38, %v837_v45  ;;  %v877_v51 = vsel %vm876_vm12, %v873_v49, %v875_v6  ;;  %v878_v53 = vsel %vm876_vm12, %v875_v6, %v873_v49  ;;  %vm1125_vm12 = vcmp.lt.s32.totalorder %v2848_v37, 16 }
 0x2ed   : > { %v866_v56 = vrot.slane %v859_v46, %v2862_v48  ;;  %v883_v57 = vcombine.low %v878_v53, %v877_v51  ;;  %1878 = vrot.lane.b32.xlu0 %v2781_v35, %s2519_s5  ;;  %1814 = vrot.lane.b32.xlu1 %v2779_v2, %s2517_s16  ;;  %v1224_v53 = vcombine.low %v2779_v2, %v2781_v35  ;;  %vm3196_vm4 = vmand %vm1124_vm10, %vm1125_vm12  ;;  %s3205_s16 = sld [smem:[#allocation6 + $0x11]]  ;;  %vm1066_vm10 = vcmp.lt.s32.totalorder %v2728_v13, 14 }
 0x2ee   : > { %v840_v40 = vadd.f32 %v839_v50, %v809_v42  ;;  %vm1097_vm12 = vcmp.lt.s32.totalorder %v2728_v13, 13 }
 0x2ef   : > { %v868_v59 = vsel %vm849_vm13, %v866_v56, 0.0  ;;  %v890_v61 = vrot.slane %v883_v57, %v2862_v48  ;;  %v3116_v62 = vpop.permute.xlu0 %971  ;;  %v908_v63 = vpop.permute.xlu1 %907  ;;  %vm942_vm13 = vcmp.lt.s32.totalorder %v2728_v13, 18  ;;  %v1231_v57 = vrot.slane %v1224_v53, %v2862_v48 }
 0x2f0   : > { %v870_v3 = vmul.f32 %v869_v55, %v868_v59  ;;  %v912_v7 = vsel %vm911_vm3, %v908_v63, %v910_v32  ;;  %v913_v10 = vsel %vm911_vm3, %v910_v32, %v908_v63  ;;  %vm973_vm3 = vcmp.lt.s32.totalorder %v2728_v13, 17 }
 0x2f1   : > { %v897_v18 = vrot.slane %v890_v61, %v2862_v48  ;;  %v918_v20 = vcombine.low %v913_v10, %v912_v7  ;;  %1909 = vrot.lane.b32.xlu0 %v2781_v35, %s2520_s20  ;;  %1845 = vrot.lane.b32.xlu1 %v2779_v2, %s2518_s7  ;;  %v1238_v63 = vrot.slane %v1231_v57, %v2862_v48  ;;  %s3221_s7 = sld [smem:[#allocation6 + $0x13]] }
 0x2f2   : > { %v871_v22 = vadd.f32 %v870_v3, %v840_v40 }
 0x2f3   : > { %v899_v0 = vsel %vm880_vm7, %v897_v18, 0.0  ;;  %v925_v5 = vrot.slane %v918_v20, %v2862_v48  ;;  %v3132_v24 = vpop.permute.xlu0 %1002  ;;  %v939_v6 = vpop.permute.xlu1 %938  ;;  %vm1221_vm7 = vmand %vm3196_vm4, %vm2940_vm0 }
 0x2f4   : > { %v901_v25 = vmul.f32 %v900_v17, %v899_v0  ;;  %v944_v61 = vsel %vm942_vm13, %v3100_v47, %v939_v6  ;;  %v1240_v0 = vsel %vm1221_vm7, %v1238_v63, 0.0  ;;  %vm1193_vm7 = vcmp.lt.s32.totalorder %v2728_v13, 1 }
 0x2f5   : > { %v932_v8 = vrot.slane %v925_v5, %v2862_v48  ;;  %1940 = vrot.lane.b32.xlu0 %v2781_v35, %s2521_s8  ;;  %1876 = vrot.lane.b32.xlu1 %v2779_v2, %s2519_s5  ;;  %s3228_s5 = sld [smem:[#allocation6 + $0x15]] }
 0x2f6   : > { %v902_v27 = vadd.f32 %v901_v25, %v871_v22  ;;  %v1241_v22 = vstv %s3186_s29  ;;  %s3285_s29 = sld [smem:[#allocation6 + $0x1b]] }
 0x2f7   : > { %v934_v28 = vsel %vm915_vm9, %v932_v8, 0.0  ;;  %v3143_v9 = vpop.permute.xlu0 %1033  ;;  %v970_v29 = vpop.permute.xlu1 %969  ;;  %vm1035_vm9 = vcmp.lt.s32.totalorder %v2728_v13, 15 }
 0x2f8   : > { %v936_v30 = vmul.f32 %v935_v26, %v934_v28  ;;  %v974_v10 = vsel %vm973_vm3, %v970_v29, %v3116_v62  ;;  %v975_v17 = vsel %vm973_vm3, %v3116_v62, %v970_v29  ;;  %vm1162_vm3 = vcmp.lt.s32.totalorder %v2728_v13, 2 }
 0x2f9   : > { %1971 = vrot.lane.b32.xlu0 %v2781_v35, %s2522_s17  ;;  %1907 = vrot.lane.b32.xlu1 %v2779_v2, %s2520_s20  ;;  %v943_v35 = vsel %vm942_vm13, %v939_v6, %v3100_v47  ;;  %v980_v62 = vcombine.low %v975_v17, %v974_v10  ;;  %s3244_s20 = sld [smem:[#allocation6 + $0x17]]  ;;  %vm1131_vm13 = vcmp.lt.s32.totalorder %v2728_v13, 3 }
 0x2fa   : > { %v3147_v31 = vadd.f32 %v936_v30, %v902_v27  ;;  %v949_v47 = vcombine.low %v944_v61, %v943_v35  ;;  %v966_v27 = vstv %s3193_s13  ;;  %v3246_v30 = vmul.f32 %v1241_v22, %v1240_v0  ;;  %s3305_s13 = sld [smem:[#allocation6 + $0x1c]] }
 0x2fb   : > { %v3149_v52 = vpop.permute.xlu0 %1064  ;;  %v1001_v32 = vpop.permute.xlu1 %1000  ;;  %v1028_v35 = vstv %s3205_s16  ;;  %v1059_v61 = vstv %s3214_s28  ;;  %s3395_s16 = sld [smem:[#allocation6 + $0x21]] }
 0x2fc   : > { %v1005_v18 = vsel %vm1004_vm6, %v1001_v32, %v3132_v24  ;;  %v1006_v20 = vsel %vm1004_vm6, %v3132_v24, %v1001_v32  ;;  %v956_v24 = vrot.slane %v949_v47, %v2862_v48  ;;  %v997_v32 = vstv %s3202_s19  ;;  %vm946_vm6 = vmand %vm3124_vm11, %vm2884_vm15  ;;  %s3314_s19 = sld [smem:[#allocation6 + $0x1d]] }
 0x2fd   : > { %1938 = vrot.lane.b32.xlu1 %v2779_v2, %s2521_s8  ;;  %v1011_v8 = vcombine.low %v1006_v20, %v1005_v18  ;;  %s3261_s8 = sld [smem:[#allocation6 + $0x19]]  ;;  %v1090_v47 = vstv %s3221_s7  ;;  %v1121_v18 = vstv %s3225_s12 }
 0x2fe   : > { %v963_v63 = vrot.slane %v956_v24, %v2862_v48  ;;  %s3416_s28 = sld [smem:[#allocation6 + $0x22]] }
 0x2ff   : > { %v3152_v33 = vpop.permute.xlu0 %1095  ;;  %v1032_v34 = vpop.permute.xlu1 %1031  ;;  %v1018_v10 = vrot.slane %v1011_v8, %v2862_v48  ;;  %s3453_s7 = sld [smem:[#allocation6 + $0x23]] }
 0x300   : > { %v1036_v25 = vsel %vm1035_vm9, %v1032_v34, %v3143_v9  ;;  %v1037_v26 = vsel %vm1035_vm9, %v3143_v9, %v1032_v34  ;;  %v987_v9 = vrot.slane %v980_v62, %v2862_v48  ;;  %vm977_vm9 = vmand %vm3124_vm11, %vm2907_vm5  ;;  %v965_v8 = vsel %vm946_vm6, %v963_v63, 0.0  ;;  %s3476_s12 = sld [smem:[#allocation6 + $0x24]] }
 0x301   : > { %1969 = vrot.lane.b32.xlu1 %v2779_v2, %s2522_s17  ;;  %v1042_v34 = vcombine.low %v1037_v26, %v1036_v25  ;;  %s3280_s17 = sld [smem:[#allocation6 + $0x1a]]  ;;  %vm1310_vm6 = vcmp.lt.s32.totalorder %v2728_v13, 125 }
 0x302   : > { %v994_v20 = vrot.slane %v987_v9, %v2862_v48 }
 0x303   : > { %v3155_v4 = vpop.permute.xlu0 %1129  ;;  %v1063_v36 = vpop.permute.xlu1 %1062  ;;  %v1049_v62 = vrot.slane %v1042_v34, %v2862_v48 }
 0x304   : > { %v1067_v28 = vsel %vm1066_vm10, %v1063_v36, %v3149_v52  ;;  %v1068_v29 = vsel %vm1066_vm10, %v3149_v52, %v1063_v36  ;;  %vm1008_vm10 = vmand %vm3124_vm11, %vm2940_vm0 }
 0x305   : > { %v1073_v17 = vcombine.low %v1068_v29, %v1067_v28  ;;  %v1025_v28 = vrot.slane %v1018_v10, %v2862_v48 }
 0x307   : > { %v3157_v38 = vpop.permute.xlu0 %1160  ;;  %v3159_v39 = vpop.permute.xlu1 %1093  ;;  %v1080_v29 = vrot.slane %v1073_v17, %v2862_v48 }
 0x308   : > { %v1098_v52 = vsel %vm1097_vm12, %v3159_v39, %v3152_v33  ;;  %v1099_v36 = vsel %vm1097_vm12, %v3152_v33, %v3159_v39  ;;  %vm1248_vm12 = vcmp.lt.s32.totalorder %v2728_v13, 127 }
 0x309   : > { %v1104_v22 = vcombine.low %v1099_v36, %v1098_v52  ;;  %v996_v52 = vsel %vm977_vm9, %v994_v20, 0.0  ;;  %v1056_v36 = vrot.slane %v1049_v62, %v2862_v48  ;;  %v1087_v20 = vrot.slane %v1080_v29, %v2862_v48 }
 0x30a   : > { %vm1407_vm9 = vcmp.lt.s32.totalorder %v2728_v13, 113 }
 0x30b   : > { %v3161_v41 = vpop.permute.xlu0 %1191  ;;  %v3163_v42 = vpop.permute.xlu1 %1127  ;;  %v1111_v63 = vrot.slane %v1104_v22, %v2862_v48  ;;  %v998_v22 = vmul.f32 %v997_v32, %v996_v52  ;;  %v1369_v52 = vstv %s3305_s13  ;;  %s4048_s13 = sshll.u32 %s2680_s15, 6 }
 0x30c   : > { %v1132_v33 = vsel %vm1131_vm13, %v3163_v42, %v3155_v4  ;;  %v1133_v39 = vsel %vm1131_vm13, %v3155_v4, %v3163_v42  ;;  %v1155_v4 = vstv %s3228_s5  ;;  %v1186_v42 = vstv %s3237_s14  ;;  %vm1039_vm13 = vmand %vm3124_vm11, %vm2951_vm2  ;;  %s3486_s5 = sld [smem:[#allocation6 + $0x25]] }
 0x30d   : > { %v1138_v9 = vcombine.low %v1133_v39, %v1132_v33  ;;  %v1027_v39 = vsel %vm1008_vm10, %v1025_v28, 0.0  ;;  %v1118_v28 = vrot.slane %v1111_v63, %v2862_v48  ;;  %vm1101_vm10 = vmand %vm3124_vm11, %vm2999_vm1  ;;  %s3818_s14 = sld [smem:[#allocation6 + $0x2c]] }
 0x30f   : > { %v3165_v44 = vpop.permute.xlu0 %1246  ;;  %v3167_v45 = vpop.permute.xlu1 %1158 }
 0x310   : > { %v1163_v26 = vsel %vm1162_vm3, %v3167_v45, %v3157_v38  ;;  %v1164_v24 = vsel %vm1162_vm3, %v3157_v38, %v3167_v45  ;;  %v1217_v38 = vstv %s3244_s20  ;;  %vm1279_vm3 = vcmp.lt.s32.totalorder %v2728_v13, 126  ;;  %s3823_s20 = sld [smem:[#allocation6 + $0x2d]] }
 0x311   : > { %v1169_v10 = vcombine.low %v1164_v24, %v1163_v26  ;;  %v1303_v26 = vstv %s3280_s17  ;;  %v3365_v24 = vadd.s32 1, %v2848_v37  ;;  %v1029_v37 = vmul.f32 %v1028_v35, %v1027_v39  ;;  %s2210_s17 = sld [smem:[#allocation6 + $0x30]] }
 0x312   : > { %v1400_v35 = vstv %s3314_s19  ;;  %s3895_s19 = scalar_lea.vmem [#allocation7], %s4048_s13 }
 0x313   : > { %v3169_v46 = vpop.permute.xlu0 %1277  ;;  %v3171_v49 = vpop.permute.xlu1 %1189  ;;  %v1176_v29 = vrot.slane %v1169_v10, %v2862_v48  ;;  %v1873_v21 = vstv %s3818_s14 }
 0x314   : > { %v1194_v45 = vsel %vm1193_vm7, %v3171_v49, %v3161_v41  ;;  %v1195_v34 = vsel %vm1193_vm7, %v3161_v41, %v3171_v49  ;;  %v967_v41 = vmul.f32 %v966_v27, %v965_v8  ;;  %v1272_v49 = vstv %s3261_s8  ;;  %vm1070_vm7 = vmand %vm3124_vm11, %vm2975_vm8  ;;  %s3853_s8 = sld [smem:[#allocation6 + $0x2f]] }
 0x315   : > { %v1145_v27 = vrot.slane %v1138_v9, %v2862_v48  ;;  %v1200_v62 = vcombine.low %v1195_v34, %v1194_v45  ;;  %v1058_v8 = vsel %vm1039_vm13, %v1056_v36, 0.0  ;;  %v1334_v9 = vstv %s3285_s29  ;;  %vm1135_vm13 = vmand %vm3196_vm4, %vm2879_vm14  ;;  %s2218_s29 = sshll.u32 %s2581_s25, 10 }
 0x316   : > { %v968_v34 = vadd.f32 %v967_v41, %v3147_v31  ;;  %v1089_v36 = vsel %vm1070_vm7, %v1087_v20, 0.0  ;;  %v1060_v41 = vmul.f32 %v1059_v61, %v1058_v8  ;;  %v1120_v20 = vsel %vm1101_vm10, %v1118_v28, 0.0  ;;  %vm1197_vm10 = vmand %vm3196_vm4, %vm2907_vm5 }
 0x317   : > { %v3173_v50 = vpop.permute.xlu0 %1308  ;;  %v3175_v51 = vpop.permute.xlu1 %1244  ;;  %v1152_v63 = vrot.slane %v1145_v27, %v2862_v48  ;;  %v1207_v31 = vrot.slane %v1200_v62, %v2862_v48  ;;  %v1183_v27 = vrot.slane %v1176_v29, %v2862_v48  ;;  %v1431_v61 = vstv %s3337_s11  ;;  %s3790_s11 = sld [smem:[#allocation6 + $0x2b]] }
 0x318   : > { %v999_v10 = vadd.f32 %v998_v22, %v968_v34  ;;  %v1249_v19 = vsel %vm1248_vm12, %v3175_v51, %v3165_v44  ;;  %v1250_v39 = vsel %vm1248_vm12, %v3165_v44, %v3175_v51  ;;  %vm1438_vm11 = vcmp.lt.s32.totalorder %v2728_v13, 112  ;;  %vm1166_vm12 = vmand %vm3196_vm4, %vm2884_vm15 }
 0x319   : > { %v1091_v34 = vmul.f32 %v1090_v47, %v1089_v36  ;;  %v1154_v28 = vsel %vm1135_vm13, %v1152_v63, 0.0  ;;  %v1214_v29 = vrot.slane %v1207_v31, %v2862_v48  ;;  %v1255_v47 = vcombine.low %v1249_v19, %v1250_v39 }
 0x31a   : > { %v1030_v8 = vadd.f32 %v1029_v37, %v999_v10  ;;  %v1462_v37 = vstv %s3357_s18  ;;  %v1122_v10 = vmul.f32 %v1121_v18, %v1120_v20  ;;  %vm1339_vm13 = vcmp.lt.s32.totalorder %v3365_v24, 16  ;;  %s3786_s18 = sld [smem:[#allocation6 + $0x2a]] }
 0x31b   : > { %v3179_v55 = vpop.permute.xlu0 %1343  ;;  %v3181_v56 = vpop.permute.xlu1 %1275  ;;  %v1185_v18 = vsel %vm1166_vm12, %v1183_v27, 0.0  ;;  %v1493_v31 = vstv %s3371_s0  ;;  %vm1500_vm7 = vcmp.lt.s32.totalorder %v2728_v13, 110  ;;  %v1156_v19 = vmul.f32 %v1155_v4, %v1154_v28  ;;  %s3760_s0 = sld [smem:[#allocation6 + $0x28]] }
 0x31c   : > { %v1280_v44 = vsel %vm1279_vm3, %v3181_v56, %v3169_v46  ;;  %v1281_v51 = vsel %vm1279_vm3, %v3169_v46, %v3181_v56  ;;  %v1061_v36 = vadd.f32 %v1060_v41, %v1030_v8  ;;  %vm1338_vm3 = vcmp.ge.s32.totalorder %v3365_v24, 0 }
 0x31d   : > { %v1286_v63 = vcombine.low %v1280_v44, %v1281_v51  ;;  %v1216_v27 = vsel %vm1197_vm10, %v1214_v29, 0.0  ;;  %v1262_v4 = vrot.slane %v1255_v47, %v2862_v48  ;;  %v1555_v47 = vstv %s3416_s28 }
 0x31e   : > { %v1997_v58 = vstv %s2210_s17 }
 0x31f   : > { %v3189_v40 = vpop.permute.xlu0 %1374  ;;  %v3191_v59 = vpop.permute.xlu1 %1306  ;;  %v1293_v28 = vrot.slane %v1286_v63, %v2862_v48  ;;  %v1269_v63 = vrot.slane %v1262_v4, %v2862_v48 }
 0x320   : > { %v1311_v46 = vsel %vm1310_vm6, %v3191_v59, %v3173_v50  ;;  %v1312_v56 = vsel %vm1310_vm6, %v3173_v50, %v3191_v59  ;;  %v1092_v59 = vadd.f32 %v1091_v34, %v1061_v36  ;;  %vm4019_vm6 = vcmp.lt.s32.totalorder %v2728_v13, 115 }
 0x321   : > { %vm4020_vm12 = vmmov %vm4019_vm6  ;;  %v1317_v8 = vcombine.low %v1311_v46, %v1312_v56  ;;  %v1524_v34 = vstv %s3395_s16  ;;  %v1218_v46 = vmul.f32 %v1217_v38, %v1216_v27  ;;  %s2063_s16 = sshll.u32 %s3895_s19, 4  ;;  %s3911_s16 = int_to_ptr.vmem [resolvable:$true] %s2063_s16 }
 0x322   : > { %v1123_v44 = vadd.f32 %v1122_v10, %v1092_v59 }
 0x323   : > { %v3208_v3 = vpop.permute.xlu0 %1405  ;;  %v3210_v7 = vpop.permute.xlu1 %1341  ;;  %v1324_v59 = vrot.slane %v1317_v8, %v2862_v48 }
 0x324   : > { %v1346_v39 = vsel %vm4019_vm6, %v3210_v7, %v3179_v55  ;;  %v1347_v20 = vsel %vm4020_vm12, %v3179_v55, %v3210_v7  ;;  %v1187_v55 = vmul.f32 %v1186_v42, %v1185_v18  ;;  %vm4021_vm12 = vcmp.lt.s32.totalorder %v2728_v13, 114  ;;  %v3505_v42 = vld [vmem:[%s3966_s3] sm:$0x3] }
 0x325   : > { %vm4022_vm10 = vmmov %vm4021_vm12  ;;  %v1352_v29 = vcombine.low %v1346_v39, %v1347_v20  ;;  %v3508_v36 = vadd.s32 2, %v3505_v42  ;;  %v1300_v20 = vrot.slane %v1293_v28, %v2862_v48  ;;  %v1331_v28 = vrot.slane %v1324_v59, %v2862_v48 }
 0x327   : > { %v3231_v5 = vpop.permute.xlu0 %1436  ;;  %v3233_v6 = vpop.permute.xlu1 %1372  ;;  %v1359_v27 = vrot.slane %v1352_v29, %v2862_v48 }
 0x328   : > { %v1377_v7 = vsel %vm4021_vm12, %v3233_v6, %v3189_v40  ;;  %v1378_v51 = vsel %vm4022_vm10, %v3189_v40, %v3233_v6  ;;  %v1157_v6 = vadd.f32 %v1156_v19, %v1123_v44  ;;  %vm1252_vm12 = vmand %vm3196_vm4, %vm2951_vm2  ;;  %vm4023_vm10 = vcmp.lt.s32.totalorder %v2728_v13, 111 }
 0x329   : > { %v1383_v39 = vcombine.low %v1377_v7, %v1378_v51  ;;  %vm4024_vm6 = vmmov %vm4023_vm10  ;;  %v1271_v51 = vsel %vm1252_vm12, %v1269_v63, 0.0  ;;  %v1366_v63 = vrot.slane %v1359_v27, %v2862_v48 }
 0x32a   : > { %v1188_v19 = vadd.f32 %v1187_v55, %v1157_v6  ;;  %vm1314_vm12 = vmand %vm3196_vm4, %vm2999_vm1  ;;  %v1273_v7 = vmul.f32 %v1272_v49, %v1271_v51 }
 0x32b   : > { %v3251_v53 = vpop.permute.xlu0 %1467  ;;  %v3253_v57 = vpop.permute.xlu1 %1403  ;;  %v1390_v6 = vrot.slane %v1383_v39, %v2862_v48 }
 0x32c   : > { %v1408_v56 = vsel %vm1407_vm9, %v3253_v57, %v3208_v3  ;;  %v1409_v18 = vsel %vm1407_vm9, %v3208_v3, %v3253_v57  ;;  %v1590_v57 = vstv %s3453_s7  ;;  %v1219_v55 = vadd.f32 %v1218_v46, %v1188_v19  ;;  %vm3573_vm9 = vmand %vm1338_vm3, %vm1339_vm13  ;;  %s3905_s7 = scalar_lea.hbm %s3969_s6, %s2218_s29 }
 0x32d   : > { %v1414_v4 = vcombine.low %v1408_v56, %v1409_v18  ;;  %v1652_v46 = vstv %s3486_s5  ;;  %v1683_v56 = vstv %s3498_s1  ;;  %vm4027_vm13 = vcmp.lt.s32.totalorder %v2728_v13, 109  ;;  %s3845_s1 = sld [smem:[#allocation6 + $0x2e]]  ;;  %s2400_s5 = scalar_lea.vmem %s3911_s16, 1024 }
 0x32e   : > { %vm1560_vm3 = vcmp.lt.s32.totalorder %v3508_v36, 16  ;;  %v1397_v49 = vrot.slane %v1390_v6, %v2862_v48  ;;  %p2401_p12 = scmp.ne.s32.totalorder %s3911_s16, %s2400_s5 }
 0x32f   : > { %v3287_v0 = vpop.permute.xlu0 %1498  ;;  %v3289_v25 = vpop.permute.xlu1 %1434  ;;  %v1421_v59 = vrot.slane %v1414_v4, %v2862_v48  ;;  %v1714_v4 = vstv %s3541_s2 }
 0x330   : > { %v1439_v38 = vsel %vm1438_vm11, %v3289_v25, %v3231_v5  ;;  %v1440_v3 = vsel %vm1438_vm11, %v3231_v5, %v3289_v25  ;;  %vm1283_vm11 = vmand %vm3196_vm4, %vm2975_vm8  ;;  %vm4029_vm4 = vcmp.lt.s32.totalorder %v2728_v13, 99  ;;  %p2402_p2 = pnand %p2401_p12, %p4049_p0 }
 0x331   : > { %v1302_v18 = vsel %vm1283_vm11, %v1300_v20, 0.0  ;;  %vm1559_vm11 = vcmp.ge.s32.totalorder %v3508_v36, 0 }
 0x332   : > { %p2403_p7 = pneg %p2402_p2 }
 0x333   : > { %v3339_v17 = vpop.permute.xlu0 %1529  ;;  %v3341_v33 = vpop.permute.xlu1 %1465 }
 0x334   : > { %v1470_v5 = vsel %vm4023_vm10, %v3341_v33, %v3251_v53  ;;  %v1471_v25 = vsel %vm4024_vm6, %v3251_v53, %v3341_v33  ;;  %v1445_v53 = vcombine.low %v1439_v38, %v1440_v3  ;;  %vm1659_vm6 = vcmp.lt.s32.totalorder %v2728_v13, 96  ;;  %vm4028_vm10 = vmmov %vm4027_vm13 }
 0x335   : > { %v1476_v39 = vcombine.low %v1470_v5, %v1471_v25  ;;  %v1243_v3 = vadd.f32 %v3246_v30, %v1219_v55  ;;  %v1333_v30 = vsel %vm1314_vm12, %v1331_v28, 0.0  ;;  %vm4030_vm12 = vmmov %vm4029_vm4  ;;  %v1428_v5 = vrot.slane %v1421_v59, %v2862_v48 }
 0x336   : > { %v1452_v20 = vrot.slane %v1445_v53, %v2862_v48  ;;  %v1335_v53 = vmul.f32 %v1334_v9, %v1333_v30 }
 0x337   : > { %v3373_v32 = vpop.permute.xlu0 %1564  ;;  %v3375_v45 = vpop.permute.xlu1 %1496  ;;  %v1274_v6 = vadd.f32 %v1273_v7, %v1243_v3 }
 0x338   : > { %v1501_v33 = vsel %vm1500_vm7, %v3375_v45, %v3287_v0  ;;  %v1502_v24 = vsel %vm1500_vm7, %v3287_v0, %v3375_v45  ;;  %vm1349_vm7 = vmand %vm3573_vm9, %vm2879_vm14  ;;  %v1459_v7 = vrot.slane %v1452_v20, %v2862_v48 }
 0x339   : > { %v1507_v27 = vcombine.low %v1501_v33, %v1502_v24  ;;  %v1368_v55 = vsel %vm1349_vm7, %v1366_v63, 0.0  ;;  %vm4031_vm7 = vcmp.lt.s32.totalorder %v2728_v13, 98 }
 0x33a   : > { %v1370_v63 = vmul.f32 %v1369_v52, %v1368_v55 }
 0x33b   : > { %v3414_v62 = vpop.permute.xlu0 %1595  ;;  %v3418_v22 = vpop.permute.xlu1 %1527  ;;  %v1514_v33 = vrot.slane %v1507_v27, %v2862_v48 }
 0x33c   : > { %v1532_v0 = vsel %vm4027_vm13, %v3418_v22, %v3339_v17  ;;  %v1533_v45 = vsel %vm4028_vm10, %v3339_v17, %v3418_v22  ;;  %v1304_v17 = vmul.f32 %v1303_v26, %v1302_v18  ;;  %vm1380_vm10 = vmand %vm3573_vm9, %vm2884_vm15  ;;  %v1483_v26 = vrot.slane %v1476_v39, %v2862_v48 }
 0x33d   : > { %v1538_v25 = vcombine.low %v1532_v0, %v1533_v45  ;;  %v1399_v9 = vsel %vm1380_vm10, %v1397_v49, 0.0  ;;  %vm1787_vm13 = vcmp.lt.s32.totalorder %v2728_v13, 83  ;;  %vm4033_vm10 = vcmp.lt.s32.totalorder %v2728_v13, 97 }
 0x33e   : > { %v1305_v18 = vadd.f32 %v1304_v17, %v1274_v6  ;;  %v1490_v39 = vrot.slane %v1483_v26, %v2862_v48  ;;  %v1401_v49 = vmul.f32 %v1400_v35, %v1399_v9  ;;  %v1521_v27 = vrot.slane %v1514_v33, %v2862_v48 }
 0x33f   : > { %v3462_v41 = vpop.permute.xlu0 %1626  ;;  %v3464_v50 = vpop.permute.xlu1 %1562  ;;  %v1545_v52 = vrot.slane %v1538_v25, %v2862_v48 }
 0x340   : > { %v1567_v2 = vsel %vm4029_vm4, %v3464_v50, %v3373_v32  ;;  %v1568_v22 = vsel %vm4030_vm12, %v3373_v32, %v3464_v50  ;;  %vm1411_vm4 = vmand %vm3573_vm9, %vm2907_vm5  ;;  %v1336_v30 = vadd.f32 %v1335_v53, %v1305_v18 }
 0x341   : > { %vm4032_vm12 = vmmov %vm4031_vm7  ;;  %v1573_v24 = vcombine.low %v1567_v2, %v1568_v22  ;;  %v1430_v59 = vsel %vm1411_vm4, %v1428_v5, 0.0  ;;  %v1552_v5 = vrot.slane %v1545_v52, %v2862_v48 }
 0x342   : > { %v1371_v2 = vadd.f32 %v1370_v63, %v1336_v30  ;;  %v1432_v22 = vmul.f32 %v1431_v61, %v1430_v59  ;;  %vm3711_vm4 = vmand %vm1559_vm11, %vm1560_vm3  ;;  %vm4041_vm11 = vcmp.lt.s32.totalorder %v2728_v13, 93 }
 0x343   : > { %v3511_v10 = vpop.permute.xlu0 %1657  ;;  %v3513_v40 = vpop.permute.xlu1 %1593  ;;  %v1580_v17 = vrot.slane %v1573_v24, %v2862_v48 }
 0x344   : > { %v1598_v32 = vsel %vm4031_vm7, %v3513_v40, %v3414_v62  ;;  %v1599_v50 = vsel %vm4032_vm12, %v3414_v62, %v3513_v40  ;;  %vm1442_vm7 = vmand %vm3573_vm9, %vm2940_vm0 }
 0x345   : > { %vm4034_vm12 = vmmov %vm4033_vm10  ;;  %v1604_v3 = vcombine.low %v1598_v32, %v1599_v50  ;;  %v1461_v20 = vsel %vm1442_vm7, %v1459_v7, 0.0  ;;  %v1402_v32 = vadd.f32 %v1401_v49, %v1371_v2  ;;  %v1587_v9 = vrot.slane %v1580_v17, %v2862_v48 }
 0x347   : > { %v3545_v8 = vpop.permute.xlu0 %1688  ;;  %v3548_v44 = vpop.permute.xlu1 %1624  ;;  %v1611_v26 = vrot.slane %v1604_v3, %v2862_v48  ;;  %v1433_v33 = vadd.f32 %v1432_v22, %v1402_v32 }
 0x348   : > { %v1629_v62 = vsel %vm4033_vm10, %v3548_v44, %v3462_v41  ;;  %v1630_v40 = vsel %vm4034_vm12, %v3462_v41, %v3548_v44  ;;  %vm1473_vm10 = vmand %vm3573_vm9, %vm2951_vm2 }
 0x349   : > { %v1635_v35 = vcombine.low %v1629_v62, %v1630_v40  ;;  %vm1504_vm12 = vmand %vm3573_vm9, %vm2975_vm8  ;;  %v1492_v55 = vsel %vm1473_vm10, %v1490_v39, 0.0  ;;  %v1618_v63 = vrot.slane %v1611_v26, %v2862_v48 }
 0x34a   : > { %vm1535_vm10 = vmand %vm3573_vm9, %vm2999_vm1  ;;  %v1523_v50 = vsel %vm1504_vm12, %v1521_v27, 0.0  ;;  %v1494_v24 = vmul.f32 %v1493_v31, %v1492_v55 }
 0x34b   : > { %v3595_v19 = vpop.permute.xlu0 %1719  ;;  %v1656_v38 = vpop.permute.xlu1 %1655  ;;  %v1642_v7 = vrot.slane %v1635_v35, %v2862_v48  ;;  %vm1570_vm9 = vmand %vm3711_vm4, %vm2879_vm14  ;;  %v1554_v18 = vsel %vm1535_vm10, %v1552_v5, 0.0  ;;  %v1525_v52 = vmul.f32 %v1524_v34, %v1523_v50 }
 0x34c   : > { %v1660_v41 = vsel %vm1659_vm6, %v1656_v38, %v3511_v10  ;;  %v1661_v44 = vsel %vm1659_vm6, %v3511_v10, %v1656_v38  ;;  %vm4035_vm6 = vcmp.lt.s32.totalorder %v2728_v13, 95  ;;  %vm1601_vm12 = vmand %vm3711_vm4, %vm2884_vm15  ;;  %v1556_v34 = vmul.f32 %v1555_v47, %v1554_v18 }
 0x34d   : > { %vm4036_vm7 = vmmov %vm4035_vm6  ;;  %v1666_v25 = vcombine.low %v1660_v41, %v1661_v44  ;;  %v1649_v30 = vrot.slane %v1642_v7, %v2862_v48 }
 0x34e   : > { %vm1632_vm10 = vmand %vm3711_vm4, %vm2907_vm5 }
 0x34f   : > { %v1751_v51 = vpop.permute.xlu0 %1750  ;;  %v1687_v28 = vpop.permute.xlu1 %1686  ;;  %v1673_v62 = vrot.slane %v1666_v25, %v2862_v48 }
 0x350   : > { %v1691_v10 = vsel %vm4035_vm6, %v1687_v28, %v3545_v8  ;;  %v1692_v38 = vsel %vm4036_vm7, %v3545_v8, %v1687_v28  ;;  %v1463_v8 = vmul.f32 %v1462_v37, %v1461_v20  ;;  %vm4039_vm6 = vcmp.lt.s32.totalorder %v2728_v13, 94  ;;  %vm4042_vm7 = vmmov %vm4041_vm11 }
 0x351   : > { %vm4040_vm3 = vmmov %vm4039_vm6  ;;  %v1697_v37 = vcombine.low %v1691_v10, %v1692_v38  ;;  %v1779_v20 = vadd.s32 3, %v3505_v42  ;;  %v1680_v27 = vrot.slane %v1673_v62, %v2862_v48  ;;  %v1651_v38 = vsel %vm1632_vm10, %v1649_v30, 0.0 }
 0x352   : > { %v1464_v39 = vadd.f32 %v1463_v8, %v1433_v33  ;;  %vm1880_vm10 = vcmp.lt.s32.totalorder %v2728_v13, 80  ;;  %v1745_v62 = vstv %s3760_s0 }
 0x353   : > { %v1786_v0 = vpop.permute.xlu0 %1785  ;;  %v1718_v45 = vpop.permute.xlu1 %1717  ;;  %v1704_v49 = vrot.slane %v1697_v37, %v2862_v48 }
 0x354   : > { %v1722_v36 = vsel %vm4039_vm6, %v1718_v45, %v3595_v19  ;;  %v1723_v28 = vsel %vm4040_vm3, %v3595_v19, %v1718_v45  ;;  %v1589_v45 = vsel %vm1570_vm9, %v1587_v9, 0.0  ;;  %v1495_v44 = vadd.f32 %v1494_v24, %v1464_v39  ;;  %vm1663_vm6 = vmand %vm3711_vm4, %vm2940_vm0 }
 0x355   : > { %v1728_v40 = vcombine.low %v1722_v36, %v1723_v28  ;;  %v1591_v22 = vmul.f32 %v1590_v57, %v1589_v45  ;;  %vm4043_vm3 = vcmp.lt.s32.totalorder %v2728_v13, 82  ;;  %v1711_v55 = vrot.slane %v1704_v49, %v2862_v48 }
 0x356   : > { %v1526_v2 = vadd.f32 %v1525_v52, %v1495_v44  ;;  %vm4044_vm9 = vmmov %vm4043_vm3  ;;  %v1653_v9 = vmul.f32 %v1652_v46, %v1651_v38 }
 0x357   : > { %v1817_v6 = vpop.permute.xlu0 %1816  ;;  %v1749_v53 = vpop.permute.xlu1 %1748  ;;  %v1735_v17 = vrot.slane %v1728_v40, %v2862_v48 }
 0x358   : > { %v1753_v29 = vsel %vm4041_vm11, %v1749_v53, %v1751_v51  ;;  %v1754_v19 = vsel %vm4042_vm7, %v1751_v51, %v1749_v53  ;;  %v1557_v57 = vadd.f32 %v1556_v34, %v1526_v2  ;;  %v4045_v53 = vstv %s3476_s12  ;;  %vm1694_vm11 = vmand %vm3711_vm4, %vm2951_vm2  ;;  %s2050_s12 = scalar_lea.sflag [#allocation4], %s2680_s15 }
 0x359   : > { %v1759_v41 = vcombine.low %v1753_v29, %v1754_v19  ;;  %vm1780_vm7 = vcmp.ge.s32.totalorder %v1779_v20, 0  ;;  %v1742_v8 = vrot.slane %v1735_v17, %v2862_v48  ;;  %v1713_v33 = vsel %vm1694_vm11, %v1711_v55, 0.0 }
 0x35a   : > { %v1592_v50 = vadd.f32 %v1591_v22, %v1557_v57 }
 0x35b   : > { %v1848_v59 = vpop.permute.xlu0 %1847  ;;  %v1784_v31 = vpop.permute.xlu1 %1783  ;;  %v1766_v5 = vrot.slane %v1759_v41, %v2862_v48 }
 0x35c   : > { %v1788_v51 = vsel %vm1787_vm13, %v1784_v31, %v1786_v0  ;;  %v1789_v3 = vsel %vm1787_vm13, %v1786_v0, %v1784_v31  ;;  %vm1849_vm13 = vcmp.lt.s32.totalorder %v2728_v13, 81  ;;  %v1620_v0 = vsel %vm1601_vm12, %v1618_v63, 0.0 }
 0x35d   : > { %v1794_v47 = vcombine.low %v1788_v51, %v1789_v3  ;;  %v1622_v32 = vmul.f32 %v4045_v53, %v1620_v0  ;;  %vm1781_vm12 = vcmp.lt.s32.totalorder %v1779_v20, 16  ;;  %v1773_v24 = vrot.slane %v1766_v5, %v2862_v48 }
 0x35e   : > { %v1715_v3 = vmul.f32 %v1714_v4, %v1713_v33  ;;  %v1811_v4 = vstv %s3786_s18  ;;  %v1842_v20 = vstv %s3790_s11  ;;  %v1935_v33 = vstv %s3845_s1 }
 0x35f   : > { %v1815_v35 = vpop.permute.xlu1 %1814  ;;  %v1879_v26 = vpop.permute.xlu0 %1878  ;;  %v1801_v36 = vrot.slane %v1794_v47, %v2862_v48  ;;  %v1623_v18 = vadd.f32 %v1622_v32, %v1592_v50 }
 0x360   : > { %v1819_v42 = vsel %vm4043_vm3, %v1815_v35, %v1817_v6  ;;  %v1820_v10 = vsel %vm4044_vm9, %v1817_v6, %v1815_v35  ;;  %v1682_v6 = vsel %vm1663_vm6, %v1680_v27, 0.0  ;;  %vm1725_vm6 = vmand %vm3711_vm4, %vm2975_vm8  ;;  %vm1911_vm9 = vcmp.lt.s32.totalorder %v2728_v13, 79 }
 0x361   : > { %v1825_v25 = vcombine.low %v1819_v42, %v1820_v10  ;;  %vm3806_vm3 = vmand %vm1780_vm7, %vm1781_vm12  ;;  %v1684_v63 = vmul.f32 %v1683_v56, %v1682_v6  ;;  %v1744_v40 = vsel %vm1725_vm6, %v1742_v8, 0.0  ;;  %v1808_v31 = vrot.slane %v1801_v36, %v2862_v48 }
 0x362   : > { %v1654_v51 = vadd.f32 %v1653_v9, %v1623_v18  ;;  %v1746_v34 = vmul.f32 %v1745_v62, %v1744_v40  ;;  %vm1853_vm11 = vmand %vm3806_vm3, %vm2907_vm5  ;;  %v1966_v40 = vstv %s3853_s8 }
 0x363   : > { %v1846_v28 = vpop.permute.xlu1 %1845  ;;  %v1832_v46 = vrot.slane %v1825_v25, %v2862_v48  ;;  %v1910_v39 = vpop.permute.xlu0 %1909  ;;  %vm1884_vm7 = vmand %vm3806_vm3, %vm2940_vm0  ;;  %v1904_v25 = vstv %s3823_s20  ;;  %vm1973_vm0 = vcmp.lt.s32.totalorder %v2728_v13, 77 }
 0x364   : > { %v1850_v7 = vsel %vm1849_vm13, %v1846_v28, %v1848_v59  ;;  %v1851_v37 = vsel %vm1849_vm13, %v1848_v59, %v1846_v28  ;;  %vm1756_vm13 = vmand %vm3711_vm4, %vm2999_vm1  ;;  %v1776_v59 = vstv %s3766_s4  ;;  %v1685_v44 = vadd.f32 %v1684_v63, %v1654_v51 }
 0x365   : > { %v1856_v19 = vcombine.low %v1850_v7, %v1851_v37  ;;  %vm1791_vm4 = vmand %vm3806_vm3, %vm2879_vm14  ;;  %v1775_v30 = vsel %vm1756_vm13, %v1773_v24, 0.0  ;;  %v1839_v49 = vrot.slane %v1832_v46, %v2862_v48 }
 0x366   : > { %vm1822_vm14 = vmand %vm3806_vm3, %vm2884_vm15  ;;  %v1810_v54 = vsel %vm1791_vm4, %v1808_v31, 0.0  ;;  %v1716_v47 = vadd.f32 %v1715_v3, %v1685_v44  ;;  %v1777_v35 = vmul.f32 %v1776_v59, %v1775_v30  ;;  %vm1942_vm15 = vcmp.lt.s32.totalorder %v2728_v13, 78 }
 0x367   : > { %v1863_v52 = vrot.slane %v1856_v19, %v2862_v48  ;;  %v1877_v56 = vpop.permute.xlu1 %1876  ;;  %v1841_v22 = vsel %vm1822_vm14, %v1839_v49, 0.0  ;;  %v1941_v42 = vpop.permute.xlu0 %1940  ;;  %v1812_v5 = vmul.f32 %v1811_v4, %v1810_v54  ;;  %vm1915_vm5 = vmand %vm3806_vm3, %vm2951_vm2 }
 0x368   : > { %v1881_v61 = vsel %vm1880_vm10, %v1877_v56, %v1879_v26  ;;  %v1882_v45 = vsel %vm1880_vm10, %v1879_v26, %v1877_v56  ;;  %v1747_v55 = vadd.f32 %v1746_v34, %v1716_v47  ;;  %v1843_v6 = vmul.f32 %v1842_v20, %v1841_v22  ;;  %vm1946_vm2 = vmand %vm3806_vm3, %vm2975_vm8 }
 0x369   : > { %v1887_v41 = vcombine.low %v1881_v61, %v1882_v45  ;;  %v1870_v0 = vrot.slane %v1863_v52, %v2862_v48  ;;  %vm1977_vm12 = vmand %vm3806_vm3, %vm2999_vm1  ;;  %v2009_v20 = vsub.s32 0, %v2730_v14 }
 0x36a   : > { %v1778_v32 = vadd.f32 %v1777_v35, %v1747_v55 }
 0x36b   : > { %v1894_v27 = vrot.slane %v1887_v41, %v2862_v48  ;;  %v1908_v17 = vpop.permute.xlu1 %1907  ;;  %v1872_v26 = vsel %vm1853_vm11, %v1870_v0, 0.0  ;;  %v1972_v37 = vpop.permute.xlu0 %1971 }
 0x36c   : > { %v1912_v60 = vsel %vm1911_vm9, %v1908_v17, %v1910_v39  ;;  %v1913_v2 = vsel %vm1911_vm9, %v1910_v39, %v1908_v17  ;;  %v1813_v9 = vadd.f32 %v1812_v5, %v1778_v32  ;;  %v1874_v7 = vmul.f32 %v1873_v21, %v1872_v26  ;;  %v2350_v26 = vld [vmem:[%s2686_s26 + $0x8] sm:$0xff]  ;;  %v2352_v32 = vld [vmem:[%s2686_s26 + $0x18] sm:$0xff] }
 0x36d   : > { %v1901_v10 = vrot.slane %v1894_v27, %v2862_v48  ;;  %v1918_v38 = vcombine.low %v1912_v60, %v1913_v2 }
 0x36e   : > { %v1844_v19 = vadd.f32 %v1843_v6, %v1813_v9 }
 0x36f   : > { %v1925_v57 = vrot.slane %v1918_v38, %v2862_v48  ;;  %v1939_v53 = vpop.permute.xlu1 %1938  ;;  %v1903_v1 = vsel %vm1884_vm7, %v1901_v10, 0.0 }
 0x370   : > { %v1943_v8 = vsel %vm1942_vm15, %v1939_v53, %v1941_v42  ;;  %v1944_v36 = vsel %vm1942_vm15, %v1941_v42, %v1939_v53  ;;  %v1905_v18 = vmul.f32 %v1904_v25, %v1903_v1  ;;  %v1875_v31 = vadd.f32 %v1874_v7, %v1844_v19  ;;  %v2354_v1 = vld [vmem:[%s2686_s26 + $0x28] sm:$0xff]  ;;  %v2356_v7 = vld [vmem:[%s2686_s26 + $0x38] sm:$0xff] }
 0x371   : > { %v1932_v28 = vrot.slane %v1925_v57, %v2862_v48  ;;  %v1949_v50 = vcombine.low %v1943_v8, %v1944_v36  ;;  %v2351_v57 = vld [vmem:[%s2686_s26 + $0x10] sm:$0xff]  ;;  %v2353_v8 = vld [vmem:[%s2686_s26 + $0x20] sm:$0xff] }
 0x372   : > { %v1906_v51 = vadd.f32 %v1905_v18, %v1875_v31 }
 0x373   : > { %v1934_v24 = vsel %vm1915_vm5, %v1932_v28, 0.0  ;;  %v1956_v43 = vrot.slane %v1949_v50, %v2862_v48  ;;  %v1970_v46 = vpop.permute.xlu1 %1969  ;;  %v2355_v50 = vld [vmem:[%s2686_s26 + $0x30] sm:$0xff] }
 0x374   : > { %v1974_v63 = vsel %vm1973_vm0, %v1970_v46, %v1972_v37  ;;  %v1975_v62 = vsel %vm1973_vm0, %v1972_v37, %v1970_v46  ;;  %v1936_v39 = vmul.f32 %v1935_v33, %v1934_v24 }
 0x375   : > { %v1963_v13 = vrot.slane %v1956_v43, %v2862_v48  ;;  %v1980_v59 = vcombine.low %v1974_v63, %v1975_v62 }
 0x376   : > { %v1937_v45 = vadd.f32 %v1936_v39, %v1906_v51 }
 0x377   : > { %v1965_v52 = vsel %vm1946_vm2, %v1963_v13, 0.0  ;;  %v1987_v56 = vrot.slane %v1980_v59, %v2862_v48 }
 0x378   : > { %v1967_v3 = vmul.f32 %v1966_v40, %v1965_v52 }
 0x379   : > { %v1994_v61 = vrot.slane %v1987_v56, %v2862_v48 }
 0x37a   : > { %v1968_v49 = vadd.f32 %v1967_v3, %v1937_v45 }
 0x37b   : > { %v1996_v30 = vsel %vm1977_vm12, %v1994_v61, 0.0 }
 0x37c   : > { %v1998_v41 = vmul.f32 %v1997_v58, %v1996_v30 }
 0x37e   : > { %v1999_v44 = vadd.f32 %v1998_v41, %v1968_v49 }
 0x380   : > { %v2211_v34 = vmul.f32 -1.442695, %v1999_v44 }
 0x382   : > { %2344 = vpow2.f32 %v2211_v34 }
 0x38f   : > { %v2345_v4 = vpop.eup %2344 }
 0x390   : > { %v2003_v54 = vadd.f32 1.0, %v2345_v4 }
 0x392   : > { %2346 = vrcp.f32 %v2003_v54 }
 0x39f   : > { %v2347_v29 = vpop.eup %2346 }
 0x3a0   : > { %v2010_v0 = vrot.slane %v2347_v29, %v2009_v20  ;;  %v2014_v27 = vrot.slane %v2347_v29, %v2013_v23 }
 0x3a2   : > { %v2017_v48 = vmul.f32 %v2757_v12, %v2010_v0  ;;  %v2018_v17 = vmul.f32 %v2757_v12, %v2014_v27  ;;  %v2019_v47 = vmul.f32 %v2755_v11, %v2010_v0  ;;  %v2020_v35 = vmul.f32 %v2755_v11, %v2014_v27 }
 0x3a3   : > { %v2021_v60 = vmul.f32 %v2761_v16, %v2010_v0  ;;  %v2022_v2 = vmul.f32 %v2761_v16, %v2014_v27  ;;  %v2023_v14 = vmul.f32 %v2759_v15, %v2010_v0  ;;  %v2024_v22 = vmul.f32 %v2759_v15, %v2014_v27  ;;  %v2349_v15 = vld [vmem:[%s2686_s26] sm:$0xff]  ;;  %s2523_s26 = smov [#allocation7]  }
 0x3a4   : > { %v2025_v42 = vadd.f32 1.0, %v2017_v48  ;;  %v2026_v10 = vadd.f32 1.0, %v2018_v17  ;;  %v2027_v12 = vadd.f32 1.0, %v2019_v47  ;;  %v2028_v38 = vadd.f32 1.0, %v2020_v35  ;;  %s2404_s2 = sshll.u32 %s2523_s26, 4  ;;  %s2405_s2 = int_to_ptr.vmem [resolvable:$false] %s2404_s2 }
 0x3a5   : > { %v2029_v11 = vadd.f32 1.0, %v2021_v60  ;;  %v2030_v16 = vadd.f32 1.0, %v2022_v2  ;;  %v2031_v55 = vadd.f32 1.0, %v2023_v14  ;;  %v2032_v5 = vadd.f32 1.0, %v2024_v22  ;;  %s2406_s0 = scalar_lea.vmem %s2405_s2, 2048  ;;  %p2407_p8 = scmp.lt.s32.totalorder %s3911_s16, %s2405_s2 }
 0x3a6   : > { %v2033_v21 = vmul.f32 %v2349_v15, %v2025_v42  ;;  %v2034_v25 = vmul.f32 %v2350_v26, %v2026_v10  ;;  %v2035_v53 = vmul.f32 %v2351_v57, %v2027_v12  ;;  %v2036_v6 = vmul.f32 %v2352_v32, %v2028_v38  ;;  %p2408_p9 = scmp.lt.s32.totalorder %s2406_s0, %s2400_s5 }
 0x3a7   : > { %v2037_v36 = vmul.f32 %v2353_v8, %v2029_v11  ;;  %v2038_v28 = vmul.f32 %v2354_v1, %v2030_v16  ;;  %v2039_v9 = vmul.f32 %v2355_v50, %v2031_v55  ;;  %v2040_v37 = vmul.f32 %v2356_v7, %v2032_v5 }
 0x3a8   : > { %2041 = vst [vmem:[%s3895_s19] sm:$0xff] %v2033_v21  ;;  %2042 = vst [vmem:[%s3895_s19 + $0x8] sm:$0xff] %v2034_v25  ;;  %p2409_p10 = por %p2408_p9, %p2407_p8 }
 0x3a9   : > { %2043 = vst [vmem:[%s3895_s19 + $0x10] sm:$0xff] %v2035_v53  ;;  %2044 = vst [vmem:[%s3895_s19 + $0x18] sm:$0xff] %v2036_v6 }
 0x3aa   : > { %2045 = vst [vmem:[%s3895_s19 + $0x20] sm:$0xff] %v2037_v36  ;;  %2046 = vst [vmem:[%s3895_s19 + $0x28] sm:$0xff] %v2038_v28  ;;  %p2410_p1 = pnand %p2409_p10, %p2403_p7 }
 0x3ab   : > { %2047 = vst [vmem:[%s3895_s19 + $0x30] sm:$0xff] %v2039_v9  ;;  %2048 = vst [vmem:[%s3895_s19 + $0x38] sm:$0xff] %v2040_v37 }
 0x3ac   : > { %2413 = shalt.err (!%p2410_p1)
}
 0x3ad   : > { %s2414_s4 = scalar_lea.hbm %s3905_s7, 1024  ;;  %s2418_s14 = scalar_lea.hbm %s3969_s6, 2048 }
 0x3ae   : > { %p2415_p4 = scmp.ne.s32.totalorder %s3905_s7, %s2414_s4  ;;  %p2419_p6 = scmp.lt.s32.totalorder %s3905_s7, %s3969_s6 }
 0x3af   : > { %p2420_p13 = scmp.lt.s32.totalorder %s2418_s14, %s2414_s4 }
 0x3b0   : > { %p2416_p11 = pnand %p2415_p4, %p4049_p0 }
 0x3b1   : > { %p2421_p3 = por %p2420_p13, %p2419_p6 }
 0x3b2   : > { %p2417_p5 = pneg %p2416_p11 }
 0x3b4   : > { %p2422_p12 = pnand %p2421_p3, %p2417_p5 }
 0x3b6   : > { %2425 = shalt.err (!%p2422_p12)
}
 0x3b7   : > { %s2524_s8 = smov 256   ;;  %s4050_s17 = smov 16  }
 0x3b8   : > { %2225 = dma.vmem_to_hbm [thread:$0]  (%p4049_p0), %s3911_s16, 1024, %s3905_s7, %s2050_s12, %s2524_s8, %s2524_s8, %s4050_s17  }
 0x3b9 PF: > { %s2078_s29 = sand.u32 1, %s2456_s21   ;;  %p4051_p2 = scmp.ne.s32.totalorder %s3984_s10, 0 }
 0x3ba   : > { %p4052_p7 = scmp.ge.s32.totalorder %s2468_s24, 2  ;;  %s2079_s13 = scalar_lea.sflag [#allocation4], %s2078_s29 }
 0x3bc   : > { %p2236_p8 = pnand %p4052_p7, %p4051_p2 }
 0x3be   : > { %p2237_p9 = pneg %p2236_p8 }
 0x3c0   : > { %2451 = dma.done.wait (%p2237_p9), %s2079_s13, 1024  }
 0x3c1   : > { %2453 = vsyncadd (%p2237_p9), %s2079_s13, 4294966272  ;;  %p20_p10 = scmp.ge.s32.totalorder %s2585_s27, 4   ;;  %s4053_s21 = smov %s2460_s22 }
 0x3c2   : > { %s4054_s22 = smov %s2464_s23  ;;  %s4055_s23 = smov %s2597_s30 }
 0x3c3   : > { %s4056_s24 = smov %s2585_s27  ;;  %22 = sbr.rel (!%p20_p10) target bundleno = 12 (0xc), region = 94 }
 0x3c8   :  { %2084 = vsyncpa [#allocation3], 1 }
 0x3c9   :  { %2086 = vsyncpa [#allocation3 + $0x1], 1 }
 0x3ca   :  { %2087 = vsyncpa [#allocation4], 1 }
 0x3cb   :  { %2089 = vsyncpa [#allocation4 + $0x1], 1 }
 0x3cc   :  { %2090 = vsyncpa [#allocation5], 1 }
 0x3cd   :  { %2092 = vsyncpa [#allocation5 + $0x1], 1 }

</bundles_post_ra>
